<compile_context>
chip_gen: v7x
topology: tpu7x:2x2x1
jax: 0.10.0
libtpu: 0.0.40
codegen_flags: <defaults>
</compile_context>

<pallas_src>
import functools

import jax
import jax.numpy as jnp
from jax import lax
from jax.experimental import pallas as pl
from jax.experimental.pallas import tpu as pltpu

NC, NZ, NGF = 1, 100, 28
C1, C2, C3 = NGF * 4, NGF * 2, NGF          # 112, 56, 28
BN_EPS = 1e-5

ROW_TILE = 256      # batch-row tile for the layer-1 GEMM
COL_TILE = 256      # (B*Hout*Wout) lane tile for the conv-GEMM layers


def _round_up(x, m):
    return (x + m - 1) // m * m


# --------------------------------------------------------------------------------------
# Pallas kernels
# --------------------------------------------------------------------------------------
def _fc_bn_relu_kernel(z_ref, w_ref, scale_ref, shift_ref, o_ref):
    """o = relu((z @ w) * scale + shift). z:(tb,NZ) bf16, w:(NZ,N) bf16, scale/shift:(1,N) f32."""
    acc = jnp.dot(z_ref[...], w_ref[...], preferred_element_type=jnp.float32)   # MXU, f32 acc
    y = acc * scale_ref[...] + shift_ref[...]                                   # f32 epilogue
    o_ref[...] = jnp.maximum(y, 0.0).astype(o_ref.dtype)


def _convt_gemm_kernel(wt_ref, xt_ref, scale_ref, shift_ref, o_ref, *, act):
    """o = act((wt @ xt) * scale + shift).

    wt: (Cout, K*K*Cin) bf16 (resident), xt: (K*K*Cin, tn) bf16 patch tile,
    scale/shift: (Cout, 1) f32 (folded eval-mode BatchNorm), o: (Cout, tn).
    """
    acc = jnp.dot(wt_ref[...], xt_ref[...], preferred_element_type=jnp.float32)
    y = acc * scale_ref[...] + shift_ref[...]
    if act == "relu":
        y = jnp.maximum(y, 0.0)
    else:  # "tanh"
        y = jnp.tanh(y)
    o_ref[...] = y.astype(o_ref.dtype)


# --------------------------------------------------------------------------------------
# Layer wrappers (pallas_call setup; cheap layout glue stays in XLA)
# --------------------------------------------------------------------------------------
def _fold_bn(gamma, beta, mean, var):
    # TODO(synk): BatchNorm2d is applied in eval mode (running stats folded into a
    # per-channel scale/shift); training-mode batch statistics are not computed in-kernel.
    scale = gamma / jnp.sqrt(var + BN_EPS)
    shift = beta - mean * scale
    return scale.astype(jnp.float32), shift.astype(jnp.float32)


def _fc_layer(z2d, w_mat, scale, shift, out_dtype):
    """Layer 1: (B,NZ) @ (NZ, 4*4*C1) + folded BN + ReLU, tiled over batch rows."""
    B, K = z2d.shape
    N = w_mat.shape[1]
    tb = min(ROW_TILE, _round_up(B, 8))
    Bp = _round_up(B, tb)
    z_p = jnp.pad(z2d, ((0, Bp - B), (0, 0))).astype(jnp.bfloat16)
    w_bf = w_mat.astype(jnp.bfloat16)

    out = pl.pallas_call(
        _fc_bn_relu_kernel,
        out_shape=jax.ShapeDtypeStruct((Bp, N), out_dtype),
        grid=(Bp // tb,),
        in_specs=[
            pl.BlockSpec((tb, K), lambda i: (i, 0)),    # z tile
            pl.BlockSpec((K, N), lambda i: (0, 0)),     # weight (resident)
            pl.BlockSpec((1, N), lambda i: (0, 0)),     # BN scale
            pl.BlockSpec((1, N), lambda i: (0, 0)),     # BN shift
        ],
        out_specs=pl.BlockSpec((tb, N), lambda i: (i, 0)),
        compiler_params=pltpu.CompilerParams(dimension_semantics=("parallel",)),
    )(z_p, w_bf, scale, shift)
    return out[:B]


def _convt_gemm_layer(x_nhwc, w, stride, padding, scale, shift, act, out_dtype):
    """ConvTranspose2d(+BN)+activation.  x_nhwc: (B,H,W,Cin) bf16; w: (Cin,Cout,K,K) f32
    in PyTorch layout.  Returns (B, Hout, Wout, Cout) in out_dtype."""
    B, H, W, Cin = x_nhwc.shape
    _, Cout, K, _ = w.shape
    edge = K - 1 - padding
    Hout = (H - 1) * stride - 2 * padding + K
    Wout = (W - 1) * stride - 2 * padding + K

    # zero-upsample (interior pad = stride-1) + edge pad, in a single XLA pad op.
    # TODO(synk): this strided interleave / im2col gather has no clean in-kernel Pallas
    # equivalent (needs a scatter), so it stays in XLA; the GEMM + BN + activation below
    # is the Pallas kernel.
    zero = jnp.zeros((), x_nhwc.dtype)
    padded = lax.pad(
        x_nhwc, zero,
        ((0, 0, 0), (edge, edge, stride - 1), (edge, edge, stride - 1), (0, 0, 0)),
    )

    # im2col: patches[b, y, x, (kh*K + kw)*Cin + ci] = padded[b, y+kh, x+kw, ci]
    cols = [padded[:, kh:kh + Hout, kw:kw + Wout, :] for kh in range(K) for kw in range(K)]
    patches = jnp.concatenate(cols, axis=-1)                 # (B, Hout, Wout, K*K*Cin)
    Kdim = K * K * Cin
    M = B * Hout * Wout
    patches_t = patches.reshape(M, Kdim).T                   # (Kdim, M)
    Mp = _round_up(M, COL_TILE)
    patches_t = jnp.pad(patches_t, ((0, 0), (0, Mp - M))).astype(jnp.bfloat16)

    # Flipped-kernel weight matrix: wt[co, (kh*K+kw)*Cin + ci] = w[ci, co, K-1-kh, K-1-kw]
    wt = jnp.transpose(jnp.flip(w, (2, 3)), (1, 2, 3, 0)).reshape(Cout, Kdim)
    wt = wt.astype(jnp.bfloat16)

    out_t = pl.pallas_call(
        functools.partial(_convt_gemm_kernel, act=act),
        out_shape=jax.ShapeDtypeStruct((Cout, Mp), out_dtype),
        grid=(Mp // COL_TILE,),
        in_specs=[
            pl.BlockSpec((Cout, Kdim), lambda i: (0, 0)),        # weight (resident)
            pl.BlockSpec((Kdim, COL_TILE), lambda i: (0, i)),    # patch tile
            pl.BlockSpec((Cout, 1), lambda i: (0, 0)),           # BN scale
            pl.BlockSpec((Cout, 1), lambda i: (0, 0)),           # BN shift
        ],
        out_specs=pl.BlockSpec((Cout, COL_TILE), lambda i: (0, i)),
        compiler_params=pltpu.CompilerParams(dimension_semantics=("parallel",)),
    )(wt, patches_t, scale, shift)

    return out_t[:, :M].T.reshape(B, Hout, Wout, Cout)


def dc_generator_forward(z, params):
    """z: (B, NZ, 1, 1) f32 latent (NCHW).  Returns (B, NC, 28, 28) f32."""
    B = z.shape[0]
    z2d = z.reshape(B, NZ)

    # --- layer 1: ConvT(nz -> C1, k4, s1, p0) on a 1x1 input == dense matmul + BN + ReLU
    w1 = params["w1"]                                            # (NZ, C1, 4, 4)
    w1_mat = jnp.transpose(w1, (0, 2, 3, 1)).reshape(NZ, 4 * 4 * C1)
    s1, t1 = _fold_bn(*params["bn1"])
    s1_flat = jnp.tile(s1, 4 * 4)[None, :]                       # co is fastest-varying
    t1_flat = jnp.tile(t1, 4 * 4)[None, :]
    h = _fc_layer(z2d, w1_mat, s1_flat, t1_flat, jnp.bfloat16)   # (B, 4*4*C1)
    h = h.reshape(B, 4, 4, C1)                                   # NHWC

    # --- layer 2: ConvT(C1 -> C2, k3, s2, p1) + BN + ReLU
    s2, t2 = _fold_bn(*params["bn2"])
    h = _convt_gemm_layer(h, params["w2"], 2, 1, s2[:, None], t2[:, None],
                          "relu", jnp.bfloat16)                  # (B, 7, 7, C2)

    # --- layer 3: ConvT(C2 -> C3, k4, s2, p1) + BN + ReLU
    s3, t3 = _fold_bn(*params["bn3"])
    h = _convt_gemm_layer(h, params["w3"], 2, 1, s3[:, None], t3[:, None],
                          "relu", jnp.bfloat16)                  # (B, 14, 14, C3)

    # --- layer 4: ConvT(C3 -> NC, k4, s2, p1) + Tanh (no BN, no bias)
    ones = jnp.ones((NC, 1), jnp.float32)
    zeros = jnp.zeros((NC, 1), jnp.float32)
    out = _convt_gemm_layer(h, params["w4"], 2, 1, ones, zeros,
                            "tanh", jnp.float32)                 # (B, 28, 28, NC)

    return jnp.transpose(out, (0, 3, 1, 2))                      # NCHW (B, 1, 28, 28)


# --------------------------------------------------------------------------------------
# Deterministic params + pure-JAX reference (direct ConvTranspose2d definition)
# --------------------------------------------------------------------------------------
def init_params(key):
    ks = jax.random.split(key, 8)

    def w(k, shape):
        return 0.05 * jax.random.normal(k, shape, jnp.float32)

    def bn(k, c):
        kg, kb, km, kv = jax.random.split(k, 4)
        gamma = 1.0 + 0.1 * jax.random.normal(kg, (c,), jnp.float32)
        beta = 0.1 * jax.random.normal(kb, (c,), jnp.float32)
        mean = 0.1 * jax.random.normal(km, (c,), jnp.float32)
        var = jax.random.uniform(kv, (c,), jnp.float32, minval=0.5, maxval=1.5)
        return gamma, beta, mean, var

    return {
        "w1": w(ks[0], (NZ, C1, 4, 4)),
        "bn1": bn(ks[1], C1),
        "w2": w(ks[2], (C1, C2, 3, 3)),
        "bn2": bn(ks[3], C2),
        "w3": w(ks[4], (C2, C3, 4, 4)),
        "bn3": bn(ks[5], C3),
        "w4": w(ks[6], (C3, NC, 4, 4)),
    }


def _conv_transpose2d_ref(x, w, stride, padding):
    """Direct PyTorch ConvTranspose2d semantics: x NCHW, w (Cin, Cout, K, K)."""
    B, Ci, H, W = x.shape
    _, Co, K, _ = w.shape
    y = jnp.einsum("bcij,cokl->boijkl", x, w)
    Hf, Wf = (H - 1) * stride + K, (W - 1) * stride + K
    full = jnp.zeros((B, Co, Hf, Wf), x.dtype)
    for kh in range(K):
        for kw in range(K):
            full = full.at[:, :,
                           kh:kh + (H - 1) * stride + 1:stride,
                           kw:kw + (W - 1) * stride + 1:stride].add(y[:, :, :, :, kh, kw])
    Hout = (H - 1) * stride - 2 * padding + K
    Wout = (W - 1) * stride - 2 * padding + K
    return full[:, :, padding:padding + Hout, padding:padding + Wout]


def _bn_relu_ref(x, gamma, beta, mean, var):
    s = gamma / jnp.sqrt(var + BN_EPS)
    y = (x - mean[None, :, None, None]) * s[None, :, None, None] + beta[None, :, None, None]
    return jnp.maximum(y, 0.0)


def dc_generator_ref(z, params):
    h = _bn_relu_ref(_conv_transpose2d_ref(z, params["w1"], 1, 0), *params["bn1"])
    h = _bn_relu_ref(_conv_transpose2d_ref(h, params["w2"], 2, 1), *params["bn2"])
    h = _bn_relu_ref(_conv_transpose2d_ref(h, params["w3"], 2, 1), *params["bn3"])
    return jnp.tanh(_conv_transpose2d_ref(h, params["w4"], 2, 1))


if __name__ == "__main__":
    key = jax.random.PRNGKey(0)
    kz, kp = jax.random.split(key)
    B = 2
    z = jax.random.normal(kz, (B, NZ, 1, 1), jnp.float32)
    params = init_params(kp)

    fwd = jax.jit(dc_generator_forward)
    out = jax.block_until_ready(fwd(z, params))

    ref = dc_generator_ref(z, params)
    assert out.shape == (B, NC, 28, 28)
    # bf16 matmul operands + bf16 inter-layer activations => loosened tolerance.
    assert jnp.allclose(out, ref, atol=3e-2, rtol=3e-2), float(jnp.max(jnp.abs(out - ref)))
    print("KERNEL_OK")
</pallas_src>

<mosaic_0001>
module attributes {stable_mosaic.version = 11 : i64} {
  func.func @_fc_bn_relu_kernel(%arg0: i32, %arg1: memref<8x100xbf16, #tpu.memory_space<vmem>>, %arg2: memref<100x1792xbf16, #tpu.memory_space<vmem>>, %arg3: memref<1x1792xf32, #tpu.memory_space<vmem>>, %arg4: memref<1x1792xf32, #tpu.memory_space<vmem>>, %arg5: memref<8x1792xbf16, #tpu.memory_space<vmem>>) attributes {dimension_semantics = [#tpu.dimension_semantics<parallel>], iteration_bounds = array<i64: 1>, scalar_prefetch = 0 : i64, scratch_operands = 0 : i64, tpu.core_type = #tpu.core_type<tc>, window_params = [{transform_indices = @transform_0, window_bounds = array<i64: 8, 100>}, {pipeline_mode = #tpu.pipeline_mode<synchronous>, transform_indices = @transform_1, window_bounds = array<i64: 100, 1792>}, {pipeline_mode = #tpu.pipeline_mode<synchronous>, transform_indices = @transform_2, window_bounds = array<i64: 1, 1792>}, {pipeline_mode = #tpu.pipeline_mode<synchronous>, transform_indices = @transform_3, window_bounds = array<i64: 1, 1792>}, {transform_indices = @transform_4, window_bounds = array<i64: 8, 1792>}]} {
    %c0 = arith.constant 0 : index
    %c0_0 = arith.constant 0 : index
    %0 = vector.load %arg1[%c0, %c0_0] : memref<8x100xbf16, #tpu.memory_space<vmem>>, vector<8x100xbf16>
    %c0_1 = arith.constant 0 : index
    %c0_2 = arith.constant 0 : index
    %1 = vector.load %arg2[%c0_1, %c0_2] : memref<100x1792xbf16, #tpu.memory_space<vmem>>, vector<100x1792xbf16>
    %cst = arith.constant dense<0.000000e+00> : vector<8x1792xf32>
    %2 = tpu.matmul %0, %1, %cst {dimension_numbers = #tpu.dot_dimension_numbers<[1], [0], [0], [1], [0, 0, 1, 1], [], []>} : vector<8x100xbf16>, vector<100x1792xbf16>, vector<8x1792xf32> -> vector<8x1792xf32>
    %c0_3 = arith.constant 0 : index
    %c0_4 = arith.constant 0 : index
    %3 = vector.load %arg3[%c0_3, %c0_4] : memref<1x1792xf32, #tpu.memory_space<vmem>>, vector<1x1792xf32>
    %4 = vector.broadcast %3 : vector<1x1792xf32> to vector<8x1792xf32>
    %5 = arith.mulf %2, %4 : vector<8x1792xf32>
    %c0_5 = arith.constant 0 : index
    %c0_6 = arith.constant 0 : index
    %6 = vector.load %arg4[%c0_5, %c0_6] : memref<1x1792xf32, #tpu.memory_space<vmem>>, vector<1x1792xf32>
    %7 = vector.broadcast %6 : vector<1x1792xf32> to vector<8x1792xf32>
    %8 = arith.addf %5, %7 : vector<8x1792xf32>
    %cst_7 = arith.constant 0.000000e+00 : f32
    %9 = vector.broadcast %cst_7 : f32 to vector<8x1792xf32>
    %10 = arith.maximumf %8, %9 : vector<8x1792xf32>
    %11 = arith.truncf %10 : vector<8x1792xf32> to vector<8x1792xbf16>
    %c0_8 = arith.constant 0 : index
    %c0_9 = arith.constant 0 : index
    %12 = vector.load %arg5[%c0_8, %c0_9] : memref<8x1792xbf16, #tpu.memory_space<vmem>>, vector<8x1792xbf16>
    tpu.vector_store %arg5[%c0_8, %c0_9], %11 {strides = array<i32>} : memref<8x1792xbf16, #tpu.memory_space<vmem>>, vector<8x1792xbf16>,
    return
  }
  func.func @transform_0(%arg0: i32) -> (i32, i32) {
    %c0_i32 = arith.constant 0 : i32
    %c0_i32_0 = arith.constant 0 : i32
    return %arg0, %c0_i32 : i32, i32
  }
  func.func @transform_1(%arg0: i32) -> (i32, i32) {
    %c0_i32 = arith.constant 0 : i32
    %c0_i32_0 = arith.constant 0 : i32
    %c0_i32_1 = arith.constant 0 : i32
    return %c0_i32, %c0_i32_0 : i32, i32
  }
  func.func @transform_2(%arg0: i32) -> (i32, i32) {
    %c0_i32 = arith.constant 0 : i32
    %c0_i32_0 = arith.constant 0 : i32
    %c0_i32_1 = arith.constant 0 : i32
    return %c0_i32, %c0_i32_0 : i32, i32
  }
  func.func @transform_3(%arg0: i32) -> (i32, i32) {
    %c0_i32 = arith.constant 0 : i32
    %c0_i32_0 = arith.constant 0 : i32
    %c0_i32_1 = arith.constant 0 : i32
    return %c0_i32, %c0_i32_0 : i32, i32
  }
  func.func @transform_4(%arg0: i32) -> (i32, i32) {
    %c0_i32 = arith.constant 0 : i32
    %c0_i32_0 = arith.constant 0 : i32
    return %arg0, %c0_i32 : i32, i32
  }
}

module attributes {stable_mosaic.version = 11 : i64} {
  func.func @_convt_gemm_kernel(%arg0: i32, %arg1: memref<56x1008xbf16, #tpu.memory_space<vmem>>, %arg2: memref<1008x256xbf16, #tpu.memory_space<vmem>>, %arg3: memref<56x1xf32, #tpu.memory_space<vmem>>, %arg4: memref<56x1xf32, #tpu.memory_space<vmem>>, %arg5: memref<56x256xbf16, #tpu.memory_space<vmem>>) attributes {dimension_semantics = [#tpu.dimension_semantics<parallel>], iteration_bounds = array<i64: 1>, scalar_prefetch = 0 : i64, scratch_operands = 0 : i64, tpu.core_type = #tpu.core_type<tc>, window_params = [{pipeline_mode = #tpu.pipeline_mode<synchronous>, transform_indices = @transform_0, window_bounds = array<i64: 56, 1008>}, {transform_indices = @transform_1, window_bounds = array<i64: 1008, 256>}, {pipeline_mode = #tpu.pipeline_mode<synchronous>, transform_indices = @transform_2, window_bounds = array<i64: 56, 1>}, {pipeline_mode = #tpu.pipeline_mode<synchronous>, transform_indices = @transform_3, window_bounds = array<i64: 56, 1>}, {transform_indices = @transform_4, window_bounds = array<i64: 56, 256>}]} {
    %c0 = arith.constant 0 : index
    %c0_0 = arith.constant 0 : index
    %0 = vector.load %arg1[%c0, %c0_0] : memref<56x1008xbf16, #tpu.memory_space<vmem>>, vector<56x1008xbf16>
    %c0_1 = arith.constant 0 : index
    %c0_2 = arith.constant 0 : index
    %1 = vector.load %arg2[%c0_1, %c0_2] : memref<1008x256xbf16, #tpu.memory_space<vmem>>, vector<1008x256xbf16>
    %cst = arith.constant dense<0.000000e+00> : vector<56x256xf32>
    %2 = tpu.matmul %0, %1, %cst {dimension_numbers = #tpu.dot_dimension_numbers<[1], [0], [0], [1], [0, 0, 1, 1], [], []>} : vector<56x1008xbf16>, vector<1008x256xbf16>, vector<56x256xf32> -> vector<56x256xf32>
    %c0_3 = arith.constant 0 : index
    %c0_4 = arith.constant 0 : index
    %3 = vector.load %arg3[%c0_3, %c0_4] : memref<56x1xf32, #tpu.memory_space<vmem>>, vector<56x1xf32>
    %4 = vector.broadcast %3 : vector<56x1xf32> to vector<56x256xf32>
    %5 = arith.mulf %2, %4 : vector<56x256xf32>
    %c0_5 = arith.constant 0 : index
    %c0_6 = arith.constant 0 : index
    %6 = vector.load %arg4[%c0_5, %c0_6] : memref<56x1xf32, #tpu.memory_space<vmem>>, vector<56x1xf32>
    %7 = vector.broadcast %6 : vector<56x1xf32> to vector<56x256xf32>
    %8 = arith.addf %5, %7 : vector<56x256xf32>
    %cst_7 = arith.constant 0.000000e+00 : f32
    %9 = vector.broadcast %cst_7 : f32 to vector<56x256xf32>
    %10 = arith.maximumf %8, %9 : vector<56x256xf32>
    %11 = arith.truncf %10 : vector<56x256xf32> to vector<56x256xbf16>
    %c0_8 = arith.constant 0 : index
    %c0_9 = arith.constant 0 : index
    %12 = vector.load %arg5[%c0_8, %c0_9] : memref<56x256xbf16, #tpu.memory_space<vmem>>, vector<56x256xbf16>
    tpu.vector_store %arg5[%c0_8, %c0_9], %11 {strides = array<i32>} : memref<56x256xbf16, #tpu.memory_space<vmem>>, vector<56x256xbf16>,
    return
  }
  func.func @transform_0(%arg0: i32) -> (i32, i32) {
    %c0_i32 = arith.constant 0 : i32
    %c0_i32_0 = arith.constant 0 : i32
    %c0_i32_1 = arith.constant 0 : i32
    return %c0_i32, %c0_i32_0 : i32, i32
  }
  func.func @transform_1(%arg0: i32) -> (i32, i32) {
    %c0_i32 = arith.constant 0 : i32
    %c0_i32_0 = arith.constant 0 : i32
    return %c0_i32, %arg0 : i32, i32
  }
  func.func @transform_2(%arg0: i32) -> (i32, i32) {
    %c0_i32 = arith.constant 0 : i32
    %c0_i32_0 = arith.constant 0 : i32
    %c0_i32_1 = arith.constant 0 : i32
    return %c0_i32, %c0_i32_0 : i32, i32
  }
  func.func @transform_3(%arg0: i32) -> (i32, i32) {
    %c0_i32 = arith.constant 0 : i32
    %c0_i32_0 = arith.constant 0 : i32
    %c0_i32_1 = arith.constant 0 : i32
    return %c0_i32, %c0_i32_0 : i32, i32
  }
  func.func @transform_4(%arg0: i32) -> (i32, i32) {
    %c0_i32 = arith.constant 0 : i32
    %c0_i32_0 = arith.constant 0 : i32
    return %c0_i32, %arg0 : i32, i32
  }
}

module attributes {stable_mosaic.version = 11 : i64} {
  func.func @_convt_gemm_kernel(%arg0: i32, %arg1: memref<28x896xbf16, #tpu.memory_space<vmem>>, %arg2: memref<896x256xbf16, #tpu.memory_space<vmem>>, %arg3: memref<28x1xf32, #tpu.memory_space<vmem>>, %arg4: memref<28x1xf32, #tpu.memory_space<vmem>>, %arg5: memref<28x256xbf16, #tpu.memory_space<vmem>>) attributes {dimension_semantics = [#tpu.dimension_semantics<parallel>], iteration_bounds = array<i64: 2>, scalar_prefetch = 0 : i64, scratch_operands = 0 : i64, tpu.core_type = #tpu.core_type<tc>, window_params = [{pipeline_mode = #tpu.pipeline_mode<synchronous>, transform_indices = @transform_0, window_bounds = array<i64: 28, 896>}, {transform_indices = @transform_1, window_bounds = array<i64: 896, 256>}, {pipeline_mode = #tpu.pipeline_mode<synchronous>, transform_indices = @transform_2, window_bounds = array<i64: 28, 1>}, {pipeline_mode = #tpu.pipeline_mode<synchronous>, transform_indices = @transform_3, window_bounds = array<i64: 28, 1>}, {transform_indices = @transform_4, window_bounds = array<i64: 28, 256>}]} {
    %c0 = arith.constant 0 : index
    %c0_0 = arith.constant 0 : index
    %0 = vector.load %arg1[%c0, %c0_0] : memref<28x896xbf16, #tpu.memory_space<vmem>>, vector<28x896xbf16>
    %c0_1 = arith.constant 0 : index
    %c0_2 = arith.constant 0 : index
    %1 = vector.load %arg2[%c0_1, %c0_2] : memref<896x256xbf16, #tpu.memory_space<vmem>>, vector<896x256xbf16>
    %cst = arith.constant dense<0.000000e+00> : vector<28x256xf32>
    %2 = tpu.matmul %0, %1, %cst {dimension_numbers = #tpu.dot_dimension_numbers<[1], [0], [0], [1], [0, 0, 1, 1], [], []>} : vector<28x896xbf16>, vector<896x256xbf16>, vector<28x256xf32> -> vector<28x256xf32>
    %c0_3 = arith.constant 0 : index
    %c0_4 = arith.constant 0 : index
    %3 = vector.load %arg3[%c0_3, %c0_4] : memref<28x1xf32, #tpu.memory_space<vmem>>, vector<28x1xf32>
    %4 = vector.broadcast %3 : vector<28x1xf32> to vector<28x256xf32>
    %5 = arith.mulf %2, %4 : vector<28x256xf32>
    %c0_5 = arith.constant 0 : index
    %c0_6 = arith.constant 0 : index
    %6 = vector.load %arg4[%c0_5, %c0_6] : memref<28x1xf32, #tpu.memory_space<vmem>>, vector<28x1xf32>
    %7 = vector.broadcast %6 : vector<28x1xf32> to vector<28x256xf32>
    %8 = arith.addf %5, %7 : vector<28x256xf32>
    %cst_7 = arith.constant 0.000000e+00 : f32
    %9 = vector.broadcast %cst_7 : f32 to vector<28x256xf32>
    %10 = arith.maximumf %8, %9 : vector<28x256xf32>
    %11 = arith.truncf %10 : vector<28x256xf32> to vector<28x256xbf16>
    %c0_8 = arith.constant 0 : index
    %c0_9 = arith.constant 0 : index
    %12 = vector.load %arg5[%c0_8, %c0_9] : memref<28x256xbf16, #tpu.memory_space<vmem>>, vector<28x256xbf16>
    tpu.vector_store %arg5[%c0_8, %c0_9], %11 {strides = array<i32>} : memref<28x256xbf16, #tpu.memory_space<vmem>>, vector<28x256xbf16>,
    return
  }
  func.func @transform_0(%arg0: i32) -> (i32, i32) {
    %c0_i32 = arith.constant 0 : i32
    %c0_i32_0 = arith.constant 0 : i32
    %c0_i32_1 = arith.constant 0 : i32
    return %c0_i32, %c0_i32_0 : i32, i32
  }
  func.func @transform_1(%arg0: i32) -> (i32, i32) {
    %c0_i32 = arith.constant 0 : i32
    %c0_i32_0 = arith.constant 0 : i32
    return %c0_i32, %arg0 : i32, i32
  }
  func.func @transform_2(%arg0: i32) -> (i32, i32) {
    %c0_i32 = arith.constant 0 : i32
    %c0_i32_0 = arith.constant 0 : i32
    %c0_i32_1 = arith.constant 0 : i32
    return %c0_i32, %c0_i32_0 : i32, i32
  }
  func.func @transform_3(%arg0: i32) -> (i32, i32) {
    %c0_i32 = arith.constant 0 : i32
    %c0_i32_0 = arith.constant 0 : i32
    %c0_i32_1 = arith.constant 0 : i32
    return %c0_i32, %c0_i32_0 : i32, i32
  }
  func.func @transform_4(%arg0: i32) -> (i32, i32) {
    %c0_i32 = arith.constant 0 : i32
    %c0_i32_0 = arith.constant 0 : i32
    return %c0_i32, %arg0 : i32, i32
  }
}

module attributes {stable_mosaic.version = 11 : i64} {
  func.func @_convt_gemm_kernel(%arg0: i32, %arg1: memref<1x448xbf16, #tpu.memory_space<vmem>>, %arg2: memref<448x256xbf16, #tpu.memory_space<vmem>>, %arg3: memref<1x1xf32, #tpu.memory_space<vmem>>, %arg4: memref<1x1xf32, #tpu.memory_space<vmem>>, %arg5: memref<1x256xf32, #tpu.memory_space<vmem>>) attributes {dimension_semantics = [#tpu.dimension_semantics<parallel>], iteration_bounds = array<i64: 7>, scalar_prefetch = 0 : i64, scratch_operands = 0 : i64, tpu.core_type = #tpu.core_type<tc>, window_params = [{pipeline_mode = #tpu.pipeline_mode<synchronous>, transform_indices = @transform_0, window_bounds = array<i64: 1, 448>}, {transform_indices = @transform_1, window_bounds = array<i64: 448, 256>}, {pipeline_mode = #tpu.pipeline_mode<synchronous>, transform_indices = @transform_2, window_bounds = array<i64: 1, 1>}, {pipeline_mode = #tpu.pipeline_mode<synchronous>, transform_indices = @transform_3, window_bounds = array<i64: 1, 1>}, {transform_indices = @transform_4, window_bounds = array<i64: 1, 256>}]} {
    %c0 = arith.constant 0 : index
    %c0_0 = arith.constant 0 : index
    %0 = vector.load %arg1[%c0, %c0_0] : memref<1x448xbf16, #tpu.memory_space<vmem>>, vector<1x448xbf16>
    %c0_1 = arith.constant 0 : index
    %c0_2 = arith.constant 0 : index
    %1 = vector.load %arg2[%c0_1, %c0_2] : memref<448x256xbf16, #tpu.memory_space<vmem>>, vector<448x256xbf16>
    %cst = arith.constant dense<0.000000e+00> : vector<1x256xf32>
    %2 = tpu.matmul %0, %1, %cst {dimension_numbers = #tpu.dot_dimension_numbers<[1], [0], [0], [1], [0, 0, 1, 1], [], []>} : vector<1x448xbf16>, vector<448x256xbf16>, vector<1x256xf32> -> vector<1x256xf32>
    %c0_3 = arith.constant 0 : index
    %c0_4 = arith.constant 0 : index
    %3 = vector.load %arg3[%c0_3, %c0_4] : memref<1x1xf32, #tpu.memory_space<vmem>>, vector<1x1xf32>
    %4 = vector.broadcast %3 : vector<1x1xf32> to vector<1x256xf32>
    %5 = arith.mulf %2, %4 : vector<1x256xf32>
    %c0_5 = arith.constant 0 : index
    %c0_6 = arith.constant 0 : index
    %6 = vector.load %arg4[%c0_5, %c0_6] : memref<1x1xf32, #tpu.memory_space<vmem>>, vector<1x1xf32>
    %7 = vector.broadcast %6 : vector<1x1xf32> to vector<1x256xf32>
    %8 = arith.addf %5, %7 : vector<1x256xf32>
    %9 = math.tanh %8 : vector<1x256xf32>
    %c0_7 = arith.constant 0 : index
    %c0_8 = arith.constant 0 : index
    %10 = vector.load %arg5[%c0_7, %c0_8] : memref<1x256xf32, #tpu.memory_space<vmem>>, vector<1x256xf32>
    tpu.vector_store %arg5[%c0_7, %c0_8], %9 {strides = array<i32>} : memref<1x256xf32, #tpu.memory_space<vmem>>, vector<1x256xf32>,
    return
  }
  func.func @transform_0(%arg0: i32) -> (i32, i32) {
    %c0_i32 = arith.constant 0 : i32
    %c0_i32_0 = arith.constant 0 : i32
    %c0_i32_1 = arith.constant 0 : i32
    return %c0_i32, %c0_i32_0 : i32, i32
  }
  func.func @transform_1(%arg0: i32) -> (i32, i32) {
    %c0_i32 = arith.constant 0 : i32
    %c0_i32_0 = arith.constant 0 : i32
    return %c0_i32, %arg0 : i32, i32
  }
  func.func @transform_2(%arg0: i32) -> (i32, i32) {
    %c0_i32 = arith.constant 0 : i32
    %c0_i32_0 = arith.constant 0 : i32
    %c0_i32_1 = arith.constant 0 : i32
    return %c0_i32, %c0_i32_0 : i32, i32
  }
  func.func @transform_3(%arg0: i32) -> (i32, i32) {
    %c0_i32 = arith.constant 0 : i32
    %c0_i32_0 = arith.constant 0 : i32
    %c0_i32_1 = arith.constant 0 : i32
    return %c0_i32, %c0_i32_0 : i32, i32
  }
  func.func @transform_4(%arg0: i32) -> (i32, i32) {
    %c0_i32 = arith.constant 0 : i32
    %c0_i32_0 = arith.constant 0 : i32
    return %c0_i32, %arg0 : i32, i32
  }
}

</mosaic_0001>

<bundles_post_ra>
// kernel: tile.13
= control target key start
LH: loop header
LB: loop body
LE: loop exit
PB: predicated region body
PF: predicated region fallthrough
CT: control target
= control target key end

     0   :  { %s28_s0 = inlined_call_operand.vmem [shape: f32[112], index: 0, kind: input, shape index: {}]   ;;  %s29_s1 = inlined_call_operand.vmem [shape: f32[16,112], index: 1, kind: output, shape index: {}]  }
   0x1   :  { %v4_v0 = vld [vmem:[%s28_s0] ss:$0 sm:$0xff] }
   0x2   :  { %5 = vst [vmem:[%s29_s1] sm:$0xff] %v4_v0  ;;  %8 = vst [vmem:[%s29_s1 + $0x8] sm:$0xff] %v4_v0 }

// kernel: tile.14
= control target key start
LH: loop header
LB: loop body
LE: loop exit
PB: predicated region body
PF: predicated region fallthrough
CT: control target
= control target key end

     0   :  { %s7_s6 = smov 3  ;;  %s10_s7 = smov 3  ;;  %vm12_vm0 = vcmask 130048   ;;  %vm43_vm1 = vcmask 392192   ;;  %vm27_vm2 = vcmask 261120   ;;  %vm47_vm3 = vcmask 523264   ;;  %s350_s0 = inlined_call_operand.vmem [shape: f32[16,112], index: 0, kind: input, shape index: {}]   ;;  %s351_s1 = inlined_call_operand.vmem [shape: f32[1,1792], index: 1, kind: output, shape index: {}]  }
   0x1   :  { %v204_v0 = vld [vmem:[%s350_s0 + $0x9] ss:$-8 sm:%s7_s6]   ;;  %s38_s12 = smov 3  ;;  %s41_s15 = smov 3  ;;  %vm31_vm4 = vcmask 654336   ;;  %vm16_vm5 = vcmask 785408  }
   0x2   :  { %v205_v1 = vld [vmem:[%s350_s0 + $0x1] ss:$8 sm:%s10_s7]   ;;  %v208_v3 = vld [vmem:[%s350_s0 + $0xb] ss:$-8 sm:%s38_s12]   ;;  %s237_s16 = smov 112   ;;  %s22_s19 = smov 3 }
   0x3   :  { %v13_v2 = vsel %vm12_vm0, %v205_v1, %v204_v0  ;;  %v209_v4 = vld [vmem:[%s350_s0 + $0xb] ss:$-8 sm:%s41_s15]   ;;  %s25_s20 = smov 3  ;;  %v206_v6 = vld [vmem:[%s350_s0 + $0xa] ss:$-8 sm:%s22_s19]   ;;  %s54_s25 = smov 3 }
   0x4   :  { %14 = vrot.lane.b32.xlu0 %v13_v2, %s237_s16  ;;  %v44_v5 = vsel %vm43_vm1, %v209_v4, %v208_v3  ;;  %v207_v7 = vld [vmem:[%s350_s0 + $0xa] ss:$-8 sm:%s25_s20]   ;;  %s238_s26 = smov 80   ;;  %s57_s29 = smov 3  ;;  %vm4_vm6 = vcmask 916480   ;;  %vm19_vm7 = vcmask 1048448  }
   0x5   :  { %45 = vrot.lane.b32.xlu1 %v44_v5, %s238_s26  ;;  %v28_v8 = vsel %vm27_vm2, %v207_v7, %v206_v6  ;;  %v210_v9 = vld [vmem:[%s350_s0 + $0x4] ss:$8 sm:%s54_s25]   ;;  %s70_s3 = smov 3  ;;  %s73_s4 = smov 3  ;;  %vm34_vm8 = vcmask 1048320   ;;  %vm50_vm9 = vcmask 1048192  }
   0x6   :  { %v211_v10 = vld [vmem:[%s350_s0 + $0xc] ss:$-8 sm:%s57_s29]   ;;  %s239_s5 = smov 96   ;;  %v212_v12 = vld [vmem:[%s350_s0 + $0xd] ss:$-8 sm:%s70_s3]   ;;  %s86_s8 = smov 3 }
   0x7   :  { %v60_v11 = vsel %vm47_vm3, %v211_v10, %v210_v9  ;;  %v213_v13 = vld [vmem:[%s350_s0 + $0x5] ss:$8 sm:%s73_s4]   ;;  %v214_v14 = vld [vmem:[%s350_s0 + $0xe] ss:$-8 sm:%s86_s8]   ;;  %s89_s13 = smov 3  ;;  %s240_s14 = smov 64  }
   0x8   :  { %29 = vrot.lane.b32.xlu0 %v28_v8, %s239_s5  ;;  %v76_v15 = vsel %vm31_vm4, %v213_v13, %v212_v12  ;;  %v215_v16 = vld [vmem:[%s350_s0 + $0xe] ss:$-8 sm:%s89_s13]   ;;  %s102_s17 = smov 3  ;;  %s2_s18 = smov 3  ;;  %vm66_vm10 = vcmask 1048064   ;;  %vm82_vm11 = vcmask 1047936  }
   0x9   :  { %61 = vrot.lane.b32.xlu1 %v60_v11, %s240_s14  ;;  %v92_v17 = vsel %vm16_vm5, %v215_v16, %v214_v14  ;;  %s241_s19 = smov 48   ;;  %v3_v18 = vld [vmem:[%s350_s0] ss:$8 sm:%s2_s18]   ;;  %s243_s24 = smov 16   ;;  %vm98_vm12 = vcmask 1047808   ;;  %vm106_vm13 = vcmask 1047680  }
   0xa   :  { %v216_v19 = vld [vmem:[%s350_s0 + $0xf] ss:$-8 sm:%s102_s17]   ;;  %5 = vst.msk [vmem:[#allocation0] ss:$56 sm:$0x3] %vm4_vm6, %v3_v18   ;;  %s242_s0 = smov 32  }
   0xc   :  { %77 = vrot.lane.b32.xlu0 %v76_v15, %s241_s19 }
   0xd   :  { %93 = vrot.lane.b32.xlu1 %v92_v17, %s242_s0 }
  0x10   :  { %104 = vrot.lane.b32.xlu0 %v216_v19, %s243_s24 }
  0x76   :  { %v15_v20 = vpop.permute.xlu0 %14  }
  0x77   :  { %18 = vst.msk [vmem:[#allocation0 + $0x40] ss:$-56 sm:$0x3] %vm16_vm5, %v15_v20   ;;  %v46_v21 = vpop.permute.xlu1 %45  }
  0x78   :  { %20 = vst.msk [vmem:[#allocation0] ss:$56 sm:$0x3] %vm19_vm7, %v15_v20  }
  0x79   :  { %49 = vst.msk [vmem:[#allocation0 + $0x50] ss:$-56 sm:$0x3] %vm47_vm3, %v46_v21  }
  0x7a   :  { %v30_v22 = vpop.permute.xlu0 %29  }
  0x7b   :  { %33 = vst.msk [vmem:[#allocation0 + $0x48] ss:$-56 sm:$0x3] %vm31_vm4, %v30_v22   ;;  %v62_v23 = vpop.permute.xlu1 %61  }
  0x7c   :  { %36 = vst.msk [vmem:[#allocation0 + $0x40] ss:$-56 sm:$0x3] %vm34_vm8, %v30_v22  }
  0x7d   :  { %52 = vst.msk [vmem:[#allocation0 + $0x48] ss:$-56 sm:$0x3] %vm50_vm9, %v46_v21  }
  0x7e   :  { %65 = vst.msk [vmem:[#allocation0 + $0x20] ss:$56 sm:$0x3] %vm43_vm1, %v62_v23   ;;  %v78_v26 = vpop.permute.xlu0 %77  }
  0x7f   :  { %68 = vst.msk [vmem:[#allocation0 + $0x50] ss:$-56 sm:$0x3] %vm66_vm10, %v62_v23   ;;  %v112_v24 = vld [vmem:[#allocation0] sm:$0x1]  ;;  %v94_v27 = vpop.permute.xlu1 %93  }
  0x80   :  { %v151_v25 = vld [vmem:[#allocation0 + $0x38] sm:$0x1]  ;;  %114 = vst [vmem:[%s351_s1] sm:$0x1] %v112_v24  ;;  %81 = vst.msk [vmem:[#allocation0 + $0x60] ss:$-56 sm:$0x3] %vm27_vm2, %v78_v26  }
  0x81   :  { %223 = vst [vmem:[%s351_s1 + $0x7] sm:$0x1] %v151_v25  ;;  %84 = vst.msk [vmem:[#allocation0 + $0x20] ss:$56 sm:$0x3] %vm82_vm11, %v78_v26  }
  0x82   :  { %97 = vst.msk [vmem:[#allocation0 + $0x68] ss:$-56 sm:$0x3] %vm12_vm0, %v94_v27   ;;  %v105_v30 = vpop.permute.xlu0 %104  }
  0x83   :  { %100 = vst.msk [vmem:[#allocation0 + $0x60] ss:$-56 sm:$0x3] %vm98_vm12, %v94_v27   ;;  %v116_v28 = vld [vmem:[#allocation0 + $0x8] sm:$0x1] }
  0x84   :  { %v157_v29 = vld [vmem:[#allocation0 + $0x40] sm:$0x1]  ;;  %217 = vst [vmem:[%s351_s1 + $0x1] sm:$0x1] %v116_v28  ;;  %v121_v31 = vld [vmem:[#allocation0 + $0x10] sm:$0x1] }
  0x85   :  { %224 = vst [vmem:[%s351_s1 + $0x8] sm:$0x1] %v157_v29  ;;  %v163_v32 = vld [vmem:[#allocation0 + $0x48] sm:$0x1]  ;;  %218 = vst [vmem:[%s351_s1 + $0x2] sm:$0x1] %v121_v31 }
  0x86   :  { %108 = vst.msk [vmem:[#allocation0 + $0x68] ss:$-56 sm:$0x3] %vm106_vm13, %v105_v30   ;;  %v127_v33 = vld [vmem:[#allocation0 + $0x18] sm:$0x1] }
  0x87   :  { %v169_v34 = vld [vmem:[#allocation0 + $0x50] sm:$0x1]  ;;  %225 = vst [vmem:[%s351_s1 + $0x9] sm:$0x1] %v163_v32  ;;  %219 = vst [vmem:[%s351_s1 + $0x3] sm:$0x1] %v127_v33 }
  0x88   :  { %226 = vst [vmem:[%s351_s1 + $0xa] sm:$0x1] %v169_v34  ;;  %v133_v35 = vld [vmem:[#allocation0 + $0x20] sm:$0x1]  ;;  %v175_v36 = vld [vmem:[#allocation0 + $0x58] sm:$0x1] }
  0x89   :  { %220 = vst [vmem:[%s351_s1 + $0x4] sm:$0x1] %v133_v35  ;;  %227 = vst [vmem:[%s351_s1 + $0xb] sm:$0x1] %v175_v36 }
  0x8a   :  { %v139_v37 = vld [vmem:[#allocation0 + $0x28] sm:$0x1]  ;;  %v181_v38 = vld [vmem:[#allocation0 + $0x60] sm:$0x1] }
  0x8b   :  { %221 = vst [vmem:[%s351_s1 + $0x5] sm:$0x1] %v139_v37  ;;  %228 = vst [vmem:[%s351_s1 + $0xc] sm:$0x1] %v181_v38 }
  0x8d   :  { %v145_v39 = vld [vmem:[#allocation0 + $0x30] sm:$0x1]  ;;  %v187_v40 = vld [vmem:[#allocation0 + $0x68] sm:$0x1] }
  0x8e   :  { %222 = vst [vmem:[%s351_s1 + $0x6] sm:$0x1] %v145_v39  ;;  %229 = vst [vmem:[%s351_s1 + $0xd] sm:$0x1] %v187_v40 }

// kernel: dc_generator_forward.4
= control target key start
LH: loop header
LB: loop body
LE: loop exit
PB: predicated region body
PF: predicated region fallthrough
CT: control target
= control target key end

     0   :  { %v1423_v1 = vmov 0   ;;  %vm569_vm0 = vcmask 1041408   ;;  %vm565_vm1 = vcmask 818176   ;;  %s1841_s1 = inlined_call_operand.vmem [shape: bf16[100,1792], index: 1, kind: input, shape index: {}]   ;;  %s1842_s0 = inlined_call_operand.vmem [shape: bf16[8,100], index: 0, kind: input, shape index: {}]   ;;  %s1843_s2 = inlined_call_operand.vmem [shape: f32[1,1792], index: 2, kind: input, shape index: {}]   ;;  %s1844_s3 = inlined_call_operand.vmem [shape: f32[1,1792], index: 3, kind: input, shape index: {}]   ;;  %s1845_s4 = inlined_call_operand.vmem [shape: bf16[8,1792], index: 4, kind: output, shape index: {}]  }
   0x1   :  { %v1283_v0 = vld [vmem:[%s1841_s1 + $0x4] ss:$56 sps:$4 sm:$0xff]   ;;  %644 = vmatprep.mubr.bf16.mxu0 %v1423_v1  ;;  %685 = vmatprep.mubr.bf16.mxu1 %v1423_v1  ;;  %v1285_v2 = vld [vmem:[%s1841_s1] ss:$56 sps:$4 sm:$0xff]   ;;  %v1286_v3 = vld [vmem:[%s1841_s1 + $0x74] ss:$56 sps:$4 sm:$0xff]  }
   0x2   :  { %612 = vmatprep.subr.bf16.mxu0 %v1283_v0  ;;  %v1288_v4 = vld [vmem:[%s1841_s1 + $0x70] ss:$56 sps:$4 sm:$0xff]   ;;  %v1289_v5 = vld [vmem:[%s1841_s1 + $0xe4] ss:$56 sps:$4 sm:$0xff]   ;;  %v1291_v6 = vld [vmem:[%s1841_s1 + $0xe0] ss:$56 sps:$4 sm:$0xff]  }
   0x3   :  { %613 = vmatpush1.bf16.msra.mxu0 %v1285_v2  ;;  %v1292_v7 = vld [vmem:[%s1841_s1 + $0x154] ss:$56 sps:$4 sm:$0xff]   ;;  %v1305_v9 = vld [vmem:[%s1841_s1 + $0x8] ss:$56 sps:$4 sm:$0xff]   ;;  %v1295_v11 = vld [vmem:[%s1841_s1 + $0x1c4] ss:$56 sps:$4 sm:$0xff]  }
   0x4   :  { %614 = vmatprep.subr.bf16.mxu0 %v1286_v3  ;;  %v1303_v8 = vld [vmem:[%s1841_s1 + $0xc] ss:$56 sps:$4 sm:$0xff]   ;;  %v1294_v10 = vld [vmem:[%s1841_s1 + $0x150] ss:$56 sps:$4 sm:$0xff]   ;;  %v1309_v12 = vld [vmem:[%s1841_s1 + $0x7c] ss:$56 sps:$4 sm:$0xff]  }
   0x5   :  { %653 = vmatprep.subr.bf16.mxu1 %v1303_v8  ;;  %v1311_v13 = vld [vmem:[%s1841_s1 + $0x78] ss:$56 sps:$4 sm:$0xff]   ;;  %v1315_v14 = vld [vmem:[%s1841_s1 + $0xec] ss:$56 sps:$4 sm:$0xff]   ;;  %v1317_v17 = vld [vmem:[%s1841_s1 + $0xe8] ss:$56 sps:$4 sm:$0xff]  }
   0x6   :  { %654 = vmatpush1.bf16.msra.mxu1 %v1305_v9  ;;  %v1297_v15 = vld [vmem:[%s1841_s1 + $0x1c0] ss:$56 sps:$4 sm:$0xff]   ;;  %v1298_v16 = vld [vmem:[%s1841_s1 + $0x234] ss:$56 sps:$4 sm:$0xff]   ;;  %v1300_v20 = vld [vmem:[%s1841_s1 + $0x230] ss:$56 sps:$4 sm:$0xff]  }
   0x7   :  { %615 = vmatpush1.bf16.msra.mxu0 %v1288_v4  ;;  %655 = vmatprep.subr.bf16.mxu1 %v1309_v12  ;;  %v103_v18 = vld [vmem:[%s1841_s1 + $0x2a0] sm:$0x33]  ;;  %v1321_v19 = vld [vmem:[%s1841_s1 + $0x15c] ss:$56 sps:$4 sm:$0xff]   ;;  %v1323_v23 = vld [vmem:[%s1841_s1 + $0x158] ss:$56 sps:$4 sm:$0xff]  }
   0x8   :  { %616 = vmatprep.subr.bf16.mxu0 %v1289_v5  ;;  %v1241_v21 = vcombine.high %v103_v18, %v103_v18  ;;  %v1240_v22 = vcombine.low %v103_v18, %v103_v18  ;;  %v1327_v24 = vld [vmem:[%s1841_s1 + $0x1cc] ss:$56 sps:$4 sm:$0xff]   ;;  %v1329_v27 = vld [vmem:[%s1841_s1 + $0x1c8] ss:$56 sps:$4 sm:$0xff]   ;;  %v1333_v28 = vld [vmem:[%s1841_s1 + $0x23c] ss:$56 sps:$4 sm:$0xff]  }
   0x9   :  { %v1308_v26 = vld [vmem:[%s1841_s1 + $0x14] ss:$56 sps:$4 sm:$0xff]   ;;  %v1531_v29 = vld [vmem:[%s1842_s0] sm:$0xf]  ;;  %v1306_v31 = vld [vmem:[%s1841_s1 + $0x10] ss:$56 sps:$4 sm:$0xff]  }
   0xa   :  { %656 = vmatpush1.bf16.msra.mxu1 %v1311_v13  ;;  %v571_v25 = vsel %vm569_vm0, %v1240_v22, 0  ;;  %v104_v30 = vld [vmem:[%s1841_s1 + $0x2a8] sm:$0x33]  ;;  %v1314_v32 = vld [vmem:[%s1841_s1 + $0x84] ss:$56 sps:$4 sm:$0xff]  }
   0xb   :  { %617 = vmatpush1.bf16.msra.mxu0 %v1291_v6  ;;  %657 = vmatprep.subr.bf16.mxu1 %v1315_v14  ;;  %v1335_v33 = vld [vmem:[%s1841_s1 + $0x238] ss:$56 sps:$4 sm:$0xff]   ;;  %v1243_v34 = vcombine.high %v104_v30, %v104_v30  ;;  %v1242_v35 = vcombine.low %v104_v30, %v104_v30  ;;  %v1320_v37 = vld [vmem:[%s1841_s1 + $0xf4] ss:$56 sps:$4 sm:$0xff]   ;;  %v1326_v41 = vld [vmem:[%s1841_s1 + $0x164] ss:$56 sps:$4 sm:$0xff]  }
   0xc   :  { %618 = vmatprep.subr.bf16.mxu0 %v1292_v7  ;;  %v1312_v36 = vld [vmem:[%s1841_s1 + $0x80] ss:$56 sps:$4 sm:$0xff]   ;;  %v1345_v39 = vld [vmem:[%s1841_s1 + $0x1c] ss:$56 sps:$4 sm:$0xff]   ;;  %v1318_v40 = vld [vmem:[%s1841_s1 + $0xf0] ss:$56 sps:$4 sm:$0xff]  }
   0xd   :  { %v577_v38 = vsel %vm569_vm0, %v1242_v35, 0  ;;  %v1343_v42 = vld [vmem:[%s1841_s1 + $0x18] ss:$56 sps:$4 sm:$0xff]   ;;  %v1351_v43 = vld [vmem:[%s1841_s1 + $0x8c] ss:$56 sps:$4 sm:$0xff]  }
   0xe   :  { %658 = vmatpush1.bf16.msra.mxu1 %v1317_v17  ;;  %v1324_v44 = vld [vmem:[%s1841_s1 + $0x160] ss:$56 sps:$4 sm:$0xff]   ;;  %v1332_v45 = vld [vmem:[%s1841_s1 + $0x1d4] ss:$56 sps:$4 sm:$0xff]   ;;  %v1330_v48 = vld [vmem:[%s1841_s1 + $0x1d0] ss:$56 sps:$4 sm:$0xff]  }
   0xf   :  { %619 = vmatpush1.bf16.msra.mxu0 %v1294_v10  ;;  %659 = vmatprep.subr.bf16.mxu1 %v1321_v19  ;;  %v1349_v46 = vld [vmem:[%s1841_s1 + $0x88] ss:$56 sps:$4 sm:$0xff]   ;;  %v1357_v47 = vld [vmem:[%s1841_s1 + $0xfc] ss:$56 sps:$4 sm:$0xff]   ;;  %v1355_v51 = vld [vmem:[%s1841_s1 + $0xf8] ss:$56 sps:$4 sm:$0xff]  }
  0x10   :  { %620 = vmatprep.subr.bf16.mxu0 %v1295_v11  ;;  %v1338_v49 = vld [vmem:[%s1841_s1 + $0x244] ss:$56 sps:$4 sm:$0xff]   ;;  %v105_v50 = vld [vmem:[%s1841_s1 + $0x2b0] sm:$0x33]  ;;  %v1336_v53 = vld [vmem:[%s1841_s1 + $0x240] ss:$56 sps:$4 sm:$0xff]  }
  0x11   :  { %v1363_v52 = vld [vmem:[%s1841_s1 + $0x16c] ss:$56 sps:$4 sm:$0xff]   ;;  %v1245_v54 = vcombine.high %v105_v50, %v105_v50  ;;  %v1244_v55 = vcombine.low %v105_v50, %v105_v50  ;;  %v1361_v56 = vld [vmem:[%s1841_s1 + $0x168] ss:$56 sps:$4 sm:$0xff]   ;;  %v1369_v57 = vld [vmem:[%s1841_s1 + $0x1dc] ss:$56 sps:$4 sm:$0xff]  }
  0x12   :  { %660 = vmatpush1.bf16.msra.mxu1 %v1323_v23  ;;  %v1348_v59 = vld [vmem:[%s1841_s1 + $0x24] ss:$56 sps:$4 sm:$0xff]   ;;  %v1367_v60 = vld [vmem:[%s1841_s1 + $0x1d8] ss:$56 sps:$4 sm:$0xff]   ;;  %v1354_v0 = vld [vmem:[%s1841_s1 + $0x94] ss:$56 sps:$4 sm:$0xff]  }
  0x13   :  { %621 = vmatpush1.bf16.msra.mxu0 %v1297_v15  ;;  %661 = vmatprep.subr.bf16.mxu1 %v1327_v24  ;;  %v583_v58 = vsel %vm569_vm0, %v1244_v55, 0  ;;  %v1375_v61 = vld [vmem:[%s1841_s1 + $0x24c] ss:$56 sps:$4 sm:$0xff]   ;;  %v106_v62 = vld [vmem:[%s1841_s1 + $0x2b8] sm:$0x33] }
  0x14   :  { %622 = vmatprep.subr.bf16.mxu0 %v1298_v16  ;;  %v1346_v63 = vld [vmem:[%s1841_s1 + $0x20] ss:$56 sps:$4 sm:$0xff]   ;;  %v1247_v3 = vcombine.high %v106_v62, %v106_v62  ;;  %v1246_v4 = vcombine.low %v106_v62, %v106_v62  ;;  %v1352_v5 = vld [vmem:[%s1841_s1 + $0x90] ss:$56 sps:$4 sm:$0xff]   ;;  %v1360_v6 = vld [vmem:[%s1841_s1 + $0x104] ss:$56 sps:$4 sm:$0xff]  }
  0x15   :  { %v1373_v2 = vld [vmem:[%s1841_s1 + $0x248] ss:$56 sps:$4 sm:$0xff]   ;;  %v1385_v8 = vld [vmem:[%s1841_s1 + $0x2c] ss:$56 sps:$4 sm:$0xff]   ;;  %v1391_v12 = vld [vmem:[%s1841_s1 + $0x9c] ss:$56 sps:$4 sm:$0xff]  }
  0x16   :  { %662 = vmatpush1.bf16.msra.mxu1 %v1329_v27  ;;  %v589_v7 = vsel %vm569_vm0, %v1246_v4, 0  ;;  %v1358_v9 = vld [vmem:[%s1841_s1 + $0x100] ss:$56 sps:$4 sm:$0xff]   ;;  %v1366_v10 = vld [vmem:[%s1841_s1 + $0x174] ss:$56 sps:$4 sm:$0xff]  }
  0x17   :  { %623 = vmatpush1.bf16.msra.mxu0 %v1300_v20  ;;  %663 = vmatprep.subr.bf16.mxu1 %v1333_v28  ;;  %v1383_v11 = vld [vmem:[%s1841_s1 + $0x28] ss:$56 sps:$4 sm:$0xff]   ;;  %v1372_v14 = vld [vmem:[%s1841_s1 + $0x1e4] ss:$56 sps:$4 sm:$0xff]   ;;  %v1389_v15 = vld [vmem:[%s1841_s1 + $0x98] ss:$56 sps:$4 sm:$0xff]  }
  0x18   :  { %1254 = vmatprep.subr.msk.bf16.mxu0 %vm569_vm0, %v1241_v21  ;;  %v1364_v13 = vld [vmem:[%s1841_s1 + $0x170] ss:$56 sps:$4 sm:$0xff]   ;;  %v1397_v16 = vld [vmem:[%s1841_s1 + $0x10c] ss:$56 sps:$4 sm:$0xff]   ;;  %v1370_v17 = vld [vmem:[%s1841_s1 + $0x1e0] ss:$56 sps:$4 sm:$0xff]  }
  0x19   :  { %v1378_v18 = vld [vmem:[%s1841_s1 + $0x254] ss:$56 sps:$4 sm:$0xff]   ;;  %v1395_v19 = vld [vmem:[%s1841_s1 + $0x108] ss:$56 sps:$4 sm:$0xff]   ;;  %v1413_v35 = vld [vmem:[%s1841_s1 + $0x258] ss:$56 sps:$4 sm:$0xff]  }
  0x1a   :  { %664 = vmatpush1.bf16.msra.mxu1 %v1335_v33  ;;  %v107_v20 = vld [vmem:[%s1841_s1 + $0x2c0] sm:$0x33]  ;;  %v1403_v21 = vld [vmem:[%s1841_s1 + $0x17c] ss:$56 sps:$4 sm:$0xff]   ;;  %v1376_v22 = vld [vmem:[%s1841_s1 + $0x250] ss:$56 sps:$4 sm:$0xff]  }
  0x1b   :  { %625 = vmatpush1.bf16.msra.mxu0 %v571_v25  ;;  %1256 = vmatprep.subr.msk.bf16.mxu1 %vm569_vm0, %v1243_v34  ;;  %v1249_v23 = vcombine.high %v107_v20, %v107_v20  ;;  %v1248_v24 = vcombine.low %v107_v20, %v107_v20  ;;  %v1401_v25 = vld [vmem:[%s1841_s1 + $0x178] ss:$56 sps:$4 sm:$0xff]   ;;  %v1388_v28 = vld [vmem:[%s1841_s1 + $0x34] ss:$56 sps:$4 sm:$0xff]   ;;  %v1407_v30 = vld [vmem:[%s1841_s1 + $0x1e8] ss:$56 sps:$4 sm:$0xff]  }
  0x1c   :  { %694 = vmatprep.subr.bf16.mxu0 %v1308_v26  ;;  %v1409_v26 = vld [vmem:[%s1841_s1 + $0x1ec] ss:$56 sps:$4 sm:$0xff]   ;;  %v1386_v33 = vld [vmem:[%s1841_s1 + $0x30] ss:$56 sps:$4 sm:$0xff]  }
  0x1d   :  { %v595_v27 = vsel %vm569_vm0, %v1248_v24, 0  ;;  %v1394_v34 = vld [vmem:[%s1841_s1 + $0xa4] ss:$56 sps:$4 sm:$0xff]  }
  0x1e   :  { %1255 = vmatmul.mubr.msk.bf16.vlgmr.msra.gmra.mrb[0].mxu0 %vm565_vm1, %v1531_v29  ;;  %666 = vmatpush1.bf16.msra.mxu1 %v577_v38  ;;  %v1392_v38 = vld [vmem:[%s1841_s1 + $0xa0] ss:$56 sps:$4 sm:$0xff]  }
  0x1f   :  { %695 = vmatpush1.bf16.msra.mxu0 %v1306_v31  ;;  %726 = vmatprep.mubr.bf16.mxu0 %v1423_v1  ;;  %v1415_v31 = vld [vmem:[%s1841_s1 + $0x25c] ss:$56 sps:$4 sm:$0xff]  }
  0x20   :  { %696 = vmatprep.subr.bf16.mxu0 %v1314_v32  ;;  %735 = vmatprep.subr.bf16.mxu1 %v1345_v39  ;;  %v108_v32 = vld [vmem:[%s1841_s1 + $0x2c8] sm:$0x33] }
  0x21   :  { %1257 = vmatmul.mubr.msk.bf16.vlgmr.msra.gmra.mrb[0].mxu1 %vm565_vm1, %v1531_v29  ;;  %v1400_v39 = vld [vmem:[%s1841_s1 + $0x114] ss:$56 sps:$4 sm:$0xff]  }
  0x22   :  { %736 = vmatpush1.bf16.msra.mxu1 %v1343_v42  ;;  %767 = vmatprep.mubr.bf16.mxu1 %v1423_v1  ;;  %v1404_v42 = vld [vmem:[%s1841_s1 + $0x180] ss:$56 sps:$4 sm:$0xff]  }
  0x23   :  { %697 = vmatpush1.bf16.msra.mxu0 %v1312_v36  ;;  %737 = vmatprep.subr.bf16.mxu1 %v1351_v43  ;;  %v1251_v36 = vcombine.high %v108_v32, %v108_v32  ;;  %v1412_v43 = vld [vmem:[%s1841_s1 + $0x1f4] ss:$56 sps:$4 sm:$0xff]  }
  0x24   :  { %698 = vmatprep.subr.bf16.mxu0 %v1320_v37  ;;  %v1250_v37 = vcombine.low %v108_v32, %v108_v32 }
  0x26   :  { %738 = vmatpush1.bf16.msra.mxu1 %v1349_v46  ;;  %v109_v46 = vld [vmem:[%s1841_s1 + $0x2d0] sm:$0x33] }
  0x27   :  { %699 = vmatpush1.bf16.msra.mxu0 %v1318_v40  ;;  %739 = vmatprep.subr.bf16.mxu1 %v1357_v47  ;;  %v601_v40 = vsel %vm569_vm0, %v1250_v37, 0  ;;  %v1416_v47 = vld [vmem:[%s1841_s1 + $0x260] ss:$56 sps:$4 sm:$0xff]  }
  0x28   :  { %700 = vmatprep.subr.bf16.mxu0 %v1326_v41  ;;  %v1398_v41 = vld [vmem:[%s1841_s1 + $0x110] ss:$56 sps:$4 sm:$0xff]  }
  0x2a   :  { %740 = vmatpush1.bf16.msra.mxu1 %v1355_v51  ;;  %v903_v51 = vlaneseq }
  0x2b   :  { %701 = vmatpush1.bf16.msra.mxu0 %v1324_v44  ;;  %741 = vmatprep.subr.bf16.mxu1 %v1363_v52  ;;  %v1410_v44 = vld [vmem:[%s1841_s1 + $0x1f0] ss:$56 sps:$4 sm:$0xff]  }
  0x2c   :  { %702 = vmatprep.subr.bf16.mxu0 %v1332_v45  ;;  %v1418_v45 = vld [vmem:[%s1841_s1 + $0x264] ss:$56 sps:$4 sm:$0xff]   ;;  %v1762_v52 = vshrl.u32 %v903_v51, 7 }
  0x2e   :  { %742 = vmatpush1.bf16.msra.mxu1 %v1361_v56  ;;  %v1771_v55 = vsub.s32 1, %v1762_v52  ;;  %v987_v56 = vld [vmem:[%s1844_s3] sm:$0xff]  ;;  %v929_v37 = vsub.s32 6, %v1762_v52 }
  0x2f   :  { %703 = vmatpush1.bf16.msra.mxu0 %v1330_v48  ;;  %743 = vmatprep.subr.bf16.mxu1 %v1369_v57  ;;  %v1253_v48 = vcombine.high %v109_v46, %v109_v46 }
  0x30   :  { %704 = vmatprep.subr.bf16.mxu0 %v1338_v49  ;;  %v1252_v49 = vcombine.low %v109_v46, %v109_v46  ;;  %v1018_v46 = vrot.slane %v987_v56, %v929_v37 }
  0x32   :  { %744 = vmatpush1.bf16.msra.mxu1 %v1367_v60  ;;  %v607_v50 = vsel %vm569_vm0, %v1252_v49, 0  ;;  %v998_v60 = vrot.slane %v987_v56, %v1771_v55 }
  0x33   :  { %705 = vmatpush1.bf16.msra.mxu0 %v1336_v53  ;;  %745 = vmatprep.subr.bf16.mxu1 %v1375_v61  ;;  %v1765_v53 = vsub.s32 0, %v1762_v52 }
  0x34   :  { %1258 = vmatprep.subr.msk.bf16.mxu0 %vm569_vm0, %v1245_v54  ;;  %v899_v54 = vld [vmem:[%s1843_s2] sm:$0xff] }
  0x35   :  { %v906_v57 = vrot.slane %v899_v54, %v1765_v53 }
  0x36   :  { %746 = vmatpush1.bf16.msra.mxu1 %v1373_v2  ;;  %v1781_v2 = vsub.s32 2, %v1762_v52 }
  0x37   :  { %707 = vmatpush1.bf16.msra.mxu0 %v583_v58  ;;  %1260 = vmatprep.subr.msk.bf16.mxu1 %vm569_vm0, %v1247_v3  ;;  %v994_v58 = vrot.slane %v987_v56, %v1765_v53 }
  0x38   :  { %776 = vmatprep.subr.bf16.mxu0 %v1348_v59 }
  0x3a   :  { %1259 = vmatmul.mubr.msk.bf16.vlgmr.msra.gmra.mrb[4].mxu0 %vm565_vm1, %v1531_v29  ;;  %748 = vmatpush1.bf16.msra.mxu1 %v589_v7 }
  0x3b   :  { %777 = vmatpush1.bf16.msra.mxu0 %v1346_v63  ;;  %808 = vmatprep.mubr.bf16.mxu0 %v1423_v1 }
  0x3c   :  { %778 = vmatprep.subr.bf16.mxu0 %v1354_v0  ;;  %817 = vmatprep.subr.bf16.mxu1 %v1385_v8 }
  0x3d   :  { %1261 = vmatmul.mubr.msk.bf16.vlgmr.msra.gmra.mrb[4].mxu1 %vm565_vm1, %v1531_v29 }
  0x3e   :  { %818 = vmatpush1.bf16.msra.mxu1 %v1383_v11  ;;  %849 = vmatprep.mubr.bf16.mxu1 %v1423_v1 }
  0x3f   :  { %779 = vmatpush1.bf16.msra.mxu0 %v1352_v5  ;;  %819 = vmatprep.subr.bf16.mxu1 %v1391_v12  ;;  %v1784_v5 = vsub.s32 3, %v1762_v52  ;;  %v1002_v12 = vrot.slane %v987_v56, %v1781_v2 }
  0x40   :  { %780 = vmatprep.subr.bf16.mxu0 %v1360_v6 }
  0x42   :  { %820 = vmatpush1.bf16.msra.mxu1 %v1389_v15 }
  0x43   :  { %781 = vmatpush1.bf16.msra.mxu0 %v1358_v9  ;;  %821 = vmatprep.subr.bf16.mxu1 %v1397_v16  ;;  %v914_v9 = vrot.slane %v899_v54, %v1781_v2 }
  0x44   :  { %782 = vmatprep.subr.bf16.mxu0 %v1366_v10  ;;  %v918_v10 = vrot.slane %v899_v54, %v1784_v5 }
  0x46   :  { %822 = vmatpush1.bf16.msra.mxu1 %v1395_v19 }
  0x47   :  { %783 = vmatpush1.bf16.msra.mxu0 %v1364_v13  ;;  %823 = vmatprep.subr.bf16.mxu1 %v1403_v21 }
  0x48   :  { %784 = vmatprep.subr.bf16.mxu0 %v1372_v14  ;;  %v1006_v14 = vrot.slane %v987_v56, %v1784_v5 }
  0x4a   :  { %824 = vmatpush1.bf16.msra.mxu1 %v1401_v25  ;;  %v1797_v25 = vsub.s32 4, %v1762_v52 }
  0x4b   :  { %785 = vmatpush1.bf16.msra.mxu0 %v1370_v17  ;;  %825 = vmatprep.subr.bf16.mxu1 %v1409_v26  ;;  %v1800_v26 = vsub.s32 5, %v1762_v52 }
  0x4c   :  { %786 = vmatprep.subr.bf16.mxu0 %v1378_v18 }
  0x4d   :  { %v1014_v32 = vrot.slane %v987_v56, %v1800_v26 }
  0x4e   :  { %826 = vmatpush1.bf16.msra.mxu1 %v1407_v30  ;;  %v1010_v30 = vrot.slane %v987_v56, %v1797_v25 }
  0x4f   :  { %787 = vmatpush1.bf16.msra.mxu0 %v1376_v22  ;;  %827 = vmatprep.subr.bf16.mxu1 %v1415_v31 }
  0x50   :  { %1262 = vmatprep.subr.msk.bf16.mxu0 %vm569_vm0, %v1249_v23 }
  0x52   :  { %828 = vmatpush1.bf16.msra.mxu1 %v1413_v35 }
  0x53   :  { %789 = vmatpush1.bf16.msra.mxu0 %v595_v27  ;;  %1264 = vmatprep.subr.msk.bf16.mxu1 %vm569_vm0, %v1251_v36  ;;  %v922_v27 = vrot.slane %v899_v54, %v1797_v25 }
  0x54   :  { %858 = vmatprep.subr.bf16.mxu0 %v1388_v28  ;;  %v926_v28 = vrot.slane %v899_v54, %v1800_v26 }
  0x56   :  { %1263 = vmatmul.mubr.msk.bf16.vlgmr.msra.gmra.mrb[8].mxu0 %vm565_vm1, %v1531_v29  ;;  %830 = vmatpush1.bf16.msra.mxu1 %v601_v40  ;;  %v933_v40 = vsub.s32 7, %v1762_v52 }
  0x57   :  { %859 = vmatpush1.bf16.msra.mxu0 %v1386_v33  ;;  %890 = vmatprep.mubr.bf16.mxu0 %v1423_v1  ;;  %v1406_v1 = vld [vmem:[%s1841_s1 + $0x184] ss:$56 sps:$4 sm:$0xff]  }
  0x58   :  { %860 = vmatprep.subr.bf16.mxu0 %v1394_v34 }
  0x59   :  { %1265 = vmatmul.mubr.msk.bf16.vlgmr.msra.gmra.mrb[8].mxu1 %vm565_vm1, %v1531_v29 }
  0x5b   :  { %861 = vmatpush1.bf16.msra.mxu0 %v1392_v38 }
  0x5c   :  { %862 = vmatprep.subr.bf16.mxu0 %v1400_v39 }
  0x5f   :  { %863 = vmatpush1.bf16.msra.mxu0 %v1398_v41 }
  0x60   :  { %864 = vmatprep.subr.bf16.mxu0 %v1406_v1 }
  0x63   :  { %865 = vmatpush1.bf16.msra.mxu0 %v1404_v42 }
  0x64   :  { %866 = vmatprep.subr.bf16.mxu0 %v1412_v43  ;;  %v930_v43 = vrot.slane %v899_v54, %v929_v37 }
  0x67   :  { %867 = vmatpush1.bf16.msra.mxu0 %v1410_v44  ;;  %v934_v44 = vrot.slane %v899_v54, %v933_v40 }
  0x68   :  { %868 = vmatprep.subr.bf16.mxu0 %v1418_v45 }
  0x6b   :  { %869 = vmatpush1.bf16.msra.mxu0 %v1416_v47 }
  0x6c   :  { %1266 = vmatprep.subr.msk.bf16.mxu0 %vm569_vm0, %v1253_v48  ;;  %v1022_v48 = vrot.slane %v987_v56, %v933_v40  ;;  %v988_v56 = vld [vmem:[%s1844_s3 + $0x8] sm:$0x3f] }
  0x6f   :  { %871 = vmatpush1.bf16.msra.mxu0 %v607_v50 }
  0x72   :  { %1267 = vmatmul.mubr.msk.bf16.vlgmr.msra.gmra.mrb[12].mxu0 %vm565_vm1, %v1531_v29  ;;  %v910_v29 = vrot.slane %v899_v54, %v1771_v55  ;;  %v900_v54 = vld [vmem:[%s1843_s2 + $0x8] sm:$0x3f] }
  0xf1   :  { %v646_v59 = vpop.f32.mrb[0].mxu0 }
  0xf2   :  { %v973_v61 = vmul.f32 %v906_v57, %v646_v59  ;;  %v648_v62 = vpop.f32.mrb[1].mxu0 }
  0xf3   :  { %v974_v63 = vmul.f32 %v910_v29, %v648_v62  ;;  %v650_v0 = vpop.f32.mrb[2].mxu0  ;;  %v938_v62 = vrot.slane %v900_v54, %v1765_v53 }
  0xf4   :  { %v1061_v3 = vadd.f32 %v994_v58, %v973_v61  ;;  %v651_v4 = vpop.f32.mrb[3].mxu0  ;;  %v687_v13 = vpop.f32.mrb[0].mxu1  ;;  %v1026_v0 = vrot.slane %v988_v56, %v1765_v53 }
  0xf5   :  { %v1062_v6 = vadd.f32 %v998_v60, %v974_v63  ;;  %v975_v15 = vmul.f32 %v914_v9, %v687_v13  ;;  %v689_v16 = vpop.f32.mrb[1].mxu1  ;;  %v942_v63 = vrot.slane %v900_v54, %v1771_v55  ;;  %v1030_v4 = vrot.slane %v988_v56, %v1771_v55 }
  0xf6   :  { %v1075_v7 = vmax.f32 %v1061_v3, 0.0  ;;  %v976_v17 = vmul.f32 %v918_v10, %v689_v16  ;;  %v691_v18 = vpop.f32.mrb[2].mxu1  ;;  %v950_v16 = vrot.slane %v900_v54, %v1784_v5 }
  0xf7   :  { %v1076_v8 = vmax.f32 %v1062_v6, 0.0  ;;  %v1063_v19 = vadd.f32 %v1002_v12, %v975_v15  ;;  %v692_v20 = vpop.f32.mrb[3].mxu1  ;;  %v946_v15 = vrot.slane %v900_v54, %v1781_v2  ;;  %v1034_v18 = vrot.slane %v988_v56, %v1781_v2 }
  0xf8   :  { %v1064_v21 = vadd.f32 %v1006_v14, %v976_v17  ;;  %v954_v2 = vrot.slane %v900_v54, %v1797_v25 }
  0xf9   :  { %v1275_v11 = vpack.c.bf16 %v1076_v8, %v1075_v7  ;;  %v1077_v22 = vmax.f32 %v1063_v19, 0.0  ;;  %v1038_v19 = vrot.slane %v988_v56, %v1784_v5  ;;  %v958_v5 = vrot.slane %v900_v54, %v1800_v26 }
  0xfa   :  { %v1078_v23 = vmax.f32 %v1064_v21, 0.0 }
  0xfb   :  { %1145 = vst [vmem:[%s1845_s4] sm:$0xff] %v1275_v11 }
  0xfc   :  { %v1276_v24 = vpack.c.bf16 %v1078_v23, %v1077_v22 }
  0xfe   :  { %1146 = vst [vmem:[%s1845_s4 + $0x8] sm:$0xff] %v1276_v24 }
 0x10d   :  { %v728_v31 = vpop.f32.mrb[4].mxu0 }
 0x10e   :  { %v977_v33 = vmul.f32 %v922_v27, %v728_v31  ;;  %v730_v34 = vpop.f32.mrb[5].mxu0 }
 0x10f   :  { %v978_v35 = vmul.f32 %v926_v28, %v730_v34  ;;  %v732_v36 = vpop.f32.mrb[6].mxu0  ;;  %v1046_v34 = vrot.slane %v988_v56, %v1800_v26 }
 0x110   :  { %v1065_v38 = vadd.f32 %v1010_v30, %v977_v33  ;;  %v733_v39 = vpop.f32.mrb[7].mxu0  ;;  %v769_v47 = vpop.f32.mrb[4].mxu1 }
 0x111   :  { %v1066_v41 = vadd.f32 %v1014_v32, %v978_v35  ;;  %v979_v49 = vmul.f32 %v930_v43, %v769_v47  ;;  %v771_v50 = vpop.f32.mrb[5].mxu1  ;;  %v1042_v32 = vrot.slane %v988_v56, %v1797_v25 }
 0x112   :  { %v1079_v1 = vmax.f32 %v1065_v38, 0.0  ;;  %v980_v51 = vmul.f32 %v934_v44, %v771_v50  ;;  %v773_v57 = vpop.f32.mrb[6].mxu1 }
 0x113   :  { %v1080_v42 = vmax.f32 %v1066_v41, 0.0  ;;  %v1067_v29 = vadd.f32 %v1018_v46, %v979_v49  ;;  %v774_v58 = vpop.f32.mrb[7].mxu1 }
 0x114   :  { %v1068_v52 = vadd.f32 %v1022_v48, %v980_v51 }
 0x115   :  { %v1277_v45 = vpack.c.bf16 %v1080_v42, %v1079_v1  ;;  %v1081_v59 = vmax.f32 %v1067_v29, 0.0 }
 0x116   :  { %v1082_v60 = vmax.f32 %v1068_v52, 0.0 }
 0x117   :  { %1147 = vst [vmem:[%s1845_s4 + $0x10] sm:$0xff] %v1277_v45 }
 0x118   :  { %v1278_v61 = vpack.c.bf16 %v1082_v60, %v1081_v59 }
 0x11a   :  { %1148 = vst [vmem:[%s1845_s4 + $0x18] sm:$0xff] %v1278_v61 }
 0x129   :  { %v810_v3 = vpop.f32.mrb[8].mxu0 }
 0x12a   :  { %v981_v6 = vmul.f32 %v938_v62, %v810_v3  ;;  %v812_v7 = vpop.f32.mrb[9].mxu0 }
 0x12b   :  { %v982_v8 = vmul.f32 %v942_v63, %v812_v7  ;;  %v814_v9 = vpop.f32.mrb[10].mxu0 }
 0x12c   :  { %v1069_v10 = vadd.f32 %v1026_v0, %v981_v6  ;;  %v815_v11 = vpop.f32.mrb[11].mxu0  ;;  %v851_v53 = vpop.f32.mrb[8].mxu1 }
 0x12d   :  { %v1070_v12 = vadd.f32 %v1030_v4, %v982_v8  ;;  %v983_v55 = vmul.f32 %v946_v15, %v851_v53  ;;  %v853_v20 = vpop.f32.mrb[9].mxu1 }
 0x12e   :  { %v1083_v13 = vmax.f32 %v1069_v10, 0.0  ;;  %v984_v21 = vmul.f32 %v950_v16, %v853_v20  ;;  %v855_v22 = vpop.f32.mrb[10].mxu1 }
 0x12f   :  { %v1084_v14 = vmax.f32 %v1070_v12, 0.0  ;;  %v1071_v23 = vadd.f32 %v1034_v18, %v983_v55  ;;  %v856_v24 = vpop.f32.mrb[11].mxu1 }
 0x130   :  { %v1072_v27 = vadd.f32 %v1038_v19, %v984_v21 }
 0x131   :  { %v1279_v17 = vpack.c.bf16 %v1084_v14, %v1083_v13  ;;  %v1085_v28 = vmax.f32 %v1071_v23, 0.0 }
 0x132   :  { %v1086_v30 = vmax.f32 %v1072_v27, 0.0 }
 0x133   :  { %1149 = vst [vmem:[%s1845_s4 + $0x20] sm:$0xff] %v1279_v17 }
 0x134   :  { %v1280_v31 = vpack.c.bf16 %v1086_v30, %v1085_v28 }
 0x136   :  { %1150 = vst [vmem:[%s1845_s4 + $0x28] sm:$0xff] %v1280_v31 }
 0x145   :  { %v892_v33 = vpop.f32.mrb[12].mxu0 }
 0x146   :  { %v985_v35 = vmul.f32 %v954_v2, %v892_v33  ;;  %v894_v36 = vpop.f32.mrb[13].mxu0 }
 0x147   :  { %v986_v37 = vmul.f32 %v958_v5, %v894_v36  ;;  %v896_v38 = vpop.f32.mrb[14].mxu0 }
 0x148   :  { %v1073_v39 = vadd.f32 %v1042_v32, %v985_v35  ;;  %v897_v40 = vpop.f32.mrb[15].mxu0 }
 0x149   :  { %v1074_v41 = vadd.f32 %v1046_v34, %v986_v37 }
 0x14a   :  { %v1087_v1 = vmax.f32 %v1073_v39, 0.0 }
 0x14b   :  { %v1088_v42 = vmax.f32 %v1074_v41, 0.0 }
 0x14d   :  { %v1281_v43 = vpack.c.bf16 %v1088_v42, %v1087_v1 }
 0x14f   :  { %1151 = vst [vmem:[%s1845_s4 + $0x30] sm:$0xff] %v1281_v43 }

// kernel: dc_generator_forward.5
= control target key start
LH: loop header
LB: loop body
LE: loop exit
PB: predicated region body
PF: predicated region fallthrough
CT: control target
= control target key end

     0   :  { %v1846_v34 = vmov 0   ;;  %vm946_vm0 = vcmask 916480   ;;  %s2429_s1 = inlined_call_operand.vmem [shape: bf16[1008,256], index: 1, kind: input, shape index: {}]   ;;  %s2430_s0 = inlined_call_operand.vmem [shape: bf16[56,1008], index: 0, kind: input, shape index: {}]   ;;  %s2431_s2 = inlined_call_operand.vmem [shape: f32[56,1], index: 2, kind: input, shape index: {}]   ;;  %s2432_s3 = inlined_call_operand.vmem [shape: f32[56,1], index: 3, kind: input, shape index: {}]   ;;  %s2433_s4 = inlined_call_operand.vmem [shape: bf16[56,256], index: 4, kind: output, shape index: {}]  }
   0x1   :  { %v1649_v0 = vld [vmem:[%s2429_s1 + $0x4] ss:$8 sps:$4 sm:$0xff]   ;;  %v1653_v2 = vld [vmem:[%s2429_s1] ss:$8 sps:$4 sm:$0xff]   ;;  %v1655_v4 = vld [vmem:[%s2429_s1 + $0x14] ss:$8 sps:$4 sm:$0xff]   ;;  %1648 = vset.pattern.permute.xlu1 %v1846_v34  ;;  %1647 = vset.pattern.permute.xlu0 %v1846_v34 }
   0x2   :  { %v1651_v1 = vld [vmem:[%s2429_s1 + $0x204] ss:$8 sps:$4 sm:$0xff]   ;;  %959 = vmatprep.subr.bf16.mxu1 %v1649_v0  ;;  %v1654_v3 = vld [vmem:[%s2429_s1 + $0x200] ss:$8 sps:$4 sm:$0xff]   ;;  %v1657_v5 = vld [vmem:[%s2429_s1 + $0x214] ss:$8 sps:$4 sm:$0xff]  }
   0x3   :  { %1101 = vmatprep.subr.bf16.mxu0 %v1651_v1  ;;  %960 = vmatpush1.bf16.msra.mxu1 %v1653_v2  ;;  %v1659_v6 = vld [vmem:[%s2429_s1 + $0x10] ss:$8 sps:$4 sm:$0xff]   ;;  %v1661_v8 = vld [vmem:[%s2429_s1 + $0x24] ss:$8 sps:$4 sm:$0xff]   ;;  %v1665_v10 = vld [vmem:[%s2429_s1 + $0x20] ss:$8 sps:$4 sm:$0xff]  }
   0x4   :  { %1102 = vmatpush1.bf16.msra.mxu0 %v1654_v3  ;;  %961 = vmatprep.subr.bf16.mxu1 %v1655_v4  ;;  %v1660_v7 = vld [vmem:[%s2429_s1 + $0x210] ss:$8 sps:$4 sm:$0xff]   ;;  %v1663_v9 = vld [vmem:[%s2429_s1 + $0x224] ss:$8 sps:$4 sm:$0xff]   ;;  %v1666_v11 = vld [vmem:[%s2429_s1 + $0x220] ss:$8 sps:$4 sm:$0xff]  }
   0x5   :  { %1103 = vmatprep.subr.bf16.mxu0 %v1657_v5  ;;  %v1667_v12 = vld [vmem:[%s2429_s1 + $0x34] ss:$8 sps:$4 sm:$0xff]   ;;  %v1671_v14 = vld [vmem:[%s2429_s1 + $0x30] ss:$8 sps:$4 sm:$0xff]   ;;  %v1673_v16 = vld [vmem:[%s2429_s1 + $0x44] ss:$8 sps:$4 sm:$0xff]  }
   0x6   :  { %v1669_v13 = vld [vmem:[%s2429_s1 + $0x234] ss:$8 sps:$4 sm:$0xff]   ;;  %v1672_v15 = vld [vmem:[%s2429_s1 + $0x230] ss:$8 sps:$4 sm:$0xff]   ;;  %v1675_v17 = vld [vmem:[%s2429_s1 + $0x244] ss:$8 sps:$4 sm:$0xff]  }
   0x7   :  { %962 = vmatpush1.bf16.msra.mxu1 %v1659_v6  ;;  %v1677_v18 = vld [vmem:[%s2429_s1 + $0x40] ss:$8 sps:$4 sm:$0xff]   ;;  %v1679_v20 = vld [vmem:[%s2429_s1 + $0x54] ss:$8 sps:$4 sm:$0xff]   ;;  %v1683_v22 = vld [vmem:[%s2429_s1 + $0x50] ss:$8 sps:$4 sm:$0xff]  }
   0x8   :  { %1104 = vmatpush1.bf16.msra.mxu0 %v1660_v7  ;;  %963 = vmatprep.subr.bf16.mxu1 %v1661_v8  ;;  %v1678_v19 = vld [vmem:[%s2429_s1 + $0x240] ss:$8 sps:$4 sm:$0xff]   ;;  %v1681_v21 = vld [vmem:[%s2429_s1 + $0x254] ss:$8 sps:$4 sm:$0xff]   ;;  %v1684_v23 = vld [vmem:[%s2429_s1 + $0x250] ss:$8 sps:$4 sm:$0xff]  }
   0x9   :  { %1105 = vmatprep.subr.bf16.mxu0 %v1663_v9  ;;  %v1685_v24 = vld [vmem:[%s2429_s1 + $0x64] ss:$8 sps:$4 sm:$0xff]   ;;  %v1689_v26 = vld [vmem:[%s2429_s1 + $0x60] ss:$8 sps:$4 sm:$0xff]   ;;  %v1691_v28 = vld [vmem:[%s2429_s1 + $0x74] ss:$8 sps:$4 sm:$0xff]  }
   0xa   :  { %v1687_v25 = vld [vmem:[%s2429_s1 + $0x264] ss:$8 sps:$4 sm:$0xff]   ;;  %v1690_v27 = vld [vmem:[%s2429_s1 + $0x260] ss:$8 sps:$4 sm:$0xff]   ;;  %v1693_v29 = vld [vmem:[%s2429_s1 + $0x274] ss:$8 sps:$4 sm:$0xff]  }
   0xb   :  { %964 = vmatpush1.bf16.msra.mxu1 %v1665_v10  ;;  %v1695_v30 = vld [vmem:[%s2429_s1 + $0x70] ss:$8 sps:$4 sm:$0xff]   ;;  %v1697_v32 = vld [vmem:[%s2429_s1 + $0x84] ss:$8 sps:$4 sm:$0xff]   ;;  %v1701_v35 = vld [vmem:[%s2429_s1 + $0x80] ss:$8 sps:$4 sm:$0xff]  }
   0xc   :  { %1106 = vmatpush1.bf16.msra.mxu0 %v1666_v11  ;;  %965 = vmatprep.subr.bf16.mxu1 %v1667_v12  ;;  %v1696_v31 = vld [vmem:[%s2429_s1 + $0x270] ss:$8 sps:$4 sm:$0xff]   ;;  %v1699_v33 = vld [vmem:[%s2429_s1 + $0x284] ss:$8 sps:$4 sm:$0xff]   ;;  %v1702_v36 = vld [vmem:[%s2429_s1 + $0x280] ss:$8 sps:$4 sm:$0xff]  }
   0xd   :  { %1107 = vmatprep.subr.bf16.mxu0 %v1669_v13  ;;  %v1703_v37 = vld [vmem:[%s2429_s1 + $0x94] ss:$8 sps:$4 sm:$0xff]   ;;  %v1707_v39 = vld [vmem:[%s2429_s1 + $0x90] ss:$8 sps:$4 sm:$0xff]   ;;  %v1709_v41 = vld [vmem:[%s2429_s1 + $0xa4] ss:$8 sps:$4 sm:$0xff]  }
   0xe   :  { %v1705_v38 = vld [vmem:[%s2429_s1 + $0x294] ss:$8 sps:$4 sm:$0xff]   ;;  %v1708_v40 = vld [vmem:[%s2429_s1 + $0x290] ss:$8 sps:$4 sm:$0xff]   ;;  %v1711_v42 = vld [vmem:[%s2429_s1 + $0x2a4] ss:$8 sps:$4 sm:$0xff]  }
   0xf   :  { %966 = vmatpush1.bf16.msra.mxu1 %v1671_v14  ;;  %v1713_v43 = vld [vmem:[%s2429_s1 + $0xa0] ss:$8 sps:$4 sm:$0xff]   ;;  %v1715_v45 = vld [vmem:[%s2429_s1 + $0xb4] ss:$8 sps:$4 sm:$0xff]   ;;  %v1719_v47 = vld [vmem:[%s2429_s1 + $0xb0] ss:$8 sps:$4 sm:$0xff]  }
  0x10   :  { %1108 = vmatpush1.bf16.msra.mxu0 %v1672_v15  ;;  %967 = vmatprep.subr.bf16.mxu1 %v1673_v16  ;;  %v1714_v44 = vld [vmem:[%s2429_s1 + $0x2a0] ss:$8 sps:$4 sm:$0xff]   ;;  %v1717_v46 = vld [vmem:[%s2429_s1 + $0x2b4] ss:$8 sps:$4 sm:$0xff]   ;;  %v1720_v48 = vld [vmem:[%s2429_s1 + $0x2b0] ss:$8 sps:$4 sm:$0xff]  }
  0x11   :  { %1109 = vmatprep.subr.bf16.mxu0 %v1675_v17  ;;  %v18_v49 = vld [vmem:[%s2430_s0] sm:$0xff]  ;;  %v20_v54 = vld [vmem:[%s2430_s0 + $0x10] sm:$0xff] }
  0x12   :  { %v22_v50 = vld [vmem:[%s2430_s0 + $0x20] sm:$0xff]  ;;  %v24_v55 = vld [vmem:[%s2430_s0 + $0x30] sm:$0xff] }
  0x13   :  { %968 = vmatpush1.bf16.msra.mxu1 %v1677_v18  ;;  %v1721_v51 = vld [vmem:[%s2429_s1 + $0xc4] ss:$8 sps:$4 sm:$0xff]   ;;  %v1425_v53 = vcombine.high %v18_v49, %v22_v50  ;;  %v1429_v56 = vcombine.high %v20_v54, %v24_v55  ;;  %v1725_v57 = vld [vmem:[%s2429_s1 + $0xc0] ss:$8 sps:$4 sm:$0xff]   ;;  %v1727_v59 = vld [vmem:[%s2429_s1 + $0xd4] ss:$8 sps:$4 sm:$0xff]   ;;  %v1424_v9 = vcombine.low %v18_v49, %v22_v50  ;;  %v1428_v11 = vcombine.low %v20_v54, %v24_v55 }
  0x14   :  { %1110 = vmatpush1.bf16.msra.mxu0 %v1678_v19  ;;  %969 = vmatprep.subr.bf16.mxu1 %v1679_v20  ;;  %v1723_v52 = vld [vmem:[%s2429_s1 + $0x2c4] ss:$8 sps:$4 sm:$0xff]   ;;  %v1726_v58 = vld [vmem:[%s2429_s1 + $0x2c0] ss:$8 sps:$4 sm:$0xff]   ;;  %v1729_v60 = vld [vmem:[%s2429_s1 + $0x2d4] ss:$8 sps:$4 sm:$0xff]  }
  0x15   :  { %1111 = vmatprep.subr.bf16.mxu0 %v1681_v21  ;;  %991 = vmatprep.mubr.bf16.mxu1 %v1425_v53  ;;  %v1731_v61 = vld [vmem:[%s2429_s1 + $0xd0] ss:$8 sps:$4 sm:$0xff]   ;;  %v1733_v63 = vld [vmem:[%s2429_s1 + $0xe4] ss:$8 sps:$4 sm:$0xff]   ;;  %v1737_v1 = vld [vmem:[%s2429_s1 + $0xe0] ss:$8 sps:$4 sm:$0xff]  }
  0x16   :  { %1133 = vmatprep.mubr.bf16.mxu0 %v1429_v56  ;;  %v1732_v62 = vld [vmem:[%s2429_s1 + $0x2d0] ss:$8 sps:$4 sm:$0xff]   ;;  %v1735_v0 = vld [vmem:[%s2429_s1 + $0x2e4] ss:$8 sps:$4 sm:$0xff]   ;;  %v1738_v2 = vld [vmem:[%s2429_s1 + $0x2e0] ss:$8 sps:$4 sm:$0xff]  }
  0x17   :  { %970 = vmatpush1.bf16.msra.mxu1 %v1683_v22  ;;  %v1739_v3 = vld [vmem:[%s2429_s1 + $0xf4] ss:$8 sps:$4 sm:$0xff]   ;;  %v1743_v5 = vld [vmem:[%s2429_s1 + $0xf0] ss:$8 sps:$4 sm:$0xff]   ;;  %v1747_v7 = vld [vmem:[%s2429_s1 + $0x104] ss:$8 sps:$4 sm:$0xff]  }
  0x18   :  { %1112 = vmatpush1.bf16.msra.mxu0 %v1684_v23  ;;  %971 = vmatprep.subr.bf16.mxu1 %v1685_v24  ;;  %v1741_v4 = vld [vmem:[%s2429_s1 + $0x2f4] ss:$8 sps:$4 sm:$0xff]   ;;  %v1744_v6 = vld [vmem:[%s2429_s1 + $0x2f0] ss:$8 sps:$4 sm:$0xff]   ;;  %v1750_v8 = vld [vmem:[%s2429_s1 + $0x304] ss:$8 sps:$4 sm:$0xff]  }
  0x19   :  { %1113 = vmatprep.subr.bf16.mxu0 %v1687_v25  ;;  %v1745_v10 = vld [vmem:[%s2429_s1 + $0x100] ss:$8 sps:$4 sm:$0xff]   ;;  %v1753_v13 = vld [vmem:[%s2429_s1 + $0x114] ss:$8 sps:$4 sm:$0xff]   ;;  %v1751_v15 = vld [vmem:[%s2429_s1 + $0x110] ss:$8 sps:$4 sm:$0xff]  }
  0x1a   :  { %v1748_v12 = vld [vmem:[%s2429_s1 + $0x300] ss:$8 sps:$4 sm:$0xff]   ;;  %v1756_v14 = vld [vmem:[%s2429_s1 + $0x314] ss:$8 sps:$4 sm:$0xff]   ;;  %v1754_v16 = vld [vmem:[%s2429_s1 + $0x310] ss:$8 sps:$4 sm:$0xff]  }
  0x1b   :  { %972 = vmatpush1.bf16.msra.mxu1 %v1689_v26  ;;  %v28_v17 = vld [vmem:[%s2430_s0 + $0x50] sm:$0xff]  ;;  %v1759_v19 = vld [vmem:[%s2429_s1 + $0x124] ss:$8 sps:$4 sm:$0xff]   ;;  %v1757_v22 = vld [vmem:[%s2429_s1 + $0x120] ss:$8 sps:$4 sm:$0xff]  }
  0x1c   :  { %1114 = vmatpush1.bf16.msra.mxu0 %v1690_v27  ;;  %973 = vmatprep.subr.bf16.mxu1 %v1691_v28  ;;  %v32_v18 = vld [vmem:[%s2430_s0 + $0x70] sm:$0xff]  ;;  %v1762_v20 = vld [vmem:[%s2429_s1 + $0x324] ss:$8 sps:$4 sm:$0xff]   ;;  %v1760_v23 = vld [vmem:[%s2429_s1 + $0x320] ss:$8 sps:$4 sm:$0xff]  }
  0x1d   :  { %1115 = vmatprep.subr.bf16.mxu0 %v1693_v29  ;;  %v1437_v21 = vcombine.high %v28_v17, %v32_v18  ;;  %v1436_v24 = vcombine.low %v28_v17, %v32_v18  ;;  %v26_v25 = vld [vmem:[%s2430_s0 + $0x40] sm:$0xff]  ;;  %v1765_v27 = vld [vmem:[%s2429_s1 + $0x134] ss:$8 sps:$4 sm:$0xff]   ;;  %v1766_v34 = vld [vmem:[%s2429_s1 + $0x330] ss:$8 sps:$4 sm:$0xff]  }
  0x1e   :  { %v30_v26 = vld [vmem:[%s2430_s0 + $0x60] sm:$0xff]  ;;  %v1775_v49 = vld [vmem:[%s2429_s1 + $0x150] ss:$8 sps:$4 sm:$0xff]   ;;  %v1248_v17 = vld [vmem:[%s2431_s2 + $0x28] sm:$0xff] }
  0x1f   :  { %974 = vmatpush1.bf16.msra.mxu1 %v1695_v30  ;;  %v1433_v28 = vcombine.high %v26_v25, %v30_v26  ;;  %v1432_v29 = vcombine.low %v26_v25, %v30_v26  ;;  %v1768_v30 = vld [vmem:[%s2429_s1 + $0x334] ss:$8 sps:$4 sm:$0xff]   ;;  %v1778_v50 = vld [vmem:[%s2429_s1 + $0x350] ss:$8 sps:$4 sm:$0xff]   ;;  %v1786_v53 = vld [vmem:[%s2429_s1 + $0x364] ss:$8 sps:$4 sm:$0xff]  }
  0x20   :  { %1116 = vmatpush1.bf16.msra.mxu0 %v1696_v31  ;;  %975 = vmatprep.subr.bf16.mxu1 %v1697_v32  ;;  %v36_v31 = vld [vmem:[%s2430_s0 + $0x90] sm:$0xff]  ;;  %v1781_v55 = vld [vmem:[%s2429_s1 + $0x160] ss:$8 sps:$4 sm:$0xff]  }
  0x21   :  { %1117 = vmatprep.subr.bf16.mxu0 %v1699_v33  ;;  %v40_v32 = vld [vmem:[%s2430_s0 + $0xb0] sm:$0xff]  ;;  %v1784_v56 = vld [vmem:[%s2429_s1 + $0x360] ss:$8 sps:$4 sm:$0xff]  }
  0x22   :  { %v1763_v33 = vld [vmem:[%s2429_s1 + $0x130] ss:$8 sps:$4 sm:$0xff]   ;;  %v1247_v18 = vld [vmem:[%s2431_s2 + $0x20] sm:$0xff]  ;;  %v1813_v25 = vld [vmem:[%s2429_s1 + $0x1b4] ss:$8 sps:$4 sm:$0xff]  }
  0x23   :  { %976 = vmatpush1.bf16.msra.mxu1 %v1701_v35  ;;  %v1445_v35 = vcombine.high %v36_v31, %v40_v32  ;;  %v1816_v26 = vld [vmem:[%s2429_s1 + $0x3b4] ss:$8 sps:$4 sm:$0xff]  }
  0x24   :  { %1118 = vmatpush1.bf16.msra.mxu0 %v1702_v36  ;;  %977 = vmatprep.subr.bf16.mxu1 %v1703_v37  ;;  %v1771_v36 = vld [vmem:[%s2429_s1 + $0x144] ss:$8 sps:$4 sm:$0xff]  }
  0x25   :  { %1119 = vmatprep.subr.bf16.mxu0 %v1705_v38  ;;  %v1774_v37 = vld [vmem:[%s2429_s1 + $0x344] ss:$8 sps:$4 sm:$0xff]  }
  0x26   :  { %v34_v38 = vld [vmem:[%s2430_s0 + $0x80] sm:$0xff] }
  0x27   :  { %978 = vmatpush1.bf16.msra.mxu1 %v1707_v39  ;;  %v38_v39 = vld [vmem:[%s2430_s0 + $0xa0] sm:$0xff] }
  0x28   :  { %1120 = vmatpush1.bf16.msra.mxu0 %v1708_v40  ;;  %979 = vmatprep.subr.bf16.mxu1 %v1709_v41  ;;  %v1769_v40 = vld [vmem:[%s2429_s1 + $0x140] ss:$8 sps:$4 sm:$0xff]  }
  0x29   :  { %1121 = vmatprep.subr.bf16.mxu0 %v1711_v42  ;;  %v1772_v41 = vld [vmem:[%s2429_s1 + $0x340] ss:$8 sps:$4 sm:$0xff]   ;;  %v1444_v42 = vcombine.low %v36_v31, %v40_v32  ;;  %v1819_v31 = vld [vmem:[%s2429_s1 + $0x1c4] ss:$8 sps:$4 sm:$0xff]  }
  0x2a   :  { %v1822_v32 = vld [vmem:[%s2429_s1 + $0x3c4] ss:$8 sps:$4 sm:$0xff]  }
  0x2b   :  { %980 = vmatpush1.bf16.msra.mxu1 %v1713_v43  ;;  %v1441_v43 = vcombine.high %v34_v38, %v38_v39 }
  0x2c   :  { %1122 = vmatpush1.bf16.msra.mxu0 %v1714_v44  ;;  %981 = vmatprep.subr.bf16.mxu1 %v1715_v45  ;;  %v1440_v44 = vcombine.low %v34_v38, %v38_v39  ;;  %v1777_v45 = vld [vmem:[%s2429_s1 + $0x154] ss:$8 sps:$4 sm:$0xff]   ;;  %v1824_v39 = vld [vmem:[%s2429_s1 + $0x1d0] ss:$8 sps:$4 sm:$0xff]  }
  0x2d   :  { %1123 = vmatprep.subr.bf16.mxu0 %v1717_v46  ;;  %v1780_v46 = vld [vmem:[%s2429_s1 + $0x354] ss:$8 sps:$4 sm:$0xff]  }
  0x2e   :  { %v1830_v38 = vld [vmem:[%s2429_s1 + $0x3d4] ss:$8 sps:$4 sm:$0xff]  }
  0x2f   :  { %982 = vmatpush1.bf16.msra.mxu1 %v1719_v47  ;;  %v44_v47 = vld [vmem:[%s2430_s0 + $0xd0] sm:$0xff] }
  0x30   :  { %1124 = vmatpush1.bf16.msra.mxu0 %v1720_v48  ;;  %983 = vmatprep.subr.bf16.mxu1 %v1721_v51  ;;  %v1453_v48 = vcombine.high %v44_v47, %v44_v47  ;;  %v42_v51 = vld [vmem:[%s2430_s0 + $0xc0] sm:$0xff] }
  0x31   :  { %1125 = vmatprep.subr.bf16.mxu0 %v1723_v52  ;;  %v1783_v52 = vld [vmem:[%s2429_s1 + $0x164] ss:$8 sps:$4 sm:$0xff]   ;;  %v1449_v54 = vcombine.high %v42_v51, %v42_v51 }
  0x33   :  { %984 = vmatpush1.bf16.msra.mxu1 %v1725_v57  ;;  %v1452_v57 = vcombine.low %v44_v47, %v44_v47  ;;  %v1841_v47 = vld [vmem:[%s2429_s1 + $0x1f4] ss:$8 sps:$4 sm:$0xff]  }
  0x34   :  { %1126 = vmatpush1.bf16.msra.mxu0 %v1726_v58  ;;  %985 = vmatprep.subr.bf16.mxu1 %v1727_v59  ;;  %v1448_v58 = vcombine.low %v42_v51, %v42_v51  ;;  %v2193_v59 = vld [vmem:[%s2430_s0 + $0x18] sm:$0xff] }
  0x35   :  { %1127 = vmatprep.subr.bf16.mxu0 %v1729_v60  ;;  %v2198_v60 = vld [vmem:[%s2430_s0 + $0x38] sm:$0xff] }
  0x36   :  { %v1839_v51 = vld [vmem:[%s2429_s1 + $0x1f0] ss:$8 sps:$4 sm:$0xff]  }
  0x37   :  { %986 = vmatpush1.bf16.msra.mxu1 %v1731_v61  ;;  %v1789_v61 = vld [vmem:[%s2429_s1 + $0x174] ss:$8 sps:$4 sm:$0xff]  }
  0x38   :  { %1128 = vmatpush1.bf16.msra.mxu0 %v1732_v62  ;;  %987 = vmatprep.subr.bf16.mxu1 %v1733_v63  ;;  %v1792_v62 = vld [vmem:[%s2429_s1 + $0x374] ss:$8 sps:$4 sm:$0xff]   ;;  %v2209_v63 = vld [vmem:[%s2430_s0 + $0x8] sm:$0xff] }
  0x39   :  { %1129 = vmatprep.subr.bf16.mxu0 %v1735_v0  ;;  %v2214_v0 = vld [vmem:[%s2430_s0 + $0x28] sm:$0xff] }
  0x3b   :  { %988 = vmatpush1.bf16.msra.mxu1 %v1737_v1  ;;  %v1431_v1 = vcombine.high %v2193_v59, %v2198_v60 }
  0x3c   :  { %1130 = vmatpush1.bf16.msra.mxu0 %v1738_v2  ;;  %989 = vmatprep.subr.bf16.mxu1 %v1739_v3  ;;  %v1427_v2 = vcombine.high %v2209_v63, %v2214_v0  ;;  %v1787_v3 = vld [vmem:[%s2429_s1 + $0x170] ss:$8 sps:$4 sm:$0xff]  }
  0x3d   :  { %1131 = vmatprep.subr.bf16.mxu0 %v1741_v4  ;;  %v1790_v4 = vld [vmem:[%s2429_s1 + $0x370] ss:$8 sps:$4 sm:$0xff]  }
  0x3f   :  { %990 = vmatpush1.bf16.msra.mxu1 %v1743_v5  ;;  %v1795_v5 = vld [vmem:[%s2429_s1 + $0x184] ss:$8 sps:$4 sm:$0xff]  }
  0x40   :  { %1132 = vmatpush1.bf16.msra.mxu0 %v1744_v6  ;;  %1030 = vmatprep.subr.bf16.mxu1 %v1747_v7  ;;  %v1798_v6 = vld [vmem:[%s2429_s1 + $0x384] ss:$8 sps:$4 sm:$0xff]   ;;  %v1245_v7 = vld [vmem:[%s2431_s2 + $0x10] sm:$0xff] }
  0x41   :  { %1172 = vmatprep.subr.bf16.mxu0 %v1750_v8  ;;  %v1243_v8 = vld [vmem:[%s2431_s2] sm:$0xff]  ;;  %1262 = vperm.xlu1 %1648, %v1245_v7  }
  0x42   :  { %992 = vmatmul.mubr.bf16.vlgmr.msra.gmra.mrb[0].mxu1 %v1424_v9  ;;  %v1793_v9 = vld [vmem:[%s2429_s1 + $0x180] ss:$8 sps:$4 sm:$0xff]   ;;  %1252 = vperm.xlu0 %1647, %v1243_v8  }
  0x43   :  { %1134 = vmatmul.mubr.bf16.vlgmr.msra.gmra.mrb[0].mxu0 %v1428_v11  ;;  %1031 = vmatpush1.bf16.msra.mxu1 %v1745_v10  ;;  %v1796_v10 = vld [vmem:[%s2429_s1 + $0x380] ss:$8 sps:$4 sm:$0xff]   ;;  %v1246_v11 = vld [vmem:[%s2431_s2 + $0x18] sm:$0xff] }
  0x44   :  { %1173 = vmatpush1.bf16.msra.mxu0 %v1748_v12  ;;  %1032 = vmatprep.subr.bf16.mxu1 %v1753_v13  ;;  %v1244_v12 = vld [vmem:[%s2431_s2 + $0x8] sm:$0xff]  ;;  %v1801_v13 = vld [vmem:[%s2429_s1 + $0x194] ss:$8 sps:$4 sm:$0xff]  }
  0x45   :  { %1174 = vmatprep.subr.bf16.mxu0 %v1756_v14  ;;  %1143 = vmatprep.mubr.bf16.mxu0 %v1437_v21  ;;  %v1804_v14 = vld [vmem:[%s2429_s1 + $0x394] ss:$8 sps:$4 sm:$0xff]   ;;  %v1805_v21 = vld [vmem:[%s2429_s1 + $0x1a0] ss:$8 sps:$4 sm:$0xff]  }
  0x46   :  { %1001 = vmatprep.mubr.bf16.mxu1 %v1433_v28  ;;  %1267 = vperm.xlu1 %1648, %v1246_v11   ;;  %v1814_v28 = vld [vmem:[%s2429_s1 + $0x3b0] ss:$8 sps:$4 sm:$0xff]  }
  0x47   :  { %1033 = vmatpush1.bf16.msra.mxu1 %v1751_v15  ;;  %v1799_v15 = vld [vmem:[%s2429_s1 + $0x190] ss:$8 sps:$4 sm:$0xff]   ;;  %1257 = vperm.xlu0 %1647, %v1244_v12  }
  0x48   :  { %1175 = vmatpush1.bf16.msra.mxu0 %v1754_v16  ;;  %1034 = vmatprep.subr.bf16.mxu1 %v1759_v19  ;;  %v1802_v16 = vld [vmem:[%s2429_s1 + $0x390] ss:$8 sps:$4 sm:$0xff]   ;;  %v1807_v19 = vld [vmem:[%s2429_s1 + $0x1a4] ss:$8 sps:$4 sm:$0xff]  }
  0x49   :  { %1176 = vmatprep.subr.bf16.mxu0 %v1762_v20  ;;  %v1810_v20 = vld [vmem:[%s2429_s1 + $0x3a4] ss:$8 sps:$4 sm:$0xff]  }
  0x4a   :  { %1002 = vmatmul.mubr.bf16.gmra.mrb[4].mxu1 %v1432_v29  ;;  %1277 = vperm.xlu1 %1648, %v1248_v17   ;;  %v1301_v29 = vld [vmem:[%s2432_s3 + $0x10] sm:$0xff] }
  0x4b   :  { %1144 = vmatmul.mubr.bf16.gmra.mrb[4].mxu0 %v1436_v24  ;;  %1035 = vmatpush1.bf16.msra.mxu1 %v1757_v22  ;;  %v1808_v22 = vld [vmem:[%s2429_s1 + $0x3a0] ss:$8 sps:$4 sm:$0xff]   ;;  %v1249_v24 = vld [vmem:[%s2431_s2 + $0x30] sm:$0xff] }
  0x4c   :  { %1177 = vmatpush1.bf16.msra.mxu0 %v1760_v23  ;;  %1036 = vmatprep.subr.bf16.mxu1 %v1765_v27  ;;  %v1299_v23 = vld [vmem:[%s2432_s3] sm:$0xff]  ;;  %v1811_v27 = vld [vmem:[%s2429_s1 + $0x1b0] ss:$8 sps:$4 sm:$0xff]  }
  0x4d   :  { %1178 = vmatprep.subr.bf16.mxu0 %v1768_v30  ;;  %1153 = vmatprep.mubr.bf16.mxu0 %v1445_v35  ;;  %v1300_v30 = vld [vmem:[%s2432_s3 + $0x8] sm:$0xff]  ;;  %v1303_v35 = vld [vmem:[%s2432_s3 + $0x20] sm:$0xff] }
  0x4e   :  { %1011 = vmatprep.mubr.bf16.mxu1 %v1441_v43  ;;  %1272 = vperm.xlu0 %1647, %v1247_v18   ;;  %v1835_v43 = vld [vmem:[%s2429_s1 + $0x1e4] ss:$8 sps:$4 sm:$0xff]  }
  0x4f   :  { %1037 = vmatpush1.bf16.msra.mxu1 %v1763_v33  ;;  %1308 = vperm.xlu1 %1648, %v1299_v23   ;;  %v1817_v33 = vld [vmem:[%s2429_s1 + $0x1c0] ss:$8 sps:$4 sm:$0xff]  }
  0x50   :  { %1179 = vmatpush1.bf16.msra.mxu0 %v1766_v34  ;;  %1038 = vmatprep.subr.bf16.mxu1 %v1771_v36  ;;  %v1820_v34 = vld [vmem:[%s2429_s1 + $0x3c0] ss:$8 sps:$4 sm:$0xff]   ;;  %v1302_v36 = vld [vmem:[%s2432_s3 + $0x18] sm:$0xff] }
  0x51   :  { %1180 = vmatprep.subr.bf16.mxu0 %v1774_v37  ;;  %v1826_v37 = vld [vmem:[%s2429_s1 + $0x1d4] ss:$8 sps:$4 sm:$0xff]  }
  0x52   :  { %1012 = vmatmul.mubr.bf16.gmra.mrb[8].mxu1 %v1440_v44  ;;  %1282 = vperm.xlu0 %1647, %v1249_v24   ;;  %v1838_v44 = vld [vmem:[%s2429_s1 + $0x3e4] ss:$8 sps:$4 sm:$0xff]  }
  0x53   :  { %1154 = vmatmul.mubr.bf16.gmra.mrb[8].mxu0 %v1444_v42  ;;  %1039 = vmatpush1.bf16.msra.mxu1 %v1769_v40  ;;  %v1828_v40 = vld [vmem:[%s2429_s1 + $0x3d0] ss:$8 sps:$4 sm:$0xff]   ;;  %v1304_v42 = vld [vmem:[%s2432_s3 + $0x28] sm:$0xff] }
  0x54   :  { %1181 = vmatpush1.bf16.msra.mxu0 %v1772_v41  ;;  %1040 = vmatprep.subr.bf16.mxu1 %v1777_v45  ;;  %v1305_v41 = vld [vmem:[%s2432_s3 + $0x30] sm:$0xff]  ;;  %v1833_v45 = vld [vmem:[%s2429_s1 + $0x1e0] ss:$8 sps:$4 sm:$0xff]  }
  0x55   :  { %1182 = vmatprep.subr.bf16.mxu0 %v1780_v46  ;;  %1163 = vmatprep.mubr.bf16.mxu0 %v1453_v48  ;;  %v1836_v46 = vld [vmem:[%s2429_s1 + $0x3e0] ss:$8 sps:$4 sm:$0xff]   ;;  %v29_v48 = vld [vmem:[%s2430_s0 + $0x58] sm:$0xff] }
  0x56   :  { %1021 = vmatprep.mubr.bf16.mxu1 %v1449_v54  ;;  %1318 = vperm.xlu1 %1648, %v1301_v29   ;;  %v31_v54 = vld [vmem:[%s2430_s0 + $0x68] sm:$0xff] }
  0x57   :  { %1041 = vmatpush1.bf16.msra.mxu1 %v1775_v49  ;;  %1313 = vperm.xlu0 %1647, %v1300_v30   ;;  %v33_v49 = vld [vmem:[%s2430_s0 + $0x78] sm:$0xff] }
  0x58   :  { %1183 = vmatpush1.bf16.msra.mxu0 %v1778_v50  ;;  %1042 = vmatprep.subr.bf16.mxu1 %v1783_v52  ;;  %v1430_v50 = vcombine.low %v2193_v59, %v2198_v60  ;;  %v1439_v52 = vcombine.high %v29_v48, %v33_v49  ;;  %v1438_v59 = vcombine.low %v29_v48, %v33_v49 }
  0x59   :  { %1184 = vmatprep.subr.bf16.mxu0 %v1786_v53  ;;  %v27_v53 = vld [vmem:[%s2430_s0 + $0x48] sm:$0xff] }
  0x5a   :  { %1022 = vmatmul.mubr.bf16.gmra.mrb[12].mxu1 %v1448_v58  ;;  %1328 = vperm.xlu1 %1648, %v1303_v35   ;;  %v41_v58 = vld [vmem:[%s2430_s0 + $0xb8] sm:$0xff] }
  0x5b   :  { %1164 = vmatmul.mubr.bf16.gmra.mrb[12].mxu0 %v1452_v57  ;;  %1043 = vmatpush1.bf16.msra.mxu1 %v1781_v55  ;;  %v1426_v55 = vcombine.low %v2209_v63, %v2214_v0  ;;  %v37_v57 = vld [vmem:[%s2430_s0 + $0x98] sm:$0xff]  ;;  %v1434_v63 = vcombine.low %v27_v53, %v31_v54 }
  0x5c   :  { %1185 = vmatpush1.bf16.msra.mxu0 %v1784_v56  ;;  %1044 = vmatprep.subr.bf16.mxu1 %v1789_v61  ;;  %v1435_v56 = vcombine.high %v27_v53, %v31_v54  ;;  %v1447_v60 = vcombine.high %v37_v57, %v41_v58  ;;  %v35_v61 = vld [vmem:[%s2430_s0 + $0x88] sm:$0xff] }
  0x5d   :  { %1186 = vmatprep.subr.bf16.mxu0 %v1792_v62  ;;  %1582 = vmatprep.mubr.msk.bf16.mxu0 %vm946_vm0, %v1431_v1  ;;  %v39_v62 = vld [vmem:[%s2430_s0 + $0xa8] sm:$0xff]  ;;  %v45_v1 = vld [vmem:[%s2430_s0 + $0xd8] sm:$0xff] }
  0x5e   :  { %1062 = vmatprep.mubr.bf16.mxu1 %v1427_v2  ;;  %1323 = vperm.xlu0 %1647, %v1302_v36   ;;  %v1443_v0 = vcombine.high %v35_v61, %v39_v62  ;;  %v1446_v2 = vcombine.low %v37_v57, %v41_v58  ;;  %v1454_v7 = vcombine.low %v45_v1, %v45_v1 }
  0x5f   :  { %1045 = vmatpush1.bf16.msra.mxu1 %v1787_v3  ;;  %1338 = vperm.xlu1 %1648, %v1305_v41   ;;  %v1455_v3 = vcombine.high %v45_v1, %v45_v1 }
  0x60   :  { %1187 = vmatpush1.bf16.msra.mxu0 %v1790_v4  ;;  %1046 = vmatprep.subr.bf16.mxu1 %v1795_v5  ;;  %v43_v4 = vld [vmem:[%s2430_s0 + $0xc8] sm:$0xff]  ;;  %v1442_v5 = vcombine.low %v35_v61, %v39_v62 }
  0x61   :  { %1188 = vmatprep.subr.bf16.mxu0 %v1798_v6  ;;  %v1451_v6 = vcombine.high %v43_v4, %v43_v4  ;;  %v1450_v8 = vcombine.low %v43_v4, %v43_v4 }
  0x62   :  { %1333 = vperm.xlu0 %1647, %v1304_v42  }
  0x63   :  { %1047 = vmatpush1.bf16.msra.mxu1 %v1793_v9 }
  0x64   :  { %1189 = vmatpush1.bf16.msra.mxu0 %v1796_v10  ;;  %1048 = vmatprep.subr.bf16.mxu1 %v1801_v13 }
  0x65   :  { %1190 = vmatprep.subr.bf16.mxu0 %v1804_v14 }
  0x67   :  { %1049 = vmatpush1.bf16.msra.mxu1 %v1799_v15 }
  0x68   :  { %1191 = vmatpush1.bf16.msra.mxu0 %v1802_v16  ;;  %1050 = vmatprep.subr.bf16.mxu1 %v1807_v19 }
  0x69   :  { %1192 = vmatprep.subr.bf16.mxu0 %v1810_v20 }
  0x6b   :  { %1051 = vmatpush1.bf16.msra.mxu1 %v1805_v21 }
  0x6c   :  { %1193 = vmatpush1.bf16.msra.mxu0 %v1808_v22  ;;  %1052 = vmatprep.subr.bf16.mxu1 %v1813_v25 }
  0x6d   :  { %1194 = vmatprep.subr.bf16.mxu0 %v1816_v26 }
  0x6f   :  { %1053 = vmatpush1.bf16.msra.mxu1 %v1811_v27 }
  0x70   :  { %1195 = vmatpush1.bf16.msra.mxu0 %v1814_v28  ;;  %1054 = vmatprep.subr.bf16.mxu1 %v1819_v31 }
  0x71   :  { %1196 = vmatprep.subr.bf16.mxu0 %v1822_v32 }
  0x73   :  { %1055 = vmatpush1.bf16.msra.mxu1 %v1817_v33 }
  0x74   :  { %1197 = vmatpush1.bf16.msra.mxu0 %v1820_v34  ;;  %1056 = vmatprep.subr.bf16.mxu1 %v1826_v37 }
  0x75   :  { %1198 = vmatprep.subr.bf16.mxu0 %v1830_v38 }
  0x77   :  { %1057 = vmatpush1.bf16.msra.mxu1 %v1824_v39 }
  0x78   :  { %1199 = vmatpush1.bf16.msra.mxu0 %v1828_v40  ;;  %1058 = vmatprep.subr.bf16.mxu1 %v1835_v43 }
  0x79   :  { %1200 = vmatprep.subr.bf16.mxu0 %v1838_v44 }
  0x7b   :  { %1059 = vmatpush1.bf16.msra.mxu1 %v1833_v45 }
  0x7c   :  { %1201 = vmatpush1.bf16.msra.mxu0 %v1836_v46  ;;  %1060 = vmatprep.subr.bf16.mxu1 %v1841_v47 }
  0x7f   :  { %1205 = vmatmul.mubr.bf16.vlgmr.msra.gmra.mrb[0].mxu0 %v1430_v50  ;;  %1061 = vmatpush1.bf16.msra.mxu1 %v1839_v51 }
  0x80   :  { %1583 = vmatprep.mubr.msk.bf16.mxu0 %vm946_vm0, %v1439_v52 }
  0x82   :  { %1063 = vmatmul.mubr.bf16.vlgmr.msra.gmra.mrb[0].mxu1 %v1426_v55 }
  0x83   :  { %1072 = vmatprep.mubr.bf16.mxu1 %v1435_v56 }
  0x87   :  { %1215 = vmatmul.mubr.bf16.gmra.mrb[4].mxu0 %v1438_v59 }
  0x88   :  { %1584 = vmatprep.mubr.msk.bf16.mxu0 %vm946_vm0, %v1447_v60 }
  0x8a   :  { %1073 = vmatmul.mubr.bf16.gmra.mrb[4].mxu1 %v1434_v63 }
  0x8b   :  { %1082 = vmatprep.mubr.bf16.mxu1 %v1443_v0 }
  0x8f   :  { %1225 = vmatmul.mubr.bf16.gmra.mrb[8].mxu0 %v1446_v2 }
  0x90   :  { %1585 = vmatprep.mubr.msk.bf16.mxu0 %vm946_vm0, %v1455_v3 }
  0x92   :  { %1083 = vmatmul.mubr.bf16.gmra.mrb[8].mxu1 %v1442_v5 }
  0x93   :  { %1092 = vmatprep.mubr.bf16.mxu1 %v1451_v6 }
  0x97   :  { %1235 = vmatmul.mubr.bf16.gmra.mrb[12].mxu0 %v1454_v7 }
  0x9a   :  { %1093 = vmatmul.mubr.bf16.gmra.mrb[12].mxu1 %v1450_v8 }
  0xc0   :  { %v1263_v10 = vpop.permute.xlu1 %1262 }
  0xc1   :  { %v1253_v9 = vpop.permute.xlu0 %1252 }
  0xc5   :  { %v1268_v12 = vpop.permute.xlu1 %1267 }
  0xc6   :  { %v1258_v11 = vpop.permute.xlu0 %1257 }
  0xc9   :  { %v2398_v16 = vpop.permute.xlu1 %1277 }
  0xcd   :  { %v2396_v13 = vpop.permute.xlu0 %1272 }
  0xce   :  { %v1309_v28 = vpop.permute.xlu1 %1308 }
  0xd1   :  { %v2400_v19 = vpop.permute.xlu0 %1282 }
  0xd5   :  { %v1319_v55 = vpop.permute.xlu1 %1318 }
  0xd6   :  { %v1314_v35 = vpop.permute.xlu0 %1313 }
  0xdd   :  { %v1324_v63 = vpop.permute.xlu0 %1323 }
 0x152   :  { %v1206_v14 = vpop.f32.mrb[0].mxu0 }
 0x153   :  { %v1208_v15 = vpop.f32.mrb[1].mxu0 }
 0x154   :  { %v1210_v17 = vpop.f32.mrb[2].mxu0 }
 0x155   :  { %v1212_v18 = vpop.f32.mrb[3].mxu0  ;;  %v1064_v20 = vpop.f32.mrb[0].mxu1 }
 0x156   :  { %v1600_v21 = vadd.f32 %v1206_v14, %v1064_v20  ;;  %v1066_v22 = vpop.f32.mrb[1].mxu1 }
 0x157   :  { %v1601_v23 = vadd.f32 %v1208_v15, %v1066_v22  ;;  %v1068_v24 = vpop.f32.mrb[2].mxu1 }
 0x158   :  { %v1285_v25 = vmul.f32 %v1600_v21, %v1253_v9  ;;  %v1602_v26 = vadd.f32 %v1210_v17, %v1068_v24  ;;  %v1070_v27 = vpop.f32.mrb[3].mxu1 }
 0x159   :  { %v1286_v29 = vmul.f32 %v1601_v23, %v1253_v9  ;;  %v1603_v30 = vadd.f32 %v1212_v18, %v1070_v27  ;;  %v1329_v23 = vpop.permute.xlu1 %1328 }
 0x15a   :  { %v1216_v31 = vpop.f32.mrb[4].mxu0  ;;  %v1341_v32 = vadd.f32 %v1309_v28, %v1285_v25  ;;  %v1287_v33 = vmul.f32 %v1602_v26, %v1258_v11 }
 0x15b   :  { %v1218_v34 = vpop.f32.mrb[5].mxu0  ;;  %v1342_v36 = vadd.f32 %v1309_v28, %v1286_v29  ;;  %v1288_v37 = vmul.f32 %v1603_v30, %v1258_v11  ;;  %v1334_v30 = vpop.permute.xlu0 %1333 }
 0x15c   :  { %v1220_v38 = vpop.f32.mrb[6].mxu0  ;;  %v1355_v39 = vmax.f32 %v1341_v32, 0.0  ;;  %v1343_v40 = vadd.f32 %v1314_v35, %v1287_v33 }
 0x15d   :  { %v1222_v41 = vpop.f32.mrb[7].mxu0  ;;  %v1356_v42 = vmax.f32 %v1342_v36, 0.0  ;;  %v1344_v43 = vadd.f32 %v1314_v35, %v1288_v37  ;;  %v1074_v44 = vpop.f32.mrb[4].mxu1 }
 0x15e   :  { %v1357_v45 = vmax.f32 %v1343_v40, 0.0  ;;  %v1604_v46 = vadd.f32 %v1216_v31, %v1074_v44  ;;  %v1076_v47 = vpop.f32.mrb[5].mxu1 }
 0x15f   :  { %v1593_v48 = vpack.c.bf16 %v1356_v42, %v1355_v39  ;;  %v1358_v49 = vmax.f32 %v1344_v43, 0.0  ;;  %v1605_v50 = vadd.f32 %v1218_v34, %v1076_v47  ;;  %v1078_v51 = vpop.f32.mrb[6].mxu1 }
 0x160   :  { %v1289_v52 = vmul.f32 %v1604_v46, %v1263_v10  ;;  %v1606_v53 = vadd.f32 %v1220_v38, %v1078_v51  ;;  %v1080_v54 = vpop.f32.mrb[7].mxu1 }
 0x161   :  { %1413 = vst [vmem:[%s2433_s4] sm:$0xff] %v1593_v48  ;;  %v1594_v56 = vpack.c.bf16 %v1358_v49, %v1357_v45  ;;  %v1290_v57 = vmul.f32 %v1605_v50, %v1263_v10  ;;  %v1607_v58 = vadd.f32 %v1222_v41, %v1080_v54  ;;  %v1339_v48 = vpop.permute.xlu1 %1338 }
 0x162   :  { %v1226_v59 = vpop.f32.mrb[8].mxu0  ;;  %v1345_v60 = vadd.f32 %v1319_v55, %v1289_v52  ;;  %v1291_v61 = vmul.f32 %v1606_v53, %v1268_v12 }
 0x163   :  { %v1228_v62 = vpop.f32.mrb[9].mxu0  ;;  %1414 = vst [vmem:[%s2433_s4 + $0x8] sm:$0xff] %v1594_v56  ;;  %v1346_v0 = vadd.f32 %v1319_v55, %v1290_v57  ;;  %v1292_v1 = vmul.f32 %v1607_v58, %v1268_v12 }
 0x164   :  { %v1230_v2 = vpop.f32.mrb[10].mxu0  ;;  %v1359_v3 = vmax.f32 %v1345_v60, 0.0  ;;  %v1347_v4 = vadd.f32 %v1324_v63, %v1291_v61 }
 0x165   :  { %v1232_v5 = vpop.f32.mrb[11].mxu0  ;;  %v1360_v6 = vmax.f32 %v1346_v0, 0.0  ;;  %v1348_v7 = vadd.f32 %v1324_v63, %v1292_v1  ;;  %v1084_v8 = vpop.f32.mrb[8].mxu1 }
 0x166   :  { %v1361_v9 = vmax.f32 %v1347_v4, 0.0  ;;  %v1608_v10 = vadd.f32 %v1226_v59, %v1084_v8  ;;  %v1086_v11 = vpop.f32.mrb[9].mxu1 }
 0x167   :  { %v1595_v14 = vpack.c.bf16 %v1360_v6, %v1359_v3  ;;  %v1362_v15 = vmax.f32 %v1348_v7, 0.0  ;;  %v1609_v17 = vadd.f32 %v1228_v62, %v1086_v11  ;;  %v1088_v18 = vpop.f32.mrb[10].mxu1 }
 0x168   :  { %v1293_v20 = vmul.f32 %v1608_v10, %v2396_v13  ;;  %v1610_v21 = vadd.f32 %v1230_v2, %v1088_v18  ;;  %v1090_v22 = vpop.f32.mrb[11].mxu1 }
 0x169   :  { %1415 = vst [vmem:[%s2433_s4 + $0x10] sm:$0xff] %v1595_v14  ;;  %v1596_v12 = vpack.c.bf16 %v1362_v15, %v1361_v9  ;;  %v1294_v24 = vmul.f32 %v1609_v17, %v2396_v13  ;;  %v1611_v25 = vadd.f32 %v1232_v5, %v1090_v22 }
 0x16a   :  { %v1236_v26 = vpop.f32.mrb[12].mxu0  ;;  %v1349_v27 = vadd.f32 %v1329_v23, %v1293_v20  ;;  %v1295_v28 = vmul.f32 %v1610_v21, %v2398_v16 }
 0x16b   :  { %v1238_v29 = vpop.f32.mrb[13].mxu0  ;;  %1416 = vst [vmem:[%s2433_s4 + $0x18] sm:$0xff] %v1596_v12  ;;  %v1350_v31 = vadd.f32 %v1329_v23, %v1294_v24  ;;  %v1296_v32 = vmul.f32 %v1611_v25, %v2398_v16 }
 0x16c   :  { %v1240_v33 = vpop.f32.mrb[14].mxu0  ;;  %v1363_v34 = vmax.f32 %v1349_v27, 0.0  ;;  %v1351_v35 = vadd.f32 %v1334_v30, %v1295_v28 }
 0x16d   :  { %v1241_v36 = vpop.f32.mrb[15].mxu0  ;;  %v1364_v37 = vmax.f32 %v1350_v31, 0.0  ;;  %v1352_v13 = vadd.f32 %v1334_v30, %v1296_v32  ;;  %v1094_v38 = vpop.f32.mrb[12].mxu1 }
 0x16e   :  { %v1365_v39 = vmax.f32 %v1351_v35, 0.0  ;;  %v1612_v40 = vadd.f32 %v1236_v26, %v1094_v38  ;;  %v1096_v41 = vpop.f32.mrb[13].mxu1 }
 0x16f   :  { %v1597_v42 = vpack.c.bf16 %v1364_v37, %v1363_v34  ;;  %v1366_v43 = vmax.f32 %v1352_v13, 0.0  ;;  %v1613_v44 = vadd.f32 %v1238_v29, %v1096_v41  ;;  %v1098_v45 = vpop.f32.mrb[14].mxu1 }
 0x170   :  { %v1297_v46 = vmul.f32 %v1612_v40, %v2400_v19  ;;  %v1099_v47 = vpop.f32.mrb[15].mxu1 }
 0x171   :  { %1417 = vst [vmem:[%s2433_s4 + $0x20] sm:$0xff] %v1597_v42  ;;  %v1598_v16 = vpack.c.bf16 %v1366_v43, %v1365_v39  ;;  %v1298_v49 = vmul.f32 %v1613_v44, %v2400_v19 }
 0x172   :  { %v1353_v50 = vadd.f32 %v1339_v48, %v1297_v46 }
 0x173   :  { %1418 = vst [vmem:[%s2433_s4 + $0x28] sm:$0xff] %v1598_v16  ;;  %v1354_v51 = vadd.f32 %v1339_v48, %v1298_v49 }
 0x174   :  { %v1367_v52 = vmax.f32 %v1353_v50, 0.0 }
 0x175   :  { %v1368_v53 = vmax.f32 %v1354_v51, 0.0 }
 0x177   :  { %v1599_v54 = vpack.c.bf16 %v1368_v53, %v1367_v52 }
 0x179   :  { %1419 = vst [vmem:[%s2433_s4 + $0x30] sm:$0xff] %v1599_v54 }

// kernel: dc_generator_forward.6
= control target key start
LH: loop header
LB: loop body
LE: loop exit
PB: predicated region body
PF: predicated region fallthrough
CT: control target
= control target key end

     0   :  { %s2296_s15 = smov 0   ;;  %s2298_s16 = smov 0   ;;  %s2772_s0 = inlined_call_operand.vmem [shape: bf16[28,896], index: 0, kind: input, shape index: {}]   ;;  %s2773_s1 = inlined_call_operand.vmem [shape: bf16[896,512], index: 1, kind: input, shape index: {}]   ;;  %s2774_s2 = inlined_call_operand.vmem [shape: f32[28,1], index: 2, kind: input, shape index: {}]   ;;  %s2775_s3 = inlined_call_operand.vmem [shape: f32[28,1], index: 3, kind: input, shape index: {}]   ;;  %s2776_s4 = inlined_call_operand.vmem [shape: bf16[28,512], index: 4, kind: output, shape index: {}]  }
   0x1   :  { %s2300_s17 = smov 0  }
   0x2 LB: > { %s1856_s18 = sadd.s32 4294967295, %s2268_s17   ;;  %s2313_s19 = sadd.s32 1, %s2268_s17   ;;  %s2268_s17 = sphi %s2300_s17, %s2780_s17   ;;  %s2264_s16 = sphi %s2298_s16, %s2779_s16   ;;  %s2260_s15 = sphi %s2296_s15, %s2778_s15  }
   0x3   : > { %s39_s20 = ssub.s32 %s2268_s17, %s2313_s19  ;;  %s42_s21 = sadd.s32 1, %s2264_s16 }
   0x4   : > { %p40_p0 = scmp.eq.s32.totalorder %s39_s20, 0  ;;  %p49_p1 = scmp.ne.s32.totalorder %s2264_s16, %s2260_s15 }
   0x5   : > { %p50_p2 = scmp.eq.s32.totalorder %s2268_s17, 0  ;;  %p121_p3 = scmp.eq.s32.totalorder %s1856_s18, 1 }
   0x6   : > { %s2324_s22 = scalar_select %p40_p0, %s2264_s16, %s42_s21  }
   0x7   : > { %p51_p4 = por %p50_p2, %p49_p1  ;;  %p2326_p5 = por %p121_p3, %p49_p1 }
   0x8   : > { %p1859_p6 = scmp.ge.s32.totalorder %s2268_s17, 2 }
   0xa   : > { %152 = sbr.rel (%p1859_p6) target bundleno = 77 (0x4d), region = 28 }
  0x11   : > { %155 = sbr.rel (!%p51_p4) target bundleno = 77 (0x4d), region = 32  ;;  %s157_s24 = sand.u32 (%p51_p4), 1, %s2264_s16  }
  0x12   : > { %s1999_s25 = sshll.u32 (%p51_p4), %s2268_s17, 3  ;;  %s2029_s26 = smul.u32 (%p51_p4), 896, %s157_s24 }
  0x13   : > { %s2336_s29 = scalar_lea.vmem (%p51_p4), %s2773_s1, %s1999_s25 }
  0x14   : > { %v412_v0 = vld [vmem:[%s2336_s29] sm:$0xff] (%p51_p4)  ;;  %v414_v1 = vld [vmem:[%s2336_s29 + $0x10] sm:$0xff] (%p51_p4)  ;;  %s2344_s30 = scalar_lea.vmem (%p51_p4), [#allocation2], %s2029_s26 }
  0x15   : > { %v416_v2 = vld [vmem:[%s2336_s29 + $0x20] sm:$0xff] (%p51_p4)  ;;  %v418_v3 = vld [vmem:[%s2336_s29 + $0x30] sm:$0xff] (%p51_p4)  ;;  %413 = vst [vmem:[%s2344_s30] sm:$0xff] (%p51_p4), %v412_v0  ;;  %415 = vst [vmem:[%s2344_s30 + $0x8] sm:$0xff] (%p51_p4), %v414_v1 }
  0x16   : > { %v420_v4 = vld [vmem:[%s2336_s29 + $0x40] sm:$0xff] (%p51_p4)  ;;  %v422_v5 = vld [vmem:[%s2336_s29 + $0x50] sm:$0xff] (%p51_p4)  ;;  %417 = vst [vmem:[%s2344_s30 + $0x10] sm:$0xff] (%p51_p4), %v416_v2  ;;  %419 = vst [vmem:[%s2344_s30 + $0x18] sm:$0xff] (%p51_p4), %v418_v3 }
  0x17   : > { %421 = vst [vmem:[%s2344_s30 + $0x20] sm:$0xff] (%p51_p4), %v420_v4  ;;  %423 = vst [vmem:[%s2344_s30 + $0x28] sm:$0xff] (%p51_p4), %v422_v5  ;;  %v424_v6 = vld [vmem:[%s2336_s29 + $0x60] sm:$0xff] (%p51_p4)  ;;  %v426_v7 = vld [vmem:[%s2336_s29 + $0x70] sm:$0xff] (%p51_p4) }
  0x18   : > { %v428_v8 = vld [vmem:[%s2336_s29 + $0x80] sm:$0xff]  ;;  %425 = vst [vmem:[%s2344_s30 + $0x30] sm:$0xff] %v424_v6  ;;  %427 = vst [vmem:[%s2344_s30 + $0x38] sm:$0xff] %v426_v7  ;;  %v430_v9 = vld [vmem:[%s2336_s29 + $0x90] sm:$0xff] }
  0x19   : > { %429 = vst [vmem:[%s2344_s30 + $0x40] sm:$0xff] %v428_v8  ;;  %v432_v10 = vld [vmem:[%s2336_s29 + $0xa0] sm:$0xff]  ;;  %v434_v11 = vld [vmem:[%s2336_s29 + $0xb0] sm:$0xff]  ;;  %431 = vst [vmem:[%s2344_s30 + $0x48] sm:$0xff] %v430_v9 }
  0x1a   : > { %433 = vst [vmem:[%s2344_s30 + $0x50] sm:$0xff] %v432_v10  ;;  %435 = vst [vmem:[%s2344_s30 + $0x58] sm:$0xff] %v434_v11  ;;  %v436_v12 = vld [vmem:[%s2336_s29 + $0xc0] sm:$0xff]  ;;  %v438_v13 = vld [vmem:[%s2336_s29 + $0xd0] sm:$0xff] }
  0x1b   : > { %v440_v14 = vld [vmem:[%s2336_s29 + $0xe0] sm:$0xff]  ;;  %437 = vst [vmem:[%s2344_s30 + $0x60] sm:$0xff] %v436_v12  ;;  %439 = vst [vmem:[%s2344_s30 + $0x68] sm:$0xff] %v438_v13  ;;  %v442_v15 = vld [vmem:[%s2336_s29 + $0xf0] sm:$0xff] }
  0x1c   : > { %441 = vst [vmem:[%s2344_s30 + $0x70] sm:$0xff] %v440_v14  ;;  %v444_v16 = vld [vmem:[%s2336_s29 + $0x100] sm:$0xff]  ;;  %v446_v17 = vld [vmem:[%s2336_s29 + $0x110] sm:$0xff]  ;;  %443 = vst [vmem:[%s2344_s30 + $0x78] sm:$0xff] %v442_v15 }
  0x1d   : > { %445 = vst [vmem:[%s2344_s30 + $0x80] sm:$0xff] %v444_v16  ;;  %447 = vst [vmem:[%s2344_s30 + $0x88] sm:$0xff] %v446_v17  ;;  %v448_v18 = vld [vmem:[%s2336_s29 + $0x120] sm:$0xff]  ;;  %v450_v19 = vld [vmem:[%s2336_s29 + $0x130] sm:$0xff] }
  0x1e   : > { %v452_v20 = vld [vmem:[%s2336_s29 + $0x140] sm:$0xff]  ;;  %449 = vst [vmem:[%s2344_s30 + $0x90] sm:$0xff] %v448_v18  ;;  %451 = vst [vmem:[%s2344_s30 + $0x98] sm:$0xff] %v450_v19  ;;  %v454_v21 = vld [vmem:[%s2336_s29 + $0x150] sm:$0xff] }
  0x1f   : > { %453 = vst [vmem:[%s2344_s30 + $0xa0] sm:$0xff] %v452_v20  ;;  %v456_v22 = vld [vmem:[%s2336_s29 + $0x160] sm:$0xff]  ;;  %v458_v23 = vld [vmem:[%s2336_s29 + $0x170] sm:$0xff]  ;;  %455 = vst [vmem:[%s2344_s30 + $0xa8] sm:$0xff] %v454_v21 }
  0x20   : > { %457 = vst [vmem:[%s2344_s30 + $0xb0] sm:$0xff] %v456_v22  ;;  %459 = vst [vmem:[%s2344_s30 + $0xb8] sm:$0xff] %v458_v23  ;;  %v460_v24 = vld [vmem:[%s2336_s29 + $0x180] sm:$0xff]  ;;  %v462_v25 = vld [vmem:[%s2336_s29 + $0x190] sm:$0xff] }
  0x21   : > { %v464_v26 = vld [vmem:[%s2336_s29 + $0x1a0] sm:$0xff]  ;;  %461 = vst [vmem:[%s2344_s30 + $0xc0] sm:$0xff] %v460_v24  ;;  %463 = vst [vmem:[%s2344_s30 + $0xc8] sm:$0xff] %v462_v25  ;;  %v466_v27 = vld [vmem:[%s2336_s29 + $0x1b0] sm:$0xff] }
  0x22   : > { %465 = vst [vmem:[%s2344_s30 + $0xd0] sm:$0xff] %v464_v26  ;;  %v468_v28 = vld [vmem:[%s2336_s29 + $0x1c0] sm:$0xff]  ;;  %v470_v29 = vld [vmem:[%s2336_s29 + $0x1d0] sm:$0xff]  ;;  %467 = vst [vmem:[%s2344_s30 + $0xd8] sm:$0xff] %v466_v27 }
  0x23   : > { %469 = vst [vmem:[%s2344_s30 + $0xe0] sm:$0xff] %v468_v28  ;;  %471 = vst [vmem:[%s2344_s30 + $0xe8] sm:$0xff] %v470_v29  ;;  %v472_v30 = vld [vmem:[%s2336_s29 + $0x1e0] sm:$0xff]  ;;  %v474_v31 = vld [vmem:[%s2336_s29 + $0x1f0] sm:$0xff] }
  0x24   : > { %v476_v32 = vld [vmem:[%s2336_s29 + $0x200] sm:$0xff]  ;;  %473 = vst [vmem:[%s2344_s30 + $0xf0] sm:$0xff] %v472_v30  ;;  %475 = vst [vmem:[%s2344_s30 + $0xf8] sm:$0xff] %v474_v31  ;;  %v478_v33 = vld [vmem:[%s2336_s29 + $0x210] sm:$0xff] }
  0x25   : > { %477 = vst [vmem:[%s2344_s30 + $0x100] sm:$0xff] %v476_v32  ;;  %v480_v34 = vld [vmem:[%s2336_s29 + $0x220] sm:$0xff]  ;;  %v482_v35 = vld [vmem:[%s2336_s29 + $0x230] sm:$0xff]  ;;  %479 = vst [vmem:[%s2344_s30 + $0x108] sm:$0xff] %v478_v33 }
  0x26   : > { %481 = vst [vmem:[%s2344_s30 + $0x110] sm:$0xff] %v480_v34  ;;  %483 = vst [vmem:[%s2344_s30 + $0x118] sm:$0xff] %v482_v35  ;;  %v484_v36 = vld [vmem:[%s2336_s29 + $0x240] sm:$0xff]  ;;  %v486_v37 = vld [vmem:[%s2336_s29 + $0x250] sm:$0xff] }
  0x27   : > { %v488_v38 = vld [vmem:[%s2336_s29 + $0x260] sm:$0xff]  ;;  %485 = vst [vmem:[%s2344_s30 + $0x120] sm:$0xff] %v484_v36  ;;  %487 = vst [vmem:[%s2344_s30 + $0x128] sm:$0xff] %v486_v37  ;;  %v490_v39 = vld [vmem:[%s2336_s29 + $0x270] sm:$0xff] }
  0x28   : > { %489 = vst [vmem:[%s2344_s30 + $0x130] sm:$0xff] %v488_v38  ;;  %v492_v40 = vld [vmem:[%s2336_s29 + $0x280] sm:$0xff]  ;;  %v494_v41 = vld [vmem:[%s2336_s29 + $0x290] sm:$0xff]  ;;  %491 = vst [vmem:[%s2344_s30 + $0x138] sm:$0xff] %v490_v39 }
  0x29   : > { %493 = vst [vmem:[%s2344_s30 + $0x140] sm:$0xff] %v492_v40  ;;  %495 = vst [vmem:[%s2344_s30 + $0x148] sm:$0xff] %v494_v41  ;;  %v496_v42 = vld [vmem:[%s2336_s29 + $0x2a0] sm:$0xff]  ;;  %v498_v43 = vld [vmem:[%s2336_s29 + $0x2b0] sm:$0xff] }
  0x2a   : > { %v500_v44 = vld [vmem:[%s2336_s29 + $0x2c0] sm:$0xff]  ;;  %497 = vst [vmem:[%s2344_s30 + $0x150] sm:$0xff] %v496_v42  ;;  %499 = vst [vmem:[%s2344_s30 + $0x158] sm:$0xff] %v498_v43  ;;  %v502_v45 = vld [vmem:[%s2336_s29 + $0x2d0] sm:$0xff] }
  0x2b   : > { %501 = vst [vmem:[%s2344_s30 + $0x160] sm:$0xff] %v500_v44  ;;  %v504_v46 = vld [vmem:[%s2336_s29 + $0x2e0] sm:$0xff]  ;;  %v506_v47 = vld [vmem:[%s2336_s29 + $0x2f0] sm:$0xff]  ;;  %503 = vst [vmem:[%s2344_s30 + $0x168] sm:$0xff] %v502_v45 }
  0x2c   : > { %505 = vst [vmem:[%s2344_s30 + $0x170] sm:$0xff] %v504_v46  ;;  %507 = vst [vmem:[%s2344_s30 + $0x178] sm:$0xff] %v506_v47  ;;  %v508_v48 = vld [vmem:[%s2336_s29 + $0x300] sm:$0xff]  ;;  %v510_v49 = vld [vmem:[%s2336_s29 + $0x310] sm:$0xff] }
  0x2d   : > { %v512_v50 = vld [vmem:[%s2336_s29 + $0x320] sm:$0xff]  ;;  %509 = vst [vmem:[%s2344_s30 + $0x180] sm:$0xff] %v508_v48  ;;  %511 = vst [vmem:[%s2344_s30 + $0x188] sm:$0xff] %v510_v49  ;;  %v514_v51 = vld [vmem:[%s2336_s29 + $0x330] sm:$0xff] }
  0x2e   : > { %513 = vst [vmem:[%s2344_s30 + $0x190] sm:$0xff] %v512_v50  ;;  %v516_v52 = vld [vmem:[%s2336_s29 + $0x340] sm:$0xff]  ;;  %v518_v53 = vld [vmem:[%s2336_s29 + $0x350] sm:$0xff]  ;;  %515 = vst [vmem:[%s2344_s30 + $0x198] sm:$0xff] %v514_v51 }
  0x2f   : > { %517 = vst [vmem:[%s2344_s30 + $0x1a0] sm:$0xff] %v516_v52  ;;  %519 = vst [vmem:[%s2344_s30 + $0x1a8] sm:$0xff] %v518_v53  ;;  %v520_v54 = vld [vmem:[%s2336_s29 + $0x360] sm:$0xff]  ;;  %v522_v55 = vld [vmem:[%s2336_s29 + $0x370] sm:$0xff] }
  0x30   : > { %v524_v56 = vld [vmem:[%s2336_s29 + $0x380] sm:$0xff]  ;;  %521 = vst [vmem:[%s2344_s30 + $0x1b0] sm:$0xff] %v520_v54  ;;  %523 = vst [vmem:[%s2344_s30 + $0x1b8] sm:$0xff] %v522_v55  ;;  %v526_v57 = vld [vmem:[%s2336_s29 + $0x390] sm:$0xff] }
  0x31   : > { %525 = vst [vmem:[%s2344_s30 + $0x1c0] sm:$0xff] %v524_v56  ;;  %v528_v58 = vld [vmem:[%s2336_s29 + $0x3a0] sm:$0xff]  ;;  %v530_v59 = vld [vmem:[%s2336_s29 + $0x3b0] sm:$0xff]  ;;  %527 = vst [vmem:[%s2344_s30 + $0x1c8] sm:$0xff] %v526_v57 }
  0x32   : > { %529 = vst [vmem:[%s2344_s30 + $0x1d0] sm:$0xff] %v528_v58  ;;  %531 = vst [vmem:[%s2344_s30 + $0x1d8] sm:$0xff] %v530_v59  ;;  %v532_v60 = vld [vmem:[%s2336_s29 + $0x3c0] sm:$0xff]  ;;  %v534_v61 = vld [vmem:[%s2336_s29 + $0x3d0] sm:$0xff] }
  0x33   : > { %v536_v62 = vld [vmem:[%s2336_s29 + $0x3e0] sm:$0xff]  ;;  %533 = vst [vmem:[%s2344_s30 + $0x1e0] sm:$0xff] %v532_v60  ;;  %535 = vst [vmem:[%s2344_s30 + $0x1e8] sm:$0xff] %v534_v61  ;;  %v538_v63 = vld [vmem:[%s2336_s29 + $0x3f0] sm:$0xff] }
  0x34   : > { %537 = vst [vmem:[%s2344_s30 + $0x1f0] sm:$0xff] %v536_v62  ;;  %v540_v0 = vld [vmem:[%s2336_s29 + $0x400] sm:$0xff]  ;;  %v542_v1 = vld [vmem:[%s2336_s29 + $0x410] sm:$0xff]  ;;  %539 = vst [vmem:[%s2344_s30 + $0x1f8] sm:$0xff] %v538_v63 }
  0x35   : > { %541 = vst [vmem:[%s2344_s30 + $0x200] sm:$0xff] %v540_v0  ;;  %543 = vst [vmem:[%s2344_s30 + $0x208] sm:$0xff] %v542_v1  ;;  %v544_v2 = vld [vmem:[%s2336_s29 + $0x420] sm:$0xff]  ;;  %v546_v3 = vld [vmem:[%s2336_s29 + $0x430] sm:$0xff] }
  0x36   : > { %v548_v4 = vld [vmem:[%s2336_s29 + $0x440] sm:$0xff]  ;;  %545 = vst [vmem:[%s2344_s30 + $0x210] sm:$0xff] %v544_v2  ;;  %547 = vst [vmem:[%s2344_s30 + $0x218] sm:$0xff] %v546_v3  ;;  %v550_v5 = vld [vmem:[%s2336_s29 + $0x450] sm:$0xff] }
  0x37   : > { %549 = vst [vmem:[%s2344_s30 + $0x220] sm:$0xff] %v548_v4  ;;  %v552_v6 = vld [vmem:[%s2336_s29 + $0x460] sm:$0xff]  ;;  %v554_v7 = vld [vmem:[%s2336_s29 + $0x470] sm:$0xff]  ;;  %551 = vst [vmem:[%s2344_s30 + $0x228] sm:$0xff] %v550_v5 }
  0x38   : > { %553 = vst [vmem:[%s2344_s30 + $0x230] sm:$0xff] %v552_v6  ;;  %555 = vst [vmem:[%s2344_s30 + $0x238] sm:$0xff] %v554_v7  ;;  %v556_v8 = vld [vmem:[%s2336_s29 + $0x480] sm:$0xff]  ;;  %v558_v9 = vld [vmem:[%s2336_s29 + $0x490] sm:$0xff] }
  0x39   : > { %v560_v10 = vld [vmem:[%s2336_s29 + $0x4a0] sm:$0xff]  ;;  %557 = vst [vmem:[%s2344_s30 + $0x240] sm:$0xff] %v556_v8  ;;  %559 = vst [vmem:[%s2344_s30 + $0x248] sm:$0xff] %v558_v9  ;;  %v562_v11 = vld [vmem:[%s2336_s29 + $0x4b0] sm:$0xff] }
  0x3a   : > { %561 = vst [vmem:[%s2344_s30 + $0x250] sm:$0xff] %v560_v10  ;;  %v564_v12 = vld [vmem:[%s2336_s29 + $0x4c0] sm:$0xff]  ;;  %v566_v13 = vld [vmem:[%s2336_s29 + $0x4d0] sm:$0xff]  ;;  %563 = vst [vmem:[%s2344_s30 + $0x258] sm:$0xff] %v562_v11 }
  0x3b   : > { %565 = vst [vmem:[%s2344_s30 + $0x260] sm:$0xff] %v564_v12  ;;  %567 = vst [vmem:[%s2344_s30 + $0x268] sm:$0xff] %v566_v13  ;;  %v568_v14 = vld [vmem:[%s2336_s29 + $0x4e0] sm:$0xff]  ;;  %v570_v15 = vld [vmem:[%s2336_s29 + $0x4f0] sm:$0xff] }
  0x3c   : > { %v572_v16 = vld [vmem:[%s2336_s29 + $0x500] sm:$0xff]  ;;  %569 = vst [vmem:[%s2344_s30 + $0x270] sm:$0xff] %v568_v14  ;;  %571 = vst [vmem:[%s2344_s30 + $0x278] sm:$0xff] %v570_v15  ;;  %v574_v17 = vld [vmem:[%s2336_s29 + $0x510] sm:$0xff] }
  0x3d   : > { %573 = vst [vmem:[%s2344_s30 + $0x280] sm:$0xff] %v572_v16  ;;  %v576_v18 = vld [vmem:[%s2336_s29 + $0x520] sm:$0xff]  ;;  %v578_v19 = vld [vmem:[%s2336_s29 + $0x530] sm:$0xff]  ;;  %575 = vst [vmem:[%s2344_s30 + $0x288] sm:$0xff] %v574_v17 }
  0x3e   : > { %577 = vst [vmem:[%s2344_s30 + $0x290] sm:$0xff] %v576_v18  ;;  %579 = vst [vmem:[%s2344_s30 + $0x298] sm:$0xff] %v578_v19  ;;  %v580_v20 = vld [vmem:[%s2336_s29 + $0x540] sm:$0xff]  ;;  %v582_v21 = vld [vmem:[%s2336_s29 + $0x550] sm:$0xff] }
  0x3f   : > { %v584_v22 = vld [vmem:[%s2336_s29 + $0x560] sm:$0xff]  ;;  %581 = vst [vmem:[%s2344_s30 + $0x2a0] sm:$0xff] %v580_v20  ;;  %583 = vst [vmem:[%s2344_s30 + $0x2a8] sm:$0xff] %v582_v21  ;;  %v586_v23 = vld [vmem:[%s2336_s29 + $0x570] sm:$0xff] }
  0x40   : > { %585 = vst [vmem:[%s2344_s30 + $0x2b0] sm:$0xff] %v584_v22  ;;  %v588_v24 = vld [vmem:[%s2336_s29 + $0x580] sm:$0xff]  ;;  %v590_v25 = vld [vmem:[%s2336_s29 + $0x590] sm:$0xff]  ;;  %587 = vst [vmem:[%s2344_s30 + $0x2b8] sm:$0xff] %v586_v23 }
  0x41   : > { %589 = vst [vmem:[%s2344_s30 + $0x2c0] sm:$0xff] %v588_v24  ;;  %591 = vst [vmem:[%s2344_s30 + $0x2c8] sm:$0xff] %v590_v25  ;;  %v592_v26 = vld [vmem:[%s2336_s29 + $0x5a0] sm:$0xff]  ;;  %v594_v27 = vld [vmem:[%s2336_s29 + $0x5b0] sm:$0xff] }
  0x42   : > { %v596_v28 = vld [vmem:[%s2336_s29 + $0x5c0] sm:$0xff]  ;;  %593 = vst [vmem:[%s2344_s30 + $0x2d0] sm:$0xff] %v592_v26  ;;  %595 = vst [vmem:[%s2344_s30 + $0x2d8] sm:$0xff] %v594_v27  ;;  %v598_v29 = vld [vmem:[%s2336_s29 + $0x5d0] sm:$0xff] }
  0x43   : > { %597 = vst [vmem:[%s2344_s30 + $0x2e0] sm:$0xff] %v596_v28  ;;  %v600_v30 = vld [vmem:[%s2336_s29 + $0x5e0] sm:$0xff]  ;;  %v602_v31 = vld [vmem:[%s2336_s29 + $0x5f0] sm:$0xff]  ;;  %599 = vst [vmem:[%s2344_s30 + $0x2e8] sm:$0xff] %v598_v29 }
  0x44   : > { %601 = vst [vmem:[%s2344_s30 + $0x2f0] sm:$0xff] %v600_v30  ;;  %603 = vst [vmem:[%s2344_s30 + $0x2f8] sm:$0xff] %v602_v31  ;;  %v604_v32 = vld [vmem:[%s2336_s29 + $0x600] sm:$0xff]  ;;  %v606_v33 = vld [vmem:[%s2336_s29 + $0x610] sm:$0xff] }
  0x45   : > { %v608_v34 = vld [vmem:[%s2336_s29 + $0x620] sm:$0xff]  ;;  %605 = vst [vmem:[%s2344_s30 + $0x300] sm:$0xff] %v604_v32  ;;  %607 = vst [vmem:[%s2344_s30 + $0x308] sm:$0xff] %v606_v33  ;;  %v610_v35 = vld [vmem:[%s2336_s29 + $0x630] sm:$0xff] }
  0x46   : > { %609 = vst [vmem:[%s2344_s30 + $0x310] sm:$0xff] %v608_v34  ;;  %v612_v36 = vld [vmem:[%s2336_s29 + $0x640] sm:$0xff]  ;;  %v614_v37 = vld [vmem:[%s2336_s29 + $0x650] sm:$0xff]  ;;  %611 = vst [vmem:[%s2344_s30 + $0x318] sm:$0xff] %v610_v35 }
  0x47   : > { %613 = vst [vmem:[%s2344_s30 + $0x320] sm:$0xff] %v612_v36  ;;  %615 = vst [vmem:[%s2344_s30 + $0x328] sm:$0xff] %v614_v37  ;;  %v616_v38 = vld [vmem:[%s2336_s29 + $0x660] sm:$0xff]  ;;  %v618_v39 = vld [vmem:[%s2336_s29 + $0x670] sm:$0xff] }
  0x48   : > { %v620_v40 = vld [vmem:[%s2336_s29 + $0x680] sm:$0xff]  ;;  %617 = vst [vmem:[%s2344_s30 + $0x330] sm:$0xff] %v616_v38  ;;  %619 = vst [vmem:[%s2344_s30 + $0x338] sm:$0xff] %v618_v39  ;;  %v622_v41 = vld [vmem:[%s2336_s29 + $0x690] sm:$0xff] }
  0x49   : > { %621 = vst [vmem:[%s2344_s30 + $0x340] sm:$0xff] %v620_v40  ;;  %v624_v42 = vld [vmem:[%s2336_s29 + $0x6a0] sm:$0xff]  ;;  %v626_v43 = vld [vmem:[%s2336_s29 + $0x6b0] sm:$0xff]  ;;  %623 = vst [vmem:[%s2344_s30 + $0x348] sm:$0xff] %v622_v41 }
  0x4a   : > { %625 = vst [vmem:[%s2344_s30 + $0x350] sm:$0xff] %v624_v42  ;;  %627 = vst [vmem:[%s2344_s30 + $0x358] sm:$0xff] %v626_v43  ;;  %v628_v44 = vld [vmem:[%s2336_s29 + $0x6c0] sm:$0xff]  ;;  %v630_v45 = vld [vmem:[%s2336_s29 + $0x6d0] sm:$0xff] }
  0x4b   : > { %v632_v46 = vld [vmem:[%s2336_s29 + $0x6e0] sm:$0xff]  ;;  %629 = vst [vmem:[%s2344_s30 + $0x360] sm:$0xff] %v628_v44  ;;  %631 = vst [vmem:[%s2344_s30 + $0x368] sm:$0xff] %v630_v45  ;;  %v634_v47 = vld [vmem:[%s2336_s29 + $0x6f0] sm:$0xff] }
  0x4c   : > { %633 = vst [vmem:[%s2344_s30 + $0x370] sm:$0xff] %v632_v46  ;;  %635 = vst [vmem:[%s2344_s30 + $0x378] sm:$0xff] %v634_v47 }
  0x4d PF: > { %p1862_p7 = scmp.ge.s32.totalorder %s2268_s17, 1  ;;  %p640_p8 = scmp.lt.s32.totalorder %s2268_s17, 3 }
  0x4f   : > { %p641_p9 = pnand %p1862_p7, %p640_p8 }
  0x50   : > { %s647_s5 = sand.u32 (!%p641_p9), 1, %s2260_s15   ;;  %v2156_v48 = vld [vmem:[%s2772_s0 + $0x4] ss:$28 sps:$4 sm:$0xff] (!%p641_p9)   ;;  %v2270_v49 = vmov (!%p641_p9), 0   ;;  %v2162_v50 = vld [vmem:[%s2772_s0 + $0x14] ss:$28 sps:$4 sm:$0xff] (!%p641_p9)  }
  0x51   : > { %644 = sbr.rel (%p641_p9) target bundleno = 456 (0x1c8), region = 70  ;;  %2057 = vset.pattern.permute.xlu1 (!%p641_p9), %v2270_v49  ;;  %2056 = vset.pattern.permute.xlu0 (!%p641_p9), %v2270_v49 }
  0x52   : > { %s2030_s6 = smul.u32 (!%p641_p9), 896, %s647_s5  ;;  %1466 = vmatprep.mubr.bf16.mxu1 (!%p641_p9), %v2156_v48  ;;  %1572 = vmatprep.mubr.bf16.mxu0 (!%p641_p9), %v2162_v50 }
  0x54   : > { %s2577_s11 = scalar_lea.vmem (!%p641_p9), [#allocation2], %s2030_s6 }
  0x55   : > { %v2058_v51 = vld [vmem:[%s2577_s11 + $0x4] ss:$8 sps:$4 sm:$0xff] (!%p641_p9)   ;;  %v2062_v53 = vld [vmem:[%s2577_s11] ss:$8 sps:$4 sm:$0xff] (!%p641_p9)   ;;  %v2064_v55 = vld [vmem:[%s2577_s11 + $0x14] ss:$8 sps:$4 sm:$0xff] (!%p641_p9)  }
  0x56   : > { %v2060_v52 = vld [vmem:[%s2577_s11 + $0x204] ss:$8 sps:$4 sm:$0xff] (!%p641_p9)   ;;  %1434 = vmatprep.subr.bf16.mxu1 (!%p641_p9), %v2058_v51  ;;  %v2063_v54 = vld [vmem:[%s2577_s11 + $0x200] ss:$8 sps:$4 sm:$0xff] (!%p641_p9)   ;;  %v2066_v56 = vld [vmem:[%s2577_s11 + $0x214] ss:$8 sps:$4 sm:$0xff] (!%p641_p9)  }
  0x57   : > { %1540 = vmatprep.subr.bf16.mxu0 (!%p641_p9), %v2060_v52  ;;  %1435 = vmatpush1.bf16.msra.mxu1 (!%p641_p9), %v2062_v53  ;;  %v2068_v57 = vld [vmem:[%s2577_s11 + $0x10] ss:$8 sps:$4 sm:$0xff] (!%p641_p9)   ;;  %v2070_v59 = vld [vmem:[%s2577_s11 + $0x24] ss:$8 sps:$4 sm:$0xff] (!%p641_p9)   ;;  %v2074_v61 = vld [vmem:[%s2577_s11 + $0x20] ss:$8 sps:$4 sm:$0xff] (!%p641_p9)  }
  0x58   : > { %1541 = vmatpush1.bf16.msra.mxu0 %v2063_v54  ;;  %1436 = vmatprep.subr.bf16.mxu1 %v2064_v55  ;;  %v2069_v58 = vld [vmem:[%s2577_s11 + $0x210] ss:$8 sps:$4 sm:$0xff]   ;;  %v2072_v60 = vld [vmem:[%s2577_s11 + $0x224] ss:$8 sps:$4 sm:$0xff]   ;;  %v2075_v62 = vld [vmem:[%s2577_s11 + $0x220] ss:$8 sps:$4 sm:$0xff]  }
  0x59   : > { %1542 = vmatprep.subr.bf16.mxu0 %v2066_v56  ;;  %v2076_v63 = vld [vmem:[%s2577_s11 + $0x34] ss:$8 sps:$4 sm:$0xff]   ;;  %v2080_v1 = vld [vmem:[%s2577_s11 + $0x30] ss:$8 sps:$4 sm:$0xff]   ;;  %v2082_v3 = vld [vmem:[%s2577_s11 + $0x44] ss:$8 sps:$4 sm:$0xff]  }
  0x5a   : > { %v2078_v0 = vld [vmem:[%s2577_s11 + $0x234] ss:$8 sps:$4 sm:$0xff]   ;;  %v2081_v2 = vld [vmem:[%s2577_s11 + $0x230] ss:$8 sps:$4 sm:$0xff]   ;;  %v2084_v4 = vld [vmem:[%s2577_s11 + $0x244] ss:$8 sps:$4 sm:$0xff]  }
  0x5b   : > { %1437 = vmatpush1.bf16.msra.mxu1 %v2068_v57  ;;  %v2086_v5 = vld [vmem:[%s2577_s11 + $0x40] ss:$8 sps:$4 sm:$0xff]   ;;  %v2088_v7 = vld [vmem:[%s2577_s11 + $0x54] ss:$8 sps:$4 sm:$0xff]   ;;  %v2092_v9 = vld [vmem:[%s2577_s11 + $0x50] ss:$8 sps:$4 sm:$0xff]  }
  0x5c   : > { %1543 = vmatpush1.bf16.msra.mxu0 %v2069_v58  ;;  %1438 = vmatprep.subr.bf16.mxu1 %v2070_v59  ;;  %v2087_v6 = vld [vmem:[%s2577_s11 + $0x240] ss:$8 sps:$4 sm:$0xff]   ;;  %v2090_v8 = vld [vmem:[%s2577_s11 + $0x254] ss:$8 sps:$4 sm:$0xff]   ;;  %v2093_v10 = vld [vmem:[%s2577_s11 + $0x250] ss:$8 sps:$4 sm:$0xff]  }
  0x5d   : > { %1544 = vmatprep.subr.bf16.mxu0 %v2072_v60  ;;  %v2094_v11 = vld [vmem:[%s2577_s11 + $0x64] ss:$8 sps:$4 sm:$0xff]   ;;  %v2098_v13 = vld [vmem:[%s2577_s11 + $0x60] ss:$8 sps:$4 sm:$0xff]   ;;  %v2100_v15 = vld [vmem:[%s2577_s11 + $0x74] ss:$8 sps:$4 sm:$0xff]  }
  0x5e   : > { %v2096_v12 = vld [vmem:[%s2577_s11 + $0x264] ss:$8 sps:$4 sm:$0xff]   ;;  %v2099_v14 = vld [vmem:[%s2577_s11 + $0x260] ss:$8 sps:$4 sm:$0xff]   ;;  %v2102_v16 = vld [vmem:[%s2577_s11 + $0x274] ss:$8 sps:$4 sm:$0xff]  }
  0x5f   : > { %1439 = vmatpush1.bf16.msra.mxu1 %v2074_v61  ;;  %v2104_v17 = vld [vmem:[%s2577_s11 + $0x70] ss:$8 sps:$4 sm:$0xff]   ;;  %v2106_v19 = vld [vmem:[%s2577_s11 + $0x84] ss:$8 sps:$4 sm:$0xff]   ;;  %v2110_v21 = vld [vmem:[%s2577_s11 + $0x80] ss:$8 sps:$4 sm:$0xff]  }
  0x60   : > { %1545 = vmatpush1.bf16.msra.mxu0 %v2075_v62  ;;  %1440 = vmatprep.subr.bf16.mxu1 %v2076_v63  ;;  %v2105_v18 = vld [vmem:[%s2577_s11 + $0x270] ss:$8 sps:$4 sm:$0xff]   ;;  %v2108_v20 = vld [vmem:[%s2577_s11 + $0x284] ss:$8 sps:$4 sm:$0xff]   ;;  %v2111_v22 = vld [vmem:[%s2577_s11 + $0x280] ss:$8 sps:$4 sm:$0xff]  }
  0x61   : > { %1546 = vmatprep.subr.bf16.mxu0 %v2078_v0  ;;  %v2112_v23 = vld [vmem:[%s2577_s11 + $0x94] ss:$8 sps:$4 sm:$0xff]   ;;  %v2116_v25 = vld [vmem:[%s2577_s11 + $0x90] ss:$8 sps:$4 sm:$0xff]   ;;  %v2118_v27 = vld [vmem:[%s2577_s11 + $0xa4] ss:$8 sps:$4 sm:$0xff]  }
  0x62   : > { %v2114_v24 = vld [vmem:[%s2577_s11 + $0x294] ss:$8 sps:$4 sm:$0xff]   ;;  %v2117_v26 = vld [vmem:[%s2577_s11 + $0x290] ss:$8 sps:$4 sm:$0xff]   ;;  %v2120_v28 = vld [vmem:[%s2577_s11 + $0x2a4] ss:$8 sps:$4 sm:$0xff]  }
  0x63   : > { %1441 = vmatpush1.bf16.msra.mxu1 %v2080_v1  ;;  %v2122_v29 = vld [vmem:[%s2577_s11 + $0xa0] ss:$8 sps:$4 sm:$0xff]   ;;  %v2124_v31 = vld [vmem:[%s2577_s11 + $0xb4] ss:$8 sps:$4 sm:$0xff]   ;;  %v2128_v33 = vld [vmem:[%s2577_s11 + $0xb0] ss:$8 sps:$4 sm:$0xff]  }
  0x64   : > { %1547 = vmatpush1.bf16.msra.mxu0 %v2081_v2  ;;  %1442 = vmatprep.subr.bf16.mxu1 %v2082_v3  ;;  %v2123_v30 = vld [vmem:[%s2577_s11 + $0x2a0] ss:$8 sps:$4 sm:$0xff]   ;;  %v2126_v32 = vld [vmem:[%s2577_s11 + $0x2b4] ss:$8 sps:$4 sm:$0xff]   ;;  %v2129_v34 = vld [vmem:[%s2577_s11 + $0x2b0] ss:$8 sps:$4 sm:$0xff]  }
  0x65   : > { %1548 = vmatprep.subr.bf16.mxu0 %v2084_v4  ;;  %v2130_v35 = vld [vmem:[%s2577_s11 + $0xc4] ss:$8 sps:$4 sm:$0xff]   ;;  %v2134_v37 = vld [vmem:[%s2577_s11 + $0xc0] ss:$8 sps:$4 sm:$0xff]   ;;  %v2136_v39 = vld [vmem:[%s2577_s11 + $0xd4] ss:$8 sps:$4 sm:$0xff]  }
  0x66   : > { %v2132_v36 = vld [vmem:[%s2577_s11 + $0x2c4] ss:$8 sps:$4 sm:$0xff]   ;;  %v2135_v38 = vld [vmem:[%s2577_s11 + $0x2c0] ss:$8 sps:$4 sm:$0xff]   ;;  %v2138_v40 = vld [vmem:[%s2577_s11 + $0x2d4] ss:$8 sps:$4 sm:$0xff]  }
  0x67   : > { %1443 = vmatpush1.bf16.msra.mxu1 %v2086_v5  ;;  %v2140_v41 = vld [vmem:[%s2577_s11 + $0xd0] ss:$8 sps:$4 sm:$0xff]   ;;  %v2142_v43 = vld [vmem:[%s2577_s11 + $0xe4] ss:$8 sps:$4 sm:$0xff]   ;;  %v2146_v45 = vld [vmem:[%s2577_s11 + $0xe0] ss:$8 sps:$4 sm:$0xff]  }
  0x68   : > { %1549 = vmatpush1.bf16.msra.mxu0 %v2087_v6  ;;  %1444 = vmatprep.subr.bf16.mxu1 %v2088_v7  ;;  %v2141_v42 = vld [vmem:[%s2577_s11 + $0x2d0] ss:$8 sps:$4 sm:$0xff]   ;;  %v2144_v44 = vld [vmem:[%s2577_s11 + $0x2e4] ss:$8 sps:$4 sm:$0xff]   ;;  %v2147_v46 = vld [vmem:[%s2577_s11 + $0x2e0] ss:$8 sps:$4 sm:$0xff]  }
  0x69   : > { %1550 = vmatprep.subr.bf16.mxu0 %v2090_v8  ;;  %v2148_v47 = vld [vmem:[%s2577_s11 + $0xf4] ss:$8 sps:$4 sm:$0xff]   ;;  %v2152_v50 = vld [vmem:[%s2577_s11 + $0xf0] ss:$8 sps:$4 sm:$0xff]   ;;  %v2159_v52 = vld [vmem:[%s2577_s11 + $0x104] ss:$8 sps:$4 sm:$0xff]  }
  0x6a   : > { %v2150_v48 = vld [vmem:[%s2577_s11 + $0x2f4] ss:$8 sps:$4 sm:$0xff]   ;;  %v2153_v51 = vld [vmem:[%s2577_s11 + $0x2f0] ss:$8 sps:$4 sm:$0xff]   ;;  %v2165_v53 = vld [vmem:[%s2577_s11 + $0x304] ss:$8 sps:$4 sm:$0xff]  }
  0x6b   : > { %1445 = vmatpush1.bf16.msra.mxu1 %v2092_v9  ;;  %v2154_v54 = vld [vmem:[%s2772_s0] ss:$28 sps:$4 sm:$0xff]   ;;  %v2160_v55 = vld [vmem:[%s2772_s0 + $0x10] ss:$28 sps:$4 sm:$0xff]   ;;  %s2004_s15 = sshll.u32 (%p2326_p5), %s1856_s18, 3 }
  0x6c   : > { %1551 = vmatpush1.bf16.msra.mxu0 %v2093_v10  ;;  %1446 = vmatprep.subr.bf16.mxu1 %v2094_v11  ;;  %v2157_v56 = vld [vmem:[%s2577_s11 + $0x100] ss:$8 sps:$4 sm:$0xff]   ;;  %v2168_v58 = vld [vmem:[%s2577_s11 + $0x114] ss:$8 sps:$4 sm:$0xff]   ;;  %v2166_v61 = vld [vmem:[%s2577_s11 + $0x110] ss:$8 sps:$4 sm:$0xff]   ;;  %s1755_s27 = scalar_lea.vmem (%p2326_p5), %s2776_s4, %s2004_s15 }
  0x6d   : > { %1552 = vmatprep.subr.bf16.mxu0 %v2096_v12  ;;  %v2163_v57 = vld [vmem:[%s2577_s11 + $0x300] ss:$8 sps:$4 sm:$0xff]   ;;  %v2171_v59 = vld [vmem:[%s2577_s11 + $0x314] ss:$8 sps:$4 sm:$0xff]   ;;  %v2169_v62 = vld [vmem:[%s2577_s11 + $0x310] ss:$8 sps:$4 sm:$0xff]  }
  0x6e   : > { %v2196_v60 = vld [vmem:[%s2772_s0 + $0x4c] ss:$28 sps:$4 sm:$0x3f]   ;;  %v2180_v4 = vld [vmem:[%s2577_s11 + $0x134] ss:$8 sps:$4 sm:$0xff]  }
  0x6f   : > { %1447 = vmatpush1.bf16.msra.mxu1 %v2098_v13  ;;  %v2174_v63 = vld [vmem:[%s2577_s11 + $0x124] ss:$8 sps:$4 sm:$0xff]   ;;  %v2172_v1 = vld [vmem:[%s2577_s11 + $0x120] ss:$8 sps:$4 sm:$0xff]   ;;  %v2183_v5 = vld [vmem:[%s2577_s11 + $0x334] ss:$8 sps:$4 sm:$0xff]  }
  0x70   : > { %1553 = vmatpush1.bf16.msra.mxu0 %v2099_v14  ;;  %1448 = vmatprep.subr.bf16.mxu1 %v2100_v15  ;;  %v2177_v0 = vld [vmem:[%s2577_s11 + $0x324] ss:$8 sps:$4 sm:$0xff]   ;;  %v2175_v2 = vld [vmem:[%s2577_s11 + $0x320] ss:$8 sps:$4 sm:$0xff]   ;;  %v2178_v6 = vld [vmem:[%s2577_s11 + $0x130] ss:$8 sps:$4 sm:$0xff]  }
  0x71   : > { %1554 = vmatprep.subr.bf16.mxu0 %v2102_v16  ;;  %v2201_v3 = vld [vmem:[%s2772_s0 + $0x48] ss:$28 sps:$4 sm:$0x3f]   ;;  %v2181_v7 = vld [vmem:[%s2577_s11 + $0x330] ss:$8 sps:$4 sm:$0xff]  }
  0x72   : > { %v2231_v8 = vld [vmem:[%s2772_s0 + $0x3c] ss:$28 sps:$4 sm:$0x3f]   ;;  %v2186_v10 = vld [vmem:[%s2577_s11 + $0x144] ss:$8 sps:$4 sm:$0xff]  }
  0x73   : > { %1449 = vmatpush1.bf16.msra.mxu1 %v2104_v17  ;;  %v2233_v9 = vld [vmem:[%s2772_s0 + $0x38] ss:$28 sps:$4 sm:$0x3f]   ;;  %v2189_v11 = vld [vmem:[%s2577_s11 + $0x344] ss:$8 sps:$4 sm:$0xff]  }
  0x74   : > { %1555 = vmatpush1.bf16.msra.mxu0 %v2105_v18  ;;  %1450 = vmatprep.subr.bf16.mxu1 %v2106_v19  ;;  %v2184_v12 = vld [vmem:[%s2577_s11 + $0x140] ss:$8 sps:$4 sm:$0xff]   ;;  %v2192_v15 = vld [vmem:[%s2577_s11 + $0x154] ss:$8 sps:$4 sm:$0xff]   ;;  %v1649_v19 = vld [vmem:[%s2774_s2 + $0x18] sm:$0xf] }
  0x75   : > { %1556 = vmatprep.subr.bf16.mxu0 %v2108_v20  ;;  %v2187_v13 = vld [vmem:[%s2577_s11 + $0x340] ss:$8 sps:$4 sm:$0xff]   ;;  %v2195_v16 = vld [vmem:[%s2577_s11 + $0x354] ss:$8 sps:$4 sm:$0xff]   ;;  %v2190_v20 = vld [vmem:[%s2577_s11 + $0x150] ss:$8 sps:$4 sm:$0xff]  }
  0x76   : > { %v2242_v14 = vld [vmem:[%s2772_s0 + $0xc] ss:$28 sps:$4 sm:$0xff]   ;;  %v1648_v17 = vld [vmem:[%s2774_s2 + $0x10] sm:$0xff]  ;;  %v1646_v18 = vld [vmem:[%s2774_s2] sm:$0xff] }
  0x77   : > { %1451 = vmatpush1.bf16.msra.mxu1 %v2110_v21  ;;  %1662 = vperm.xlu1 %2057, %v1648_v17   ;;  %v2193_v21 = vld [vmem:[%s2577_s11 + $0x350] ss:$8 sps:$4 sm:$0xff]  }
  0x78   : > { %1557 = vmatpush1.bf16.msra.mxu0 %v2111_v22  ;;  %1452 = vmatprep.subr.bf16.mxu1 %v2112_v23  ;;  %v1647_v22 = vld [vmem:[%s2774_s2 + $0x8] sm:$0xff] }
  0x79   : > { %1558 = vmatprep.subr.bf16.mxu0 %v2114_v24  ;;  %1652 = vperm.xlu0 %2056, %v1646_v18   ;;  %v2200_v23 = vld [vmem:[%s2577_s11 + $0x164] ss:$8 sps:$4 sm:$0xff]  }
  0x7a   : > { %v2204_v24 = vld [vmem:[%s2577_s11 + $0x364] ss:$8 sps:$4 sm:$0xff]  }
  0x7b   : > { %1453 = vmatpush1.bf16.msra.mxu1 %v2116_v25  ;;  %1667 = vperm.xlu1 %2057, %v1649_v19   ;;  %v1679_v25 = vld [vmem:[%s2775_s3 + $0x8] sm:$0xff] }
  0x7c   : > { %1559 = vmatpush1.bf16.msra.mxu0 %v2117_v26  ;;  %1454 = vmatprep.subr.bf16.mxu1 %v2118_v27  ;;  %v2198_v26 = vld [vmem:[%s2577_s11 + $0x160] ss:$8 sps:$4 sm:$0xff]  }
  0x7d   : > { %1560 = vmatprep.subr.bf16.mxu0 %v2120_v28  ;;  %1657 = vperm.xlu0 %2056, %v1647_v22   ;;  %v2202_v27 = vld [vmem:[%s2577_s11 + $0x360] ss:$8 sps:$4 sm:$0xff]  }
  0x7e   : > { %v1678_v28 = vld [vmem:[%s2775_s3] sm:$0xff] }
  0x7f   : > { %1455 = vmatpush1.bf16.msra.mxu1 %v2122_v29  ;;  %v2207_v29 = vld [vmem:[%s2577_s11 + $0x174] ss:$8 sps:$4 sm:$0xff]   ;;  %1689 = vperm.xlu1 %2057, %v1679_v25  }
  0x80   : > { %1561 = vmatpush1.bf16.msra.mxu0 %v2123_v30  ;;  %1456 = vmatprep.subr.bf16.mxu1 %v2124_v31  ;;  %v2210_v30 = vld [vmem:[%s2577_s11 + $0x374] ss:$8 sps:$4 sm:$0xff]   ;;  %v1681_v31 = vld [vmem:[%s2775_s3 + $0x18] sm:$0xf] }
  0x81   : > { %1562 = vmatprep.subr.bf16.mxu0 %v2126_v32  ;;  %1684 = vperm.xlu0 %2056, %v1678_v28   ;;  %v2205_v32 = vld [vmem:[%s2577_s11 + $0x170] ss:$8 sps:$4 sm:$0xff]  }
  0x83   : > { %1457 = vmatpush1.bf16.msra.mxu1 %v2128_v33  ;;  %v2208_v33 = vld [vmem:[%s2577_s11 + $0x370] ss:$8 sps:$4 sm:$0xff]   ;;  %1699 = vperm.xlu1 %2057, %v1681_v31  }
  0x84   : > { %1563 = vmatpush1.bf16.msra.mxu0 %v2129_v34  ;;  %1458 = vmatprep.subr.bf16.mxu1 %v2130_v35  ;;  %v1680_v34 = vld [vmem:[%s2775_s3 + $0x10] sm:$0xff]  ;;  %v2213_v35 = vld [vmem:[%s2577_s11 + $0x184] ss:$8 sps:$4 sm:$0xff]  }
  0x85   : > { %1564 = vmatprep.subr.bf16.mxu0 %v2132_v36  ;;  %v2214_v36 = vld [vmem:[%s2772_s0 + $0x18] ss:$28 sps:$4 sm:$0xff]   ;;  %1694 = vperm.xlu0 %2056, %v1680_v34  }
  0x87   : > { %1459 = vmatpush1.bf16.msra.mxu1 %v2134_v37  ;;  %v2211_v37 = vld [vmem:[%s2577_s11 + $0x180] ss:$8 sps:$4 sm:$0xff]  }
  0x88   : > { %1565 = vmatpush1.bf16.msra.mxu0 %v2135_v38  ;;  %1460 = vmatprep.subr.bf16.mxu1 %v2136_v39  ;;  %v2217_v38 = vld [vmem:[%s2577_s11 + $0x194] ss:$8 sps:$4 sm:$0xff]   ;;  %v2215_v39 = vld [vmem:[%s2577_s11 + $0x190] ss:$8 sps:$4 sm:$0xff]  }
  0x89   : > { %1566 = vmatprep.subr.bf16.mxu0 %v2138_v40  ;;  %v2220_v40 = vld [vmem:[%s2577_s11 + $0x1a4] ss:$8 sps:$4 sm:$0xff]  }
  0x8b   : > { %1461 = vmatpush1.bf16.msra.mxu1 %v2140_v41  ;;  %v2230_v41 = vld [vmem:[%s2772_s0 + $0x50] ss:$28 sps:$4 sm:$0x3f]  }
  0x8c   : > { %1567 = vmatpush1.bf16.msra.mxu0 %v2141_v42  ;;  %1462 = vmatprep.subr.bf16.mxu1 %v2142_v43  ;;  %v2218_v42 = vld [vmem:[%s2577_s11 + $0x1a0] ss:$8 sps:$4 sm:$0xff]   ;;  %v2223_v43 = vld [vmem:[%s2577_s11 + $0x1b4] ss:$8 sps:$4 sm:$0xff]  }
  0x8d   : > { %1568 = vmatprep.subr.bf16.mxu0 %v2144_v44  ;;  %v2221_v44 = vld [vmem:[%s2577_s11 + $0x1b0] ss:$8 sps:$4 sm:$0xff]  }
  0x8f   : > { %1463 = vmatpush1.bf16.msra.mxu1 %v2146_v45  ;;  %v2224_v45 = vld [vmem:[%s2577_s11 + $0x1c0] ss:$8 sps:$4 sm:$0xff]  }
  0x90   : > { %1569 = vmatpush1.bf16.msra.mxu0 %v2147_v46  ;;  %1464 = vmatprep.subr.bf16.mxu1 %v2148_v47  ;;  %v2229_v46 = vld [vmem:[%s2577_s11 + $0x1d4] ss:$8 sps:$4 sm:$0xff]   ;;  %v2227_v47 = vld [vmem:[%s2577_s11 + $0x1d0] ss:$8 sps:$4 sm:$0xff]  }
  0x91   : > { %1570 = vmatprep.subr.bf16.mxu0 %v2150_v48  ;;  %v2236_v48 = vld [vmem:[%s2577_s11 + $0x1e4] ss:$8 sps:$4 sm:$0xff]  }
  0x93   : > { %1465 = vmatpush1.bf16.msra.mxu1 %v2152_v50  ;;  %v2234_v50 = vld [vmem:[%s2577_s11 + $0x1e0] ss:$8 sps:$4 sm:$0xff]  }
  0x94   : > { %1571 = vmatpush1.bf16.msra.mxu0 %v2153_v51  ;;  %1487 = vmatprep.subr.bf16.mxu1 %v2159_v52  ;;  %v2239_v51 = vld [vmem:[%s2577_s11 + $0x1f4] ss:$8 sps:$4 sm:$0xff]   ;;  %v2237_v52 = vld [vmem:[%s2577_s11 + $0x1f0] ss:$8 sps:$4 sm:$0xff]  }
  0x95   : > { %1593 = vmatprep.subr.bf16.mxu0 %v2165_v53  ;;  %v2240_v53 = vld [vmem:[%s2772_s0 + $0x8] ss:$28 sps:$4 sm:$0xff]  }
  0x96   : > { %1467 = vmatmul.mubr.bf16.vlgmr.msra.gmra.mrb[0].mxu1 %v2154_v54  ;;  %v2243_v54 = vld [vmem:[%s2772_s0 + $0x44] ss:$28 sps:$4 sm:$0x3f]  }
  0x97   : > { %1573 = vmatmul.mubr.bf16.vlgmr.msra.gmra.mrb[0].mxu0 %v2160_v55  ;;  %1488 = vmatpush1.bf16.msra.mxu1 %v2157_v56  ;;  %v2245_v55 = vld [vmem:[%s2772_s0 + $0x40] ss:$28 sps:$4 sm:$0x3f]  }
  0x98   : > { %1594 = vmatpush1.bf16.msra.mxu0 %v2163_v57  ;;  %1489 = vmatprep.subr.bf16.mxu1 %v2168_v58 }
  0x99   : > { %1595 = vmatprep.subr.bf16.mxu0 %v2171_v59  ;;  %1582 = vmatprep.mubr.bf16.mxu0 %v2196_v60 }
  0x9a   : > { %1476 = vmatprep.mubr.bf16.mxu1 %v2231_v8 }
  0x9b   : > { %1490 = vmatpush1.bf16.msra.mxu1 %v2166_v61 }
  0x9c   : > { %1596 = vmatpush1.bf16.msra.mxu0 %v2169_v62  ;;  %1491 = vmatprep.subr.bf16.mxu1 %v2174_v63 }
  0x9d   : > { %1597 = vmatprep.subr.bf16.mxu0 %v2177_v0 }
  0x9e   : > { %1477 = vmatmul.mubr.bf16.gmra.mrb[4].mxu1 %v2233_v9 }
  0x9f   : > { %1583 = vmatmul.mubr.bf16.gmra.mrb[4].mxu0 %v2201_v3  ;;  %1492 = vmatpush1.bf16.msra.mxu1 %v2172_v1 }
  0xa0   : > { %1598 = vmatpush1.bf16.msra.mxu0 %v2175_v2  ;;  %1493 = vmatprep.subr.bf16.mxu1 %v2180_v4 }
  0xa1   : > { %1599 = vmatprep.subr.bf16.mxu0 %v2183_v5  ;;  %1625 = vmatprep.mubr.bf16.mxu0 %v2270_v49 }
  0xa2   : > { %1519 = vmatprep.mubr.bf16.mxu1 %v2242_v14 }
  0xa3   : > { %1494 = vmatpush1.bf16.msra.mxu1 %v2178_v6 }
  0xa4   : > { %1600 = vmatpush1.bf16.msra.mxu0 %v2181_v7  ;;  %1495 = vmatprep.subr.bf16.mxu1 %v2186_v10 }
  0xa5   : > { %1601 = vmatprep.subr.bf16.mxu0 %v2189_v11 }
  0xa7   : > { %1496 = vmatpush1.bf16.msra.mxu1 %v2184_v12 }
  0xa8   : > { %1602 = vmatpush1.bf16.msra.mxu0 %v2187_v13  ;;  %1497 = vmatprep.subr.bf16.mxu1 %v2192_v15 }
  0xa9   : > { %1603 = vmatprep.subr.bf16.mxu0 %v2195_v16 }
  0xab   : > { %1498 = vmatpush1.bf16.msra.mxu1 %v2190_v20 }
  0xac   : > { %1604 = vmatpush1.bf16.msra.mxu0 %v2193_v21  ;;  %1499 = vmatprep.subr.bf16.mxu1 %v2200_v23 }
  0xad   : > { %1605 = vmatprep.subr.bf16.mxu0 %v2204_v24 }
  0xaf   : > { %1500 = vmatpush1.bf16.msra.mxu1 %v2198_v26 }
  0xb0   : > { %1606 = vmatpush1.bf16.msra.mxu0 %v2202_v27  ;;  %1501 = vmatprep.subr.bf16.mxu1 %v2207_v29 }
  0xb1   : > { %1607 = vmatprep.subr.bf16.mxu0 %v2210_v30 }
  0xb3   : > { %1502 = vmatpush1.bf16.msra.mxu1 %v2205_v32 }
  0xb4   : > { %1608 = vmatpush1.bf16.msra.mxu0 %v2208_v33  ;;  %1503 = vmatprep.subr.bf16.mxu1 %v2213_v35 }
  0xb7   : > { %1626 = vmatmul.mubr.bf16.vlgmr.msra.gmra.mrb[0].mxu0 %v2214_v36  ;;  %1504 = vmatpush1.bf16.msra.mxu1 %v2211_v37 }
  0xb8   : > { %1635 = vmatprep.mubr.bf16.mxu0 %v2270_v49  ;;  %1505 = vmatprep.subr.bf16.mxu1 %v2217_v38  ;;  %v2226_v49 = vld [vmem:[%s2577_s11 + $0x1c4] ss:$8 sps:$4 sm:$0xff]   ;;  %s1863_s11 = sshll.u32 %s647_s5, 5 }
  0xb9   : > { %s670_s25 = scalar_lea.vmem [#allocation3], %s1863_s11 }
  0xbb   : > { %1506 = vmatpush1.bf16.msra.mxu1 %v2215_v39 }
  0xbc   : > { %1507 = vmatprep.subr.bf16.mxu1 %v2220_v40 }
  0xbf   : > { %1636 = vmatmul.mubr.bf16.gmra.mrb[4].mxu0 %v2230_v41  ;;  %1508 = vmatpush1.bf16.msra.mxu1 %v2218_v42 }
  0xc0   : > { %1509 = vmatprep.subr.bf16.mxu1 %v2223_v43 }
  0xc3   : > { %1510 = vmatpush1.bf16.msra.mxu1 %v2221_v44 }
  0xc4   : > { %1511 = vmatprep.subr.bf16.mxu1 %v2226_v49 }
  0xc7   : > { %1512 = vmatpush1.bf16.msra.mxu1 %v2224_v45 }
  0xc8   : > { %1513 = vmatprep.subr.bf16.mxu1 %v2229_v46 }
  0xcb   : > { %1514 = vmatpush1.bf16.msra.mxu1 %v2227_v47 }
  0xcc   : > { %1515 = vmatprep.subr.bf16.mxu1 %v2236_v48 }
  0xcf   : > { %1516 = vmatpush1.bf16.msra.mxu1 %v2234_v50 }
  0xd0   : > { %1517 = vmatprep.subr.bf16.mxu1 %v2239_v51 }
  0xd3   : > { %1518 = vmatpush1.bf16.msra.mxu1 %v2237_v52 }
  0xd6   : > { %1520 = vmatmul.mubr.bf16.vlgmr.msra.gmra.mrb[0].mxu1 %v2240_v53 }
  0xd7   : > { %1529 = vmatprep.mubr.bf16.mxu1 %v2243_v54 }
  0xde   : > { %1530 = vmatmul.mubr.bf16.gmra.mrb[4].mxu1 %v2245_v55 }
  0xf6   : > { %v1663_v1 = vpop.permute.xlu1 %1662 }
  0xf8   : > { %v1653_v0 = vpop.permute.xlu0 %1652 }
  0xfa   : > { %v1668_v3 = vpop.permute.xlu1 %1667 }
  0xfc   : > { %v1658_v2 = vpop.permute.xlu0 %1657 }
  0xfe   : > { %v1690_v17 = vpop.permute.xlu1 %1689 }
 0x100   : > { %v1685_v12 = vpop.permute.xlu0 %1684 }
 0x102   : > { %v1700_v41 = vpop.permute.xlu1 %1699 }
 0x104   : > { %v1695_v35 = vpop.permute.xlu0 %1694 }
 0x18a   : > { %v1627_v56 = vpop.f32.mrb[0].mxu0 }
 0x18b   : > { %v1629_v57 = vpop.f32.mrb[1].mxu0 }
 0x18c   : > { %v1631_v58 = vpop.f32.mrb[2].mxu0 }
 0x18d   : > { %v1633_v59 = vpop.f32.mrb[3].mxu0 }
 0x192   : > { %v1637_v60 = vpop.f32.mrb[4].mxu0 }
 0x193   : > { %v1639_v61 = vpop.f32.mrb[5].mxu0 }
 0x194   : > { %v1641_v62 = vpop.f32.mrb[6].mxu0 }
 0x195   : > { %v1643_v63 = vpop.f32.mrb[7].mxu0 }
 0x1a9   : > { %v1521_v4 = vpop.f32.mrb[0].mxu1 }
 0x1aa   : > { %v2005_v5 = vadd.f32 %v1627_v56, %v1521_v4  ;;  %v1523_v6 = vpop.f32.mrb[1].mxu1 }
 0x1ab   : > { %v2006_v7 = vadd.f32 %v1629_v57, %v1523_v6  ;;  %v1525_v8 = vpop.f32.mrb[2].mxu1 }
 0x1ac   : > { %v1670_v9 = vmul.f32 %v2005_v5, %v1653_v0  ;;  %v2007_v10 = vadd.f32 %v1631_v58, %v1525_v8  ;;  %v1527_v11 = vpop.f32.mrb[3].mxu1 }
 0x1ad   : > { %v1671_v13 = vmul.f32 %v2006_v7, %v1653_v0  ;;  %v2008_v14 = vadd.f32 %v1633_v59, %v1527_v11 }
 0x1ae   : > { %v1702_v15 = vadd.f32 %v1685_v12, %v1670_v9  ;;  %v1672_v16 = vmul.f32 %v2007_v10, %v1658_v2 }
 0x1af   : > { %v1703_v18 = vadd.f32 %v1685_v12, %v1671_v13  ;;  %v1673_v19 = vmul.f32 %v2008_v14, %v1658_v2 }
 0x1b0   : > { %v1710_v20 = vmax.f32 %v1702_v15, 0.0  ;;  %v1704_v21 = vadd.f32 %v1690_v17, %v1672_v16 }
 0x1b1   : > { %v1711_v22 = vmax.f32 %v1703_v18, 0.0  ;;  %v1705_v23 = vadd.f32 %v1690_v17, %v1673_v19  ;;  %v1531_v24 = vpop.f32.mrb[4].mxu1 }
 0x1b2   : > { %v1712_v25 = vmax.f32 %v1704_v21, 0.0  ;;  %v2009_v26 = vadd.f32 %v1637_v60, %v1531_v24  ;;  %v1533_v27 = vpop.f32.mrb[5].mxu1 }
 0x1b3   : > { %v2000_v28 = vpack.c.bf16 %v1711_v22, %v1710_v20  ;;  %v1713_v29 = vmax.f32 %v1705_v23, 0.0  ;;  %v2010_v30 = vadd.f32 %v1639_v61, %v1533_v27  ;;  %v1535_v31 = vpop.f32.mrb[6].mxu1 }
 0x1b4   : > { %v1674_v32 = vmul.f32 %v2009_v26, %v1663_v1  ;;  %v2011_v33 = vadd.f32 %v1641_v62, %v1535_v31  ;;  %v1537_v34 = vpop.f32.mrb[7].mxu1 }
 0x1b5   : > { %1742 = vst [vmem:[%s670_s25] sm:$0xff] %v2000_v28  ;;  %v2001_v36 = vpack.c.bf16 %v1713_v29, %v1712_v25  ;;  %v1675_v37 = vmul.f32 %v2010_v30, %v1663_v1  ;;  %v2012_v38 = vadd.f32 %v1643_v63, %v1537_v34 }
 0x1b6   : > { %v1706_v39 = vadd.f32 %v1695_v35, %v1674_v32  ;;  %v1676_v40 = vmul.f32 %v2011_v33, %v1668_v3 }
 0x1b7   : > { %1743 = vst [vmem:[%s670_s25 + $0x8] sm:$0xff] %v2001_v36  ;;  %v1707_v42 = vadd.f32 %v1695_v35, %v1675_v37  ;;  %v1677_v43 = vmul.f32 %v2012_v38, %v1668_v3 }
 0x1b8   : > { %v1714_v44 = vmax.f32 %v1706_v39, 0.0  ;;  %v1708_v49 = vadd.f32 %v1700_v41, %v1676_v40 }
 0x1b9   : > { %v1715_v45 = vmax.f32 %v1707_v42, 0.0  ;;  %v1709_v46 = vadd.f32 %v1700_v41, %v1677_v43  ;;  %1752 = sbr.rel (!%p2326_p5) target bundleno = 456 (0x1c8), region = 78 }
 0x1ba   : > { %v1716_v47 = vmax.f32 %v1708_v49, 0.0 }
 0x1bb   : > { %v2002_v48 = vpack.c.bf16 %v1715_v45, %v1714_v44  ;;  %v1717_v50 = vmax.f32 %v1709_v46, 0.0 }
 0x1bc   : > { %v1789_v52 = vld [vmem:[%s670_s25] sm:$0xff] (%p2326_p5) }
 0x1bd   : > { %1744 = vst [vmem:[%s670_s25 + $0x10] sm:$0xff] %v2002_v48  ;;  %v2003_v51 = vpack.c.bf16 %v1717_v50, %v1716_v47  ;;  %1790 = vst [vmem:[%s1755_s27] sm:$0xff] (%p2326_p5), %v1789_v52 }
 0x1be   : > { %v1791_v53 = vld [vmem:[%s670_s25 + $0x8] sm:$0xff] (%p2326_p5) }
 0x1bf   : > { %1745 = vst [vmem:[%s670_s25 + $0x18] sm:$0x33] %v2003_v51  ;;  %1792 = vst [vmem:[%s1755_s27 + $0x10] sm:$0xff] (%p2326_p5), %v1791_v53 }
 0x1c4   : > { %v1793_v54 = vld [vmem:[%s670_s25 + $0x10] sm:$0xff] }
 0x1c5   : > { %1794 = vst [vmem:[%s1755_s27 + $0x20] sm:$0xff] %v1793_v54 }
 0x1c6   : > { %v1795_v55 = vld [vmem:[%s670_s25 + $0x18] sm:$0xff] }
 0x1c7   : > { %1796 = vst [vmem:[%s1755_s27 + $0x30] sm:$0xff] %v1795_v55 }
 0x1c8 PF: > { %p11_p10 = scmp.ge.s32.totalorder %s2313_s19, 4   ;;  %s2778_s15 = smov %s2264_s16 }
 0x1c9   : > { %s2779_s16 = smov %s2324_s22  ;;  %s2780_s17 = smov %s2313_s19 }
 0x1ca   :  { %13 = sbr.rel (!%p11_p10) target bundleno = 2 (0x2), region = 147 }

// kernel: dc_generator_forward.7
= control target key start
LH: loop header
LB: loop body
LE: loop exit
PB: predicated region body
PF: predicated region fallthrough
CT: control target
= control target key end

     0   :  { %s1505_s0 = inlined_call_operand.vmem [shape: bf16[1,448], index: 0, kind: input, shape index: {}]   ;;  %s1506_s1 = inlined_call_operand.vmem [shape: bf16[448,1792], index: 1, kind: input, shape index: {}]   ;;  %s1507_s2 = inlined_call_operand.<no memory space> [shape: f32[1,1], index: 2, kind: input, shape index: {}]   ;;  %s1508_s4 = inlined_call_operand.vmem [shape: f32[1,1792], index: 4, kind: output, shape index: {}]   ;;  %s1509_s3 = inlined_call_operand.<no memory space> [shape: f32[1,1], index: 3, kind: input, shape index: {}]  }
   0x1   :  { %v9_v0 = vstv %s1507_s2  ;;  %v11_v1 = vstv %s1509_s3 }
   0x2   :  { %10 = vst [vmem:[#allocation2] sm:$0x1] %v9_v0  ;;  %12 = vst [vmem:[#allocation3] sm:$0x1] %v11_v1 }
   0x3   :  { %s1259_s19 = smov 0   ;;  %s1261_s20 = smov 0  }
   0x4   :  { %s1263_s21 = smov 0  }
   0x5 LB: > { %s1014_s2 = sadd.s32 4294967295, %s1224_s21   ;;  %s1276_s3 = sadd.s32 1, %s1224_s21   ;;  %s1224_s21 = sphi %s1263_s21, %s1512_s21   ;;  %s1220_s20 = sphi %s1261_s20, %s1511_s20   ;;  %s1216_s19 = sphi %s1259_s19, %s1510_s19  }
   0x6   : > { %s43_s22 = ssub.s32 %s1224_s21, %s1276_s3  ;;  %s46_s23 = sadd.s32 1, %s1220_s20 }
   0x7   : > { %p44_p0 = scmp.eq.s32.totalorder %s43_s22, 0  ;;  %p53_p1 = scmp.ne.s32.totalorder %s1220_s20, %s1216_s19 }
   0x8   : > { %p54_p2 = scmp.eq.s32.totalorder %s1224_s21, 0  ;;  %p1017_p4 = scmp.ge.s32.totalorder %s1224_s21, 7 }
   0x9   : > { %s1285_s24 = scalar_select %p44_p0, %s1220_s20, %s46_s23  }
   0xa   : > { %p55_p3 = por %p54_p2, %p53_p1  ;;  %156 = sbr.rel (%p1017_p4) target bundleno = 50 (0x32), region = 28 }
  0x11   : > { %159 = sbr.rel (!%p55_p3) target bundleno = 50 (0x32), region = 32  ;;  %s161_s25 = sand.u32 (%p55_p3), 1, %s1220_s20  }
  0x12   : > { %s1082_s26 = sshll.u32 (%p55_p3), %s1224_s21, 3  ;;  %s1085_s27 = smul.u32 (%p55_p3), 448, %s161_s25 }
  0x13   : > { %s1293_s30 = scalar_lea.vmem (%p55_p3), %s1506_s1, %s1082_s26 }
  0x14   : > { %v304_v2 = vld [vmem:[%s1293_s30] sm:$0xff] (%p55_p3)  ;;  %v306_v3 = vld [vmem:[%s1293_s30 + $0x38] sm:$0xff] (%p55_p3)  ;;  %v308_v4 = vld [vmem:[%s1293_s30 + $0x70] sm:$0xff] (%p55_p3)  ;;  %s1301_s5 = scalar_lea.vmem (%p55_p3), [#allocation4], %s1085_s27 }
  0x15   : > { %v310_v5 = vld [vmem:[%s1293_s30 + $0xa8] sm:$0xff] (%p55_p3)  ;;  %v312_v6 = vld [vmem:[%s1293_s30 + $0xe0] sm:$0xff] (%p55_p3)  ;;  %v314_v7 = vld [vmem:[%s1293_s30 + $0x118] sm:$0xff] (%p55_p3)  ;;  %305 = vst [vmem:[%s1301_s5] sm:$0xff] (%p55_p3), %v304_v2 }
  0x16   : > { %307 = vst [vmem:[%s1301_s5 + $0x8] sm:$0xff] (%p55_p3), %v306_v3  ;;  %309 = vst [vmem:[%s1301_s5 + $0x10] sm:$0xff] (%p55_p3), %v308_v4  ;;  %v316_v8 = vld [vmem:[%s1293_s30 + $0x150] sm:$0xff] (%p55_p3)  ;;  %v318_v9 = vld [vmem:[%s1293_s30 + $0x188] sm:$0xff] (%p55_p3) }
  0x17   : > { %311 = vst [vmem:[%s1301_s5 + $0x18] sm:$0xff] (%p55_p3), %v310_v5  ;;  %313 = vst [vmem:[%s1301_s5 + $0x20] sm:$0xff] (%p55_p3), %v312_v6  ;;  %v320_v10 = vld [vmem:[%s1293_s30 + $0x1c0] sm:$0xff] (%p55_p3)  ;;  %v322_v11 = vld [vmem:[%s1293_s30 + $0x1f8] sm:$0xff] (%p55_p3) }
  0x18   : > { %315 = vst [vmem:[%s1301_s5 + $0x28] sm:$0xff] %v314_v7  ;;  %317 = vst [vmem:[%s1301_s5 + $0x30] sm:$0xff] %v316_v8  ;;  %v324_v12 = vld [vmem:[%s1293_s30 + $0x230] sm:$0xff]  ;;  %v326_v13 = vld [vmem:[%s1293_s30 + $0x268] sm:$0xff] }
  0x19   : > { %319 = vst [vmem:[%s1301_s5 + $0x38] sm:$0xff] %v318_v9  ;;  %321 = vst [vmem:[%s1301_s5 + $0x40] sm:$0xff] %v320_v10  ;;  %v328_v14 = vld [vmem:[%s1293_s30 + $0x2a0] sm:$0xff]  ;;  %v330_v15 = vld [vmem:[%s1293_s30 + $0x2d8] sm:$0xff] }
  0x1a   : > { %323 = vst [vmem:[%s1301_s5 + $0x48] sm:$0xff] %v322_v11  ;;  %325 = vst [vmem:[%s1301_s5 + $0x50] sm:$0xff] %v324_v12  ;;  %v332_v16 = vld [vmem:[%s1293_s30 + $0x310] sm:$0xff]  ;;  %v334_v17 = vld [vmem:[%s1293_s30 + $0x348] sm:$0xff] }
  0x1b   : > { %327 = vst [vmem:[%s1301_s5 + $0x58] sm:$0xff] %v326_v13  ;;  %329 = vst [vmem:[%s1301_s5 + $0x60] sm:$0xff] %v328_v14  ;;  %v336_v18 = vld [vmem:[%s1293_s30 + $0x380] sm:$0xff]  ;;  %v338_v19 = vld [vmem:[%s1293_s30 + $0x3b8] sm:$0xff] }
  0x1c   : > { %331 = vst [vmem:[%s1301_s5 + $0x68] sm:$0xff] %v330_v15  ;;  %333 = vst [vmem:[%s1301_s5 + $0x70] sm:$0xff] %v332_v16  ;;  %v340_v20 = vld [vmem:[%s1293_s30 + $0x3f0] sm:$0xff]  ;;  %v342_v21 = vld [vmem:[%s1293_s30 + $0x428] sm:$0xff] }
  0x1d   : > { %335 = vst [vmem:[%s1301_s5 + $0x78] sm:$0xff] %v334_v17  ;;  %337 = vst [vmem:[%s1301_s5 + $0x80] sm:$0xff] %v336_v18  ;;  %v344_v22 = vld [vmem:[%s1293_s30 + $0x460] sm:$0xff]  ;;  %v346_v23 = vld [vmem:[%s1293_s30 + $0x498] sm:$0xff] }
  0x1e   : > { %339 = vst [vmem:[%s1301_s5 + $0x88] sm:$0xff] %v338_v19  ;;  %341 = vst [vmem:[%s1301_s5 + $0x90] sm:$0xff] %v340_v20  ;;  %v348_v24 = vld [vmem:[%s1293_s30 + $0x4d0] sm:$0xff]  ;;  %v350_v25 = vld [vmem:[%s1293_s30 + $0x508] sm:$0xff] }
  0x1f   : > { %343 = vst [vmem:[%s1301_s5 + $0x98] sm:$0xff] %v342_v21  ;;  %345 = vst [vmem:[%s1301_s5 + $0xa0] sm:$0xff] %v344_v22  ;;  %v352_v26 = vld [vmem:[%s1293_s30 + $0x540] sm:$0xff]  ;;  %v354_v27 = vld [vmem:[%s1293_s30 + $0x578] sm:$0xff] }
  0x20   : > { %347 = vst [vmem:[%s1301_s5 + $0xa8] sm:$0xff] %v346_v23  ;;  %349 = vst [vmem:[%s1301_s5 + $0xb0] sm:$0xff] %v348_v24  ;;  %v356_v28 = vld [vmem:[%s1293_s30 + $0x5b0] sm:$0xff]  ;;  %v358_v29 = vld [vmem:[%s1293_s30 + $0x5e8] sm:$0xff] }
  0x21   : > { %351 = vst [vmem:[%s1301_s5 + $0xb8] sm:$0xff] %v350_v25  ;;  %353 = vst [vmem:[%s1301_s5 + $0xc0] sm:$0xff] %v352_v26  ;;  %v360_v30 = vld [vmem:[%s1293_s30 + $0x620] sm:$0xff]  ;;  %v362_v31 = vld [vmem:[%s1293_s30 + $0x658] sm:$0xff] }
  0x22   : > { %355 = vst [vmem:[%s1301_s5 + $0xc8] sm:$0xff] %v354_v27  ;;  %357 = vst [vmem:[%s1301_s5 + $0xd0] sm:$0xff] %v356_v28  ;;  %v364_v32 = vld [vmem:[%s1293_s30 + $0x690] sm:$0xff]  ;;  %v366_v33 = vld [vmem:[%s1293_s30 + $0x6c8] sm:$0xff] }
  0x23   : > { %359 = vst [vmem:[%s1301_s5 + $0xd8] sm:$0xff] %v358_v29  ;;  %361 = vst [vmem:[%s1301_s5 + $0xe0] sm:$0xff] %v360_v30  ;;  %v368_v34 = vld [vmem:[%s1293_s30 + $0x700] sm:$0xff]  ;;  %v370_v35 = vld [vmem:[%s1293_s30 + $0x738] sm:$0xff] }
  0x24   : > { %363 = vst [vmem:[%s1301_s5 + $0xe8] sm:$0xff] %v362_v31  ;;  %365 = vst [vmem:[%s1301_s5 + $0xf0] sm:$0xff] %v364_v32  ;;  %v372_v36 = vld [vmem:[%s1293_s30 + $0x770] sm:$0xff]  ;;  %v374_v37 = vld [vmem:[%s1293_s30 + $0x7a8] sm:$0xff] }
  0x25   : > { %367 = vst [vmem:[%s1301_s5 + $0xf8] sm:$0xff] %v366_v33  ;;  %369 = vst [vmem:[%s1301_s5 + $0x100] sm:$0xff] %v368_v34  ;;  %v376_v38 = vld [vmem:[%s1293_s30 + $0x7e0] sm:$0xff]  ;;  %v378_v39 = vld [vmem:[%s1293_s30 + $0x818] sm:$0xff] }
  0x26   : > { %371 = vst [vmem:[%s1301_s5 + $0x108] sm:$0xff] %v370_v35  ;;  %373 = vst [vmem:[%s1301_s5 + $0x110] sm:$0xff] %v372_v36  ;;  %v380_v40 = vld [vmem:[%s1293_s30 + $0x850] sm:$0xff]  ;;  %v382_v41 = vld [vmem:[%s1293_s30 + $0x888] sm:$0xff] }
  0x27   : > { %375 = vst [vmem:[%s1301_s5 + $0x118] sm:$0xff] %v374_v37  ;;  %377 = vst [vmem:[%s1301_s5 + $0x120] sm:$0xff] %v376_v38  ;;  %v384_v42 = vld [vmem:[%s1293_s30 + $0x8c0] sm:$0xff]  ;;  %v386_v43 = vld [vmem:[%s1293_s30 + $0x8f8] sm:$0xff] }
  0x28   : > { %379 = vst [vmem:[%s1301_s5 + $0x128] sm:$0xff] %v378_v39  ;;  %381 = vst [vmem:[%s1301_s5 + $0x130] sm:$0xff] %v380_v40  ;;  %v388_v44 = vld [vmem:[%s1293_s30 + $0x930] sm:$0xff]  ;;  %v390_v45 = vld [vmem:[%s1293_s30 + $0x968] sm:$0xff] }
  0x29   : > { %383 = vst [vmem:[%s1301_s5 + $0x138] sm:$0xff] %v382_v41  ;;  %385 = vst [vmem:[%s1301_s5 + $0x140] sm:$0xff] %v384_v42  ;;  %v392_v46 = vld [vmem:[%s1293_s30 + $0x9a0] sm:$0xff]  ;;  %v394_v47 = vld [vmem:[%s1293_s30 + $0x9d8] sm:$0xff] }
  0x2a   : > { %387 = vst [vmem:[%s1301_s5 + $0x148] sm:$0xff] %v386_v43  ;;  %389 = vst [vmem:[%s1301_s5 + $0x150] sm:$0xff] %v388_v44  ;;  %v396_v48 = vld [vmem:[%s1293_s30 + $0xa10] sm:$0xff]  ;;  %v398_v49 = vld [vmem:[%s1293_s30 + $0xa48] sm:$0xff] }
  0x2b   : > { %391 = vst [vmem:[%s1301_s5 + $0x158] sm:$0xff] %v390_v45  ;;  %393 = vst [vmem:[%s1301_s5 + $0x160] sm:$0xff] %v392_v46  ;;  %v400_v50 = vld [vmem:[%s1293_s30 + $0xa80] sm:$0xff]  ;;  %v402_v51 = vld [vmem:[%s1293_s30 + $0xab8] sm:$0xff] }
  0x2c   : > { %395 = vst [vmem:[%s1301_s5 + $0x168] sm:$0xff] %v394_v47  ;;  %397 = vst [vmem:[%s1301_s5 + $0x170] sm:$0xff] %v396_v48  ;;  %v404_v52 = vld [vmem:[%s1293_s30 + $0xaf0] sm:$0xff]  ;;  %v406_v53 = vld [vmem:[%s1293_s30 + $0xb28] sm:$0xff] }
  0x2d   : > { %399 = vst [vmem:[%s1301_s5 + $0x178] sm:$0xff] %v398_v49  ;;  %401 = vst [vmem:[%s1301_s5 + $0x180] sm:$0xff] %v400_v50  ;;  %v408_v54 = vld [vmem:[%s1293_s30 + $0xb60] sm:$0xff]  ;;  %v410_v55 = vld [vmem:[%s1293_s30 + $0xb98] sm:$0xff] }
  0x2e   : > { %403 = vst [vmem:[%s1301_s5 + $0x188] sm:$0xff] %v402_v51  ;;  %405 = vst [vmem:[%s1301_s5 + $0x190] sm:$0xff] %v404_v52  ;;  %v412_v56 = vld [vmem:[%s1293_s30 + $0xbd0] sm:$0xff]  ;;  %v414_v57 = vld [vmem:[%s1293_s30 + $0xc08] sm:$0xff] }
  0x2f   : > { %407 = vst [vmem:[%s1301_s5 + $0x198] sm:$0xff] %v406_v53  ;;  %409 = vst [vmem:[%s1301_s5 + $0x1a0] sm:$0xff] %v408_v54 }
  0x30   : > { %411 = vst [vmem:[%s1301_s5 + $0x1a8] sm:$0xff] %v410_v55  ;;  %413 = vst [vmem:[%s1301_s5 + $0x1b0] sm:$0xff] %v412_v56 }
  0x31   : > { %415 = vst [vmem:[%s1301_s5 + $0x1b8] sm:$0xff] %v414_v57 }
  0x32 PF: > { %p1020_p5 = scmp.ge.s32.totalorder %s1224_s21, 1  ;;  %p420_p6 = scmp.lt.s32.totalorder %s1224_s21, 8 }
  0x34   : > { %p421_p7 = pnand %p1020_p5, %p420_p6 }
  0x35   : > { %s427_s6 = sand.u32 (!%p421_p7), 1, %s1216_s19   ;;  %v1415_v58 = vld.sshfl [vmem:[%s1505_s0] sm:$0x33 pattern:$0x75316420] (!%p421_p7)  ;;  %v527_v59 = vlaneseq (!%p421_p7)  ;;  %v1227_v0 = vmov (!%p421_p7), 0  }
  0x36   : > { %424 = sbr.rel (%p421_p7) target bundleno = 360 (0x168), region = 70  ;;  %v909_v60 = vld [vmem:[#allocation2] sm:$0x1] (!%p421_p7)  ;;  %v1226_v61 = vmov (!%p421_p7), 1966171168   ;;  %1113 = vset.pattern.permute.xlu0 (!%p421_p7), %v1227_v0  ;;  %v523_v3 = vcombine.high (!%p421_p7), %v1415_v58, %v1415_v58  ;;  %vm823_vm0 = vcmask (!%p421_p7), 523264  }
  0x37   : > { %s1086_s9 = smul.u32 (!%p421_p7), 448, %s427_s6  ;;  %v525_v62 = vunpack.c.l.s4 (!%p421_p7), %v1226_v61  ;;  %v1418_v63 = vshrl.u32 (!%p421_p7), %v527_v59, 7  ;;  %912 = vperm.xlu0 (!%p421_p7), %1113, %v909_v60   ;;  %v921_v1 = vld [vmem:[#allocation3] sm:$0x1] (!%p421_p7)  ;;  %s1021_s11 = sshll.u32 (!%p421_p7), %s1014_s2, 1  ;;  %vm955_vm1 = vcmp.lt.s32.totalorder (!%p421_p7), %v527_v59, 256 }
  0x38   : > { %p453_p8 = scmp.lt.s32.totalorder (!%p421_p7), %s1021_s11, 13 }
  0x39   : > { %s1420_s10 = scalar_lea.vmem (!%p421_p7), [#allocation4], %s1086_s9  ;;  %v526_v4 = vunpack.c.0.s8 (!%p421_p7), %v525_v62 }
  0x3a   : > { %v1114_v2 = vld [vmem:[%s1420_s10 + $0x4] ss:$8 sps:$4 sm:$0xff] (!%p421_p7)   ;;  %v1116_v5 = vld [vmem:[%s1420_s10] ss:$8 sps:$4 sm:$0xff] (!%p421_p7)   ;;  %v1117_v6 = vld [vmem:[%s1420_s10 + $0x14] ss:$8 sps:$4 sm:$0xff] (!%p421_p7)  }
  0x3b   : > { %827 = vmatprep.subr.bf16.mxu1 (!%p421_p7), %v1114_v2  ;;  %v1428_v7 = vsub.s32 (!%p421_p7), %v526_v4, %v1418_v63  ;;  %v1119_v8 = vld [vmem:[%s1420_s10 + $0x10] ss:$8 sps:$4 sm:$0xff] (!%p421_p7)   ;;  %924 = vperm.xlu0 (!%p421_p7), %1113, %v921_v1   ;;  %v1120_v9 = vld [vmem:[%s1420_s10 + $0x24] ss:$8 sps:$4 sm:$0xff] (!%p421_p7)   ;;  %v1128_v12 = vld [vmem:[%s1420_s10 + $0x100] ss:$8 sps:$4 sm:$0xff] (!%p421_p7)  }
  0x3c   : > { %828 = vmatpush1.bf16.msra.mxu1 (!%p421_p7), %v1116_v5  ;;  %v1126_v11 = vld [vmem:[%s1420_s10 + $0x104] ss:$8 sps:$4 sm:$0xff] (!%p421_p7)   ;;  %v1122_v14 = vld [vmem:[%s1420_s10 + $0x20] ss:$8 sps:$4 sm:$0xff] (!%p421_p7)   ;;  %v1123_v15 = vld [vmem:[%s1420_s10 + $0x34] ss:$8 sps:$4 sm:$0xff] (!%p421_p7)  }
  0x3d   : > { %829 = vmatprep.subr.bf16.mxu1 %v1117_v6  ;;  %v537_v10 = vrot.slane %v523_v3, %v1428_v7  ;;  %868 = vmatprep.subr.bf16.mxu0 %v1126_v11  ;;  %v1132_v16 = vld [vmem:[%s1420_s10 + $0x114] ss:$8 sps:$4 sm:$0xff]   ;;  %v1134_v17 = vld [vmem:[%s1420_s10 + $0x110] ss:$8 sps:$4 sm:$0xff]   ;;  %v1138_v19 = vld [vmem:[%s1420_s10 + $0x124] ss:$8 sps:$4 sm:$0xff]   ;;  %v530_v57 = vrot.slane %v1415_v58, %v1428_v7 }
  0x3e   : > { %869 = vmatpush1.bf16.msra.mxu0 %v1128_v12  ;;  %v1125_v18 = vld [vmem:[%s1420_s10 + $0x30] ss:$8 sps:$4 sm:$0xff]   ;;  %v1129_v20 = vld [vmem:[%s1420_s10 + $0x44] ss:$8 sps:$4 sm:$0xff]   ;;  %v1140_v21 = vld [vmem:[%s1420_s10 + $0x120] ss:$8 sps:$4 sm:$0xff]  }
  0x3f   : > { %v539_v13 = vcombine.high %v537_v10, %v537_v10  ;;  %859 = vmatprep.mubr.bf16.mxu1 %v537_v10  ;;  %870 = vmatprep.subr.bf16.mxu0 %v1132_v16  ;;  %v1144_v22 = vld [vmem:[%s1420_s10 + $0x134] ss:$8 sps:$4 sm:$0xff]   ;;  %v1131_v23 = vld [vmem:[%s1420_s10 + $0x40] ss:$8 sps:$4 sm:$0xff]   ;;  %v1146_v25 = vld [vmem:[%s1420_s10 + $0x130] ss:$8 sps:$4 sm:$0xff]   ;;  %v538_v0 = vcombine.high %v530_v57, %v530_v57 }
  0x40   : > { %830 = vmatpush1.bf16.msra.mxu1 %v1119_v8  ;;  %v1135_v24 = vld [vmem:[%s1420_s10 + $0x54] ss:$8 sps:$4 sm:$0xff]   ;;  %v1150_v26 = vld [vmem:[%s1420_s10 + $0x144] ss:$8 sps:$4 sm:$0xff]   ;;  %v1137_v27 = vld [vmem:[%s1420_s10 + $0x50] ss:$8 sps:$4 sm:$0xff]  }
  0x41   : > { %831 = vmatprep.subr.bf16.mxu1 %v1120_v9  ;;  %1079 = vmatprep.mubr.msk.bf16.mxu0 %vm823_vm0, %v539_v13  ;;  %v1141_v28 = vld [vmem:[%s1420_s10 + $0x64] ss:$8 sps:$4 sm:$0xff]   ;;  %v1152_v29 = vld [vmem:[%s1420_s10 + $0x140] ss:$8 sps:$4 sm:$0xff]   ;;  %v1156_v30 = vld [vmem:[%s1420_s10 + $0x154] ss:$8 sps:$4 sm:$0xff]  }
  0x42   : > { %871 = vmatpush1.bf16.msra.mxu0 %v1134_v17  ;;  %v1143_v31 = vld [vmem:[%s1420_s10 + $0x60] ss:$8 sps:$4 sm:$0xff]   ;;  %v1147_v32 = vld [vmem:[%s1420_s10 + $0x74] ss:$8 sps:$4 sm:$0xff]   ;;  %v1158_v33 = vld [vmem:[%s1420_s10 + $0x150] ss:$8 sps:$4 sm:$0xff]  }
  0x43   : > { %872 = vmatprep.subr.bf16.mxu0 %v1138_v19  ;;  %v1162_v34 = vld [vmem:[%s1420_s10 + $0x164] ss:$8 sps:$4 sm:$0xff]   ;;  %v1149_v35 = vld [vmem:[%s1420_s10 + $0x70] ss:$8 sps:$4 sm:$0xff]   ;;  %v1164_v37 = vld [vmem:[%s1420_s10 + $0x160] ss:$8 sps:$4 sm:$0xff]  }
  0x44   : > { %832 = vmatpush1.bf16.msra.mxu1 %v1122_v14  ;;  %v1153_v36 = vld [vmem:[%s1420_s10 + $0x84] ss:$8 sps:$4 sm:$0xff]   ;;  %v1168_v38 = vld [vmem:[%s1420_s10 + $0x174] ss:$8 sps:$4 sm:$0xff]   ;;  %v1155_v39 = vld [vmem:[%s1420_s10 + $0x80] ss:$8 sps:$4 sm:$0xff]  }
  0x45   : > { %833 = vmatprep.subr.bf16.mxu1 %v1123_v15  ;;  %v1159_v40 = vld [vmem:[%s1420_s10 + $0x94] ss:$8 sps:$4 sm:$0xff]   ;;  %v1170_v41 = vld [vmem:[%s1420_s10 + $0x170] ss:$8 sps:$4 sm:$0xff]   ;;  %v1174_v42 = vld [vmem:[%s1420_s10 + $0x184] ss:$8 sps:$4 sm:$0xff]  }
  0x46   : > { %873 = vmatpush1.bf16.msra.mxu0 %v1140_v21  ;;  %v1161_v43 = vld [vmem:[%s1420_s10 + $0x90] ss:$8 sps:$4 sm:$0xff]   ;;  %v1165_v44 = vld [vmem:[%s1420_s10 + $0xa4] ss:$8 sps:$4 sm:$0xff]   ;;  %v1176_v45 = vld [vmem:[%s1420_s10 + $0x180] ss:$8 sps:$4 sm:$0xff]  }
  0x47   : > { %874 = vmatprep.subr.bf16.mxu0 %v1144_v22  ;;  %v1180_v46 = vld [vmem:[%s1420_s10 + $0x194] ss:$8 sps:$4 sm:$0xff]   ;;  %v1167_v47 = vld [vmem:[%s1420_s10 + $0xa0] ss:$8 sps:$4 sm:$0xff]   ;;  %v1182_v49 = vld [vmem:[%s1420_s10 + $0x190] ss:$8 sps:$4 sm:$0xff]  }
  0x48   : > { %834 = vmatpush1.bf16.msra.mxu1 %v1125_v18  ;;  %v1171_v48 = vld [vmem:[%s1420_s10 + $0xb4] ss:$8 sps:$4 sm:$0xff]   ;;  %v1186_v50 = vld [vmem:[%s1420_s10 + $0x1a4] ss:$8 sps:$4 sm:$0xff]   ;;  %v1173_v51 = vld [vmem:[%s1420_s10 + $0xb0] ss:$8 sps:$4 sm:$0xff]  }
  0x49   : > { %835 = vmatprep.subr.bf16.mxu1 %v1129_v20  ;;  %v1177_v52 = vld [vmem:[%s1420_s10 + $0xc4] ss:$8 sps:$4 sm:$0xff]   ;;  %v1188_v53 = vld [vmem:[%s1420_s10 + $0x1a0] ss:$8 sps:$4 sm:$0xff]   ;;  %v1192_v54 = vld [vmem:[%s1420_s10 + $0x1b4] ss:$8 sps:$4 sm:$0xff]  }
  0x4a   : > { %875 = vmatpush1.bf16.msra.mxu0 %v1146_v25  ;;  %v1179_v55 = vld [vmem:[%s1420_s10 + $0xc0] ss:$8 sps:$4 sm:$0xff]   ;;  %v1183_v56 = vld [vmem:[%s1420_s10 + $0xd4] ss:$8 sps:$4 sm:$0xff]   ;;  %v1194_v60 = vld [vmem:[%s1420_s10 + $0x1b0] ss:$8 sps:$4 sm:$0xff]  }
  0x4b   : > { %876 = vmatprep.subr.bf16.mxu0 %v1150_v26  ;;  %v1185_v61 = vld [vmem:[%s1420_s10 + $0xd0] ss:$8 sps:$4 sm:$0xff]   ;;  %v1189_v62 = vld [vmem:[%s1420_s10 + $0xe4] ss:$8 sps:$4 sm:$0xff]   ;;  %v1191_v1 = vld [vmem:[%s1420_s10 + $0xe0] ss:$8 sps:$4 sm:$0xff]  }
  0x4c   : > { %836 = vmatpush1.bf16.msra.mxu1 %v1131_v23  ;;  %v1195_v2 = vld [vmem:[%s1420_s10 + $0xf4] ss:$8 sps:$4 sm:$0xff]   ;;  %v1197_v3 = vld [vmem:[%s1420_s10 + $0xf0] ss:$8 sps:$4 sm:$0xff]   ;;  %v917_v9 = vsub.s32 0, %v1418_v63  ;;  %s1514_s11 = smov (!%p453_p8, %s1021_s11), 13 }
  0x4d   : > { %837 = vmatprep.subr.bf16.mxu1 %v1135_v24  ;;  %s455_s14 = scalar_lea.vmem %s1508_s4, %s1514_s11 }
  0x4e   : > { %877 = vmatpush1.bf16.msra.mxu0 %v1152_v29 }
  0x4f   : > { %878 = vmatprep.subr.bf16.mxu0 %v1156_v30 }
  0x50   : > { %838 = vmatpush1.bf16.msra.mxu1 %v1137_v27 }
  0x51   : > { %839 = vmatprep.subr.bf16.mxu1 %v1141_v28 }
  0x52   : > { %879 = vmatpush1.bf16.msra.mxu0 %v1158_v33 }
  0x53   : > { %880 = vmatprep.subr.bf16.mxu0 %v1162_v34 }
  0x54   : > { %840 = vmatpush1.bf16.msra.mxu1 %v1143_v31 }
  0x55   : > { %841 = vmatprep.subr.bf16.mxu1 %v1147_v32 }
  0x56   : > { %881 = vmatpush1.bf16.msra.mxu0 %v1164_v37 }
  0x57   : > { %882 = vmatprep.subr.bf16.mxu0 %v1168_v38 }
  0x58   : > { %842 = vmatpush1.bf16.msra.mxu1 %v1149_v35 }
  0x59   : > { %843 = vmatprep.subr.bf16.mxu1 %v1153_v36 }
  0x5a   : > { %883 = vmatpush1.bf16.msra.mxu0 %v1170_v41 }
  0x5b   : > { %884 = vmatprep.subr.bf16.mxu0 %v1174_v42 }
  0x5c   : > { %844 = vmatpush1.bf16.msra.mxu1 %v1155_v39 }
  0x5d   : > { %845 = vmatprep.subr.bf16.mxu1 %v1159_v40 }
  0x5e   : > { %885 = vmatpush1.bf16.msra.mxu0 %v1176_v45 }
  0x5f   : > { %886 = vmatprep.subr.bf16.mxu0 %v1180_v46 }
  0x60   : > { %846 = vmatpush1.bf16.msra.mxu1 %v1161_v43 }
  0x61   : > { %847 = vmatprep.subr.bf16.mxu1 %v1165_v44 }
  0x62   : > { %887 = vmatpush1.bf16.msra.mxu0 %v1182_v49 }
  0x63   : > { %888 = vmatprep.subr.bf16.mxu0 %v1186_v50 }
  0x64   : > { %848 = vmatpush1.bf16.msra.mxu1 %v1167_v47 }
  0x65   : > { %849 = vmatprep.subr.bf16.mxu1 %v1171_v48 }
  0x66   : > { %889 = vmatpush1.bf16.msra.mxu0 %v1188_v53 }
  0x67   : > { %890 = vmatprep.subr.bf16.mxu0 %v1192_v54 }
  0x68   : > { %850 = vmatpush1.bf16.msra.mxu1 %v1173_v51 }
  0x69   : > { %851 = vmatprep.subr.bf16.mxu1 %v1177_v52 }
  0x6a   : > { %891 = vmatpush1.bf16.msra.mxu0 %v1194_v60 }
  0x6c   : > { %852 = vmatpush1.bf16.msra.mxu1 %v1179_v55 }
  0x6d   : > { %853 = vmatprep.subr.bf16.mxu1 %v1183_v56  ;;  %901 = vmatmul.mubr.bf16.vlgmr.msra.gmra.mrb[0].mxu0 %v538_v0 }
  0x70   : > { %854 = vmatpush1.bf16.msra.mxu1 %v1185_v61 }
  0x71   : > { %855 = vmatprep.subr.bf16.mxu1 %v1189_v62 }
  0x74   : > { %856 = vmatpush1.bf16.msra.mxu1 %v1191_v1 }
  0x75   : > { %857 = vmatprep.subr.bf16.mxu1 %v1195_v2 }
  0x78   : > { %858 = vmatpush1.bf16.msra.mxu1 %v1197_v3 }
  0x7b   : > { %860 = vmatmul.mubr.bf16.vlgmr.msra.gmra.mrb[0].mxu1 %v530_v57 }
  0xb6   : > { %v913_v8 = vpop.permute.xlu0 %912 }
  0xb7   : > { %v918_v10 = vrot.slane %v913_v8, %v917_v9 }
  0xba   : > { %v925_v11 = vpop.permute.xlu0 %924 }
  0xbb   : > { %v930_v17 = vrot.slane %v925_v11, %v917_v9 }
 0x140   : > { %v902_v58 = vpop.f32.mrb[0].mxu0 }
 0x141   : > { %v904_v4 = vpop.f32.mrb[1].mxu0 }
 0x142   : > { %v906_v5 = vpop.f32.mrb[2].mxu0 }
 0x143   : > { %v907_v6 = vpop.f32.mrb[3].mxu0 }
 0x14e   : > { %v861_v12 = vpop.f32.mrb[0].mxu1 }
 0x14f   : > { %v903_v13 = vadd.f32 %v902_v58, %v861_v12  ;;  %v863_v14 = vpop.f32.mrb[1].mxu1 }
 0x150   : > { %v905_v15 = vadd.f32 %v904_v4, %v863_v14  ;;  %v865_v16 = vpop.f32.mrb[2].mxu1 }
 0x151   : > { %v919_v18 = vmul.f32 %v918_v10, %v903_v13  ;;  %v866_v19 = vpop.f32.mrb[3].mxu1 }
 0x152   : > { %v920_v20 = vmul.f32 %v918_v10, %v905_v15 }
 0x153   : > { %v931_v21 = vadd.f32 %v930_v17, %v919_v18 }
 0x154   : > { %v932_v22 = vadd.f32 %v930_v17, %v920_v20 }
 0x155   : > { %1198 = vtanh.f32 %v931_v21 }
 0x156   : > { %1200 = vtanh.f32 %v932_v22 }
 0x15f   : > { %v1199_v63 = vpop.eup %1198 }
 0x160   : > { %v1201_v23 = vpop.eup %1200 }
 0x161   : > { %v937_v24 = vcombine.low %v1199_v63, %v1201_v23 }
 0x163   : > { %v944_v25 = vrot.slane %v937_v24, %v1428_v7 }
 0x165   : > { %v951_v26 = vrot.slane %v944_v25, %v1428_v7 }
 0x167   : > { %957 = vst.msk [vmem:[%s455_s14] sm:$0x3] %vm955_vm1, %v951_v26 }
 0x168 PF: > { %p15_p9 = scmp.ge.s32.totalorder %s1276_s3, 9   ;;  %s1510_s19 = smov %s1220_s20 }
 0x169   : > { %s1511_s20 = smov %s1285_s24  ;;  %s1512_s21 = smov %s1276_s3 }
 0x16a   :  { %17 = sbr.rel (!%p15_p9) target bundleno = 5 (0x5), region = 109 }

</bundles_post_ra>
